<compile_context>
chip_gen: v5e
topology: v5e:2x2
jax: 0.10.0
libtpu: 0.0.40
codegen_flags: <defaults>
</compile_context>

<pallas_src>
import functools

import jax
import jax.numpy as jnp
import numpy as np
from jax import lax
from jax.experimental import pallas as pl
from jax.experimental.pallas import tpu as pltpu


def _widx(py, px, dr, dc, ci, co, C):
    """Flat index into the collapsed sub-pixel weight vector (py,px,dr,dc,ci,co)."""
    return ((((py * 2 + px) * 2 + dr) * 2 + dc) * C + ci) * C + co


def _upsample2x_kernel(x_ref, r_ref, g_ref, w_ref, b_ref, o_ref, ext_ref, p_ref,
                       *, TH, W, C, H, KK):
    # x_ref  : (1, C, H, W)  unpadded original-resolution image, resident per n.
    # r_ref  : (2*TH, 4*(TH+2)) 0/1 row-shift + height-interleave matrix (VMEM).
    # g_ref  : (4*W, 2*W)       0/1 col-shift + width-interleave matrix (VMEM).
    # w_ref  : (16*C*C,) collapsed sub-pixel weights (SMEM, scalar indexed).
    # b_ref  : (C,)      bias (SMEM).
    # o_ref  : output strip; (1, C, TH, 4W) if KK==2 else (1, C, 2*TH, 2*W).
    # ext_ref: (C, TH+2, W) VMEM scratch - halo-extended row window.
    # p_ref  : (4*(TH+2), 4*W) VMEM scratch - assembled sub-pixel pieces.
    f32 = jnp.float32
    s = pl.program_id(1)
    row0 = pl.multiple_of(s * TH, TH)          # first original row of this strip

    # ---- halo-extended window, built once per strip (in-kernel zero padding) ----
    top_i = jnp.maximum(row0 - 1, 0)           # clamped so we never read OOB VMEM
    bot_i = jnp.minimum(row0 + TH, H - 1)
    top_m = (row0 > 0).astype(f32)             # 0.0 exactly at the image top border
    bot_m = (row0 + TH < H).astype(f32)        # 0.0 exactly at the image bottom border
    ext_ref[:, 0:1, :] = x_ref[0, :, pl.ds(top_i, 1), :].astype(f32) * top_m
    ext_ref[:, 1:TH + 1, :] = x_ref[0, :, pl.ds(row0, TH), :].astype(f32)
    ext_ref[:, TH + 1:TH + 2, :] = x_ref[0, :, pl.ds(bot_i, 1), :].astype(f32) * bot_m

    R = r_ref[...]                             # hoisted constants (built in wrapper)
    G = g_ref[...]

    for co in range(C):
        # 16 sub-pixel accumulators (py, dr, px, dc), each (TH+2, W).  Channel
        # contraction = VPU broadcast-FMA with SMEM scalars (small-C path).
        accs = [None] * 16
        for ci in range(C):
            e = ext_ref[ci]                    # (TH+2, W)
            for py in range(2):
                for dr in range(2):
                    for px in range(2):
                        for dc in range(2):
                            idx = ((py * 2 + dr) * 2 + px) * 2 + dc
                            t = w_ref[_widx(py, px, dr, dc, ci, co, C)] * e
                            accs[idx] = t if ci == 0 else accs[idx] + t

        # Assemble the pieces into P (VMEM scratch; plain masked vector stores,
        # no register-level concats / relayouts).
        for py in range(2):
            for dr in range(2):
                for px in range(2):
                    for dc in range(2):
                        idx = ((py * 2 + dr) * 2 + px) * 2 + dc
                        gr, gc = 2 * py + dr, 2 * px + dc
                        p_ref[gr * (TH + 2):(gr + 1) * (TH + 2),
                              gc * W:(gc + 1) * W] = accs[idx]

        # Two MXU matmuls per channel: rows (shift + interleave), then columns
        # (shift + interleave + zero border).  Bias added once on the result.
        t_rows = jnp.dot(R, p_ref[...], preferred_element_type=f32)      # (2TH, 4W)
        u = jnp.dot(t_rows, G, preferred_element_type=f32) + b_ref[co]   # (2TH, 2W)
        if KK == 2:
            # lane-pack the (even, odd) output rows of one original row side by
            # side -> stored rows are 4W wide; the wrapper reshape is free.
            u = jnp.concatenate([u[:TH, :], u[TH:, :]], axis=1)          # (TH, 4W)
        o_ref[0, co, :, :] = u.astype(o_ref.dtype)


def _pick_row_tile(H, W, C, N, row_tile):
    def ok(t):
        return t >= 1 and H % t == 0 and (t % 8 == 0 or t == H)

    if row_tile is not None:
        if not ok(row_tile):
            raise ValueError(f"row_tile={row_tile} must divide H={H} and be a "
                             f"multiple of 8 (or equal H).")
        th = row_tile
    else:
        th = H
        for t in (256, 128, 64, 32, 16, 8):    # big tiles first (v6e wants them)
            if ok(t):
                th = t
                break
    # Keep the double-buffered output strip modest for v7x's 64 MiB VMEM.
    while C * (2 * th) * (2 * W) * 4 * 2 > (8 << 20) and ok(th // 2):
        th //= 2
    # v7x has 2 TensorCores: prefer >= 2 grid steps so both get work.
    if N * (H // th) < 2 and ok(th // 2):
        th //= 2
    return th


def upsample2x(x_nchw, weight_oihw, bias, *, row_tile=None):
    """Equivalent of: Conv2d(C, C, 3, padding=1)(F.interpolate(x, 2, 'nearest'))."""
    N, C, H, W = x_nchw.shape
    TH = _pick_row_tile(H, W, C, N, row_tile)
    KK = 2 if (2 * W < 128) else 1             # lane-pack 2 output rows per store

    # Collapse (nearest-2x upsample o conv3x3) into 4 sub-pixel 2x2 kernels:
    #   Weff[py, px, dr, dc, ci, co]
    m = jnp.array([[[1., 0., 0.], [0., 1., 1.]],
                   [[1., 1., 0.], [0., 0., 1.]]], dtype=jnp.float32)
    weff = jnp.einsum('pdh,qcw,oihw->pqdcio', m, m,
                      weight_oihw.astype(jnp.float32))
    w_flat = weff.reshape(-1)                        # (16*C*C,) -> SMEM
    b_vec = bias.astype(jnp.float32).reshape(C)      # (C,)      -> SMEM

    # --- precomputed 0/1 shift + interleave matrices (hoisted out of the kernel) ---
    # R: output row (2i+py) reads ext row (i + py + dr) of the (py,dr) group.
    Rm = np.zeros((2 * TH, 4 * (TH + 2)), np.float32)
    for py in range(2):
        for dr in range(2):
            gr = 2 * py + dr
            for i in range(TH):
                orow = (py * TH + i) if KK == 2 else (2 * i + py)
                Rm[orow, gr * (TH + 2) + (i + py + dr)] = 1.0
    # G: output col (2j+px) reads input col (j+px+dc-1) of the (px,dc) group;
    # out-of-range columns are simply absent -> exact zero padding at the border.
    Gm = np.zeros((4 * W, 2 * W), np.float32)
    for px in range(2):
        for dc in range(2):
            gc = 2 * px + dc
            for j in range(W):
                k = j + px + dc - 1
                if 0 <= k < W:
                    Gm[gc * W + k, 2 * j + px] = 1.0
    Rj = jnp.asarray(Rm)
    Gj = jnp.asarray(Gm)

    if KK == 2:
        out_struct = jax.ShapeDtypeStruct((N, C, H, 4 * W), x_nchw.dtype)
        out_spec = pl.BlockSpec((1, C, TH, 4 * W), lambda n, s: (n, 0, s, 0))
    else:
        out_struct = jax.ShapeDtypeStruct((N, C, 2 * H, 2 * W), x_nchw.dtype)
        out_spec = pl.BlockSpec((1, C, 2 * TH, 2 * W), lambda n, s: (n, 0, s, 0))

    # Explicit VMEM budget (review: v5e default scoped VMEM is only 16 MiB,
    # v7x physical VMEM is 64 MiB).
    itms = x_nchw.dtype.itemsize
    in_bytes = C * H * W * itms
    out_bytes = C * (2 * TH) * (2 * W) * itms
    aux_bytes = (Rm.size + Gm.size) * 4
    scratch_bytes = (C * (TH + 2) * W + 4 * (TH + 2) * 4 * W) * 4
    need = 2 * (in_bytes + out_bytes + aux_bytes) + scratch_bytes + (2 << 20)
    vmem_limit = int(min(64 << 20, max(32 << 20, need)))

    kernel = functools.partial(_upsample2x_kernel, TH=TH, W=W, C=C, H=H, KK=KK)
    out = pl.pallas_call(
        kernel,
        out_shape=out_struct,
        grid_spec=pltpu.PrefetchScalarGridSpec(
            num_scalar_prefetch=0,
            grid=(N, H // TH),
            in_specs=[
                # Unpadded original-res image: resident in VMEM across strips.
                pl.BlockSpec((1, C, H, W), lambda n, s: (n, 0, 0, 0)),
                pl.BlockSpec((2 * TH, 4 * (TH + 2)), lambda n, s: (0, 0)),
                pl.BlockSpec((4 * W, 2 * W), lambda n, s: (0, 0)),
                pl.BlockSpec(memory_space=pltpu.MemorySpace.SMEM),
                pl.BlockSpec(memory_space=pltpu.MemorySpace.SMEM),
            ],
            out_specs=out_spec,
            scratch_shapes=[
                pltpu.VMEM((C, TH + 2, W), jnp.float32),
                pltpu.VMEM((4 * (TH + 2), 4 * W), jnp.float32),
            ],
        ),
        compiler_params=pltpu.CompilerParams(
            dimension_semantics=("parallel", "parallel"),
            vmem_limit_bytes=vmem_limit),
    )(x_nchw, Rj, Gj, w_flat, b_vec)

    # Free row-major bitcast back to NCHW at 2x resolution.
    return out.reshape(N, C, 2 * H, 2 * W)


def _reference(x_nchw, weight_oihw, bias):
    x_up = jnp.repeat(jnp.repeat(x_nchw, 2, axis=2), 2, axis=3)
    y = lax.conv_general_dilated(
        x_up, weight_oihw, window_strides=(1, 1), padding="SAME",
        dimension_numbers=("NCHW", "OIHW", "NCHW"))
    return y + bias[None, :, None, None]


if __name__ == "__main__":
    # Small shapes consistent with the module: NCHW input.
    N, C, H, W = 2, 4, 16, 16

    key = jax.random.PRNGKey(0)
    kx, kw, kb = jax.random.split(key, 3)

    x = jax.random.normal(kx, (N, C, H, W), dtype=jnp.float32)

    # Deterministic Conv2d(C, C, 3, padding=1) init (PyTorch-style uniform bounds).
    fan_in = C * 3 * 3
    bound = 1.0 / np.sqrt(fan_in)
    weight = jax.random.uniform(kw, (C, C, 3, 3), jnp.float32, -bound, bound)
    bias = jax.random.uniform(kb, (C,), jnp.float32, -bound, bound)

    # row_tile=8 -> 2 row strips per image, exercising both the border-halo and
    # the interior-halo (real neighbor row) paths across the strip grid axis.
    out = upsample2x(x, weight, bias, row_tile=8)
    out = jax.block_until_ready(out)

    ref = jax.block_until_ready(_reference(x, weight, bias))
    np.testing.assert_allclose(np.asarray(out), np.asarray(ref),
                               rtol=1e-4, atol=1e-4)

    print("KERNEL_OK")
</pallas_src>

<mosaic_0001>
module attributes {stable_mosaic.version = 11 : i64} {
  func.func @_upsample2x_kernel(%arg0: i32, %arg1: i32, %arg2: memref<1x4x16x16xf32, #tpu.memory_space<vmem>>, %arg3: memref<16x40xf32, #tpu.memory_space<vmem>>, %arg4: memref<64x32xf32, #tpu.memory_space<vmem>>, %arg5: memref<256xf32, #tpu.memory_space<smem>>, %arg6: memref<4xf32, #tpu.memory_space<smem>>, %arg7: memref<1x4x8x64xf32, #tpu.memory_space<vmem>>, %arg8: memref<4x10x16xf32, #tpu.memory_space<vmem>>, %arg9: memref<40x64xf32, #tpu.memory_space<vmem>>) attributes {dimension_semantics = [#tpu.dimension_semantics<parallel>, #tpu.dimension_semantics<parallel>], iteration_bounds = array<i64: 2, 2>, scalar_prefetch = 0 : i64, scratch_operands = 2 : i64, tpu.core_type = #tpu.core_type<tc>, window_params = [{transform_indices = @transform_0, window_bounds = array<i64: 1, 4, 16, 16>}, {pipeline_mode = #tpu.pipeline_mode<synchronous>, transform_indices = @transform_1, window_bounds = array<i64: 16, 40>}, {pipeline_mode = #tpu.pipeline_mode<synchronous>, transform_indices = @transform_2, window_bounds = array<i64: 64, 32>}, {transform_indices = @transform_3, window_bounds = array<i64: 256>}, {transform_indices = @transform_4, window_bounds = array<i64: 4>}, {transform_indices = @transform_5, window_bounds = array<i64: 1, 4, 8, 64>}]} {
    %c8_i32 = arith.constant 8 : i32
    %0 = arith.muli %arg1, %c8_i32 : i32
    %1 = tpu.assume_multiple %0, 8 : i32
    %c1_i32 = arith.constant 1 : i32
    %2 = arith.subi %1, %c1_i32 : i32
    %c0_i32 = arith.constant 0 : i32
    %3 = arith.maxsi %2, %c0_i32 : i32
    %c8_i32_0 = arith.constant 8 : i32
    %4 = arith.addi %1, %c8_i32_0 : i32
    %c15_i32 = arith.constant 15 : i32
    %5 = arith.minsi %4, %c15_i32 : i32
    %c0_i32_1 = arith.constant 0 : i32
    %6 = arith.cmpi sgt, %1, %c0_i32_1 : i32
    %7 = arith.extui %6 : i1 to i32
    %8 = arith.sitofp %7 : i32 to f32
    %c8_i32_2 = arith.constant 8 : i32
    %9 = arith.addi %1, %c8_i32_2 : i32
    %c16_i32 = arith.constant 16 : i32
    %10 = arith.cmpi slt, %9, %c16_i32 : i32
    %11 = arith.extui %10 : i1 to i32
    %12 = arith.sitofp %11 : i32 to f32
    %c0 = arith.constant 0 : index
    %c0_3 = arith.constant 0 : index
    %13 = arith.index_cast %3 : i32 to index
    %c0_4 = arith.constant 0 : index
    %14 = vector.load %arg2[%c0, %c0_3, %13, %c0_4] : memref<1x4x16x16xf32, #tpu.memory_space<vmem>>, vector<1x4x1x16xf32>
    %15 = vector.shape_cast %14 : vector<1x4x1x16xf32> to vector<4x1x16xf32>
    %16 = vector.broadcast %8 : f32 to vector<4x1x16xf32>
    %17 = arith.mulf %15, %16 : vector<4x1x16xf32>
    %c0_5 = arith.constant 0 : index
    %c0_6 = arith.constant 0 : index
    %c0_7 = arith.constant 0 : index
    %18 = vector.load %arg8[%c0_5, %c0_6, %c0_7] : memref<4x10x16xf32, #tpu.memory_space<vmem>>, vector<4x1x16xf32>
    tpu.vector_store %arg8[%c0_5, %c0_6, %c0_7], %17 {strides = array<i32>} : memref<4x10x16xf32, #tpu.memory_space<vmem>>, vector<4x1x16xf32>,
    %c0_8 = arith.constant 0 : index
    %c0_9 = arith.constant 0 : index
    %19 = arith.index_cast %1 : i32 to index
    %c0_10 = arith.constant 0 : index
    %20 = vector.load %arg2[%c0_8, %c0_9, %19, %c0_10] : memref<1x4x16x16xf32, #tpu.memory_space<vmem>>, vector<1x4x8x16xf32>
    %21 = vector.shape_cast %20 : vector<1x4x8x16xf32> to vector<4x8x16xf32>
    %c0_11 = arith.constant 0 : index
    %c1 = arith.constant 1 : index
    %c0_12 = arith.constant 0 : index
    %22 = vector.load %arg8[%c0_11, %c1, %c0_12] : memref<4x10x16xf32, #tpu.memory_space<vmem>>, vector<4x8x16xf32>
    tpu.vector_store %arg8[%c0_11, %c1, %c0_12], %21 {strides = array<i32>} : memref<4x10x16xf32, #tpu.memory_space<vmem>>, vector<4x8x16xf32>,
    %c0_13 = arith.constant 0 : index
    %c0_14 = arith.constant 0 : index
    %23 = arith.index_cast %5 : i32 to index
    %c0_15 = arith.constant 0 : index
    %24 = vector.load %arg2[%c0_13, %c0_14, %23, %c0_15] : memref<1x4x16x16xf32, #tpu.memory_space<vmem>>, vector<1x4x1x16xf32>
    %25 = vector.shape_cast %24 : vector<1x4x1x16xf32> to vector<4x1x16xf32>
    %26 = vector.broadcast %12 : f32 to vector<4x1x16xf32>
    %27 = arith.mulf %25, %26 : vector<4x1x16xf32>
    %c0_16 = arith.constant 0 : index
    %c9 = arith.constant 9 : index
    %c0_17 = arith.constant 0 : index
    %28 = vector.load %arg8[%c0_16, %c9, %c0_17] : memref<4x10x16xf32, #tpu.memory_space<vmem>>, vector<4x1x16xf32>
    tpu.vector_store %arg8[%c0_16, %c9, %c0_17], %27 {strides = array<i32>} : memref<4x10x16xf32, #tpu.memory_space<vmem>>, vector<4x1x16xf32>,
    %c0_18 = arith.constant 0 : index
    %c0_19 = arith.constant 0 : index
    %29 = vector.load %arg3[%c0_18, %c0_19] : memref<16x40xf32, #tpu.memory_space<vmem>>, vector<16x40xf32>
    %c0_20 = arith.constant 0 : index
    %c0_21 = arith.constant 0 : index
    %30 = vector.load %arg4[%c0_20, %c0_21] : memref<64x32xf32, #tpu.memory_space<vmem>>, vector<64x32xf32>
    %c0_22 = arith.constant 0 : index
    %c0_23 = arith.constant 0 : index
    %c0_24 = arith.constant 0 : index
    %31 = vector.load %arg8[%c0_22, %c0_23, %c0_24] : memref<4x10x16xf32, #tpu.memory_space<vmem>>, vector<1x10x16xf32>
    %32 = vector.shape_cast %31 : vector<1x10x16xf32> to vector<10x16xf32>
    %c0_25 = arith.constant 0 : index
    %33 = memref.load %arg5[%c0_25] : memref<256xf32, #tpu.memory_space<smem>>
    %34 = vector.broadcast %33 : f32 to vector<10x16xf32>
    %35 = arith.mulf %34, %32 : vector<10x16xf32>
    %c16 = arith.constant 16 : index
    %36 = memref.load %arg5[%c16] : memref<256xf32, #tpu.memory_space<smem>>
    %37 = vector.broadcast %36 : f32 to vector<10x16xf32>
    %38 = arith.mulf %37, %32 : vector<10x16xf32>
    %c64 = arith.constant 64 : index
    %39 = memref.load %arg5[%c64] : memref<256xf32, #tpu.memory_space<smem>>
    %40 = vector.broadcast %39 : f32 to vector<10x16xf32>
    %41 = arith.mulf %40, %32 : vector<10x16xf32>
    %c80 = arith.constant 80 : index
    %42 = memref.load %arg5[%c80] : memref<256xf32, #tpu.memory_space<smem>>
    %43 = vector.broadcast %42 : f32 to vector<10x16xf32>
    %44 = arith.mulf %43, %32 : vector<10x16xf32>
    %c32 = arith.constant 32 : index
    %45 = memref.load %arg5[%c32] : memref<256xf32, #tpu.memory_space<smem>>
    %46 = vector.broadcast %45 : f32 to vector<10x16xf32>
    %47 = arith.mulf %46, %32 : vector<10x16xf32>
    %c48 = arith.constant 48 : index
    %48 = memref.load %arg5[%c48] : memref<256xf32, #tpu.memory_space<smem>>
    %49 = vector.broadcast %48 : f32 to vector<10x16xf32>
    %50 = arith.mulf %49, %32 : vector<10x16xf32>
    %c96 = arith.constant 96 : index
    %51 = memref.load %arg5[%c96] : memref<256xf32, #tpu.memory_space<smem>>
    %52 = vector.broadcast %51 : f32 to vector<10x16xf32>
    %53 = arith.mulf %52, %32 : vector<10x16xf32>
    %c112 = arith.constant 112 : index
    %54 = memref.load %arg5[%c112] : memref<256xf32, #tpu.memory_space<smem>>
    %55 = vector.broadcast %54 : f32 to vector<10x16xf32>
    %56 = arith.mulf %55, %32 : vector<10x16xf32>
    %c128 = arith.constant 128 : index
    %57 = memref.load %arg5[%c128] : memref<256xf32, #tpu.memory_space<smem>>
    %58 = vector.broadcast %57 : f32 to vector<10x16xf32>
    %59 = arith.mulf %58, %32 : vector<10x16xf32>
    %c144 = arith.constant 144 : index
    %60 = memref.load %arg5[%c144] : memref<256xf32, #tpu.memory_space<smem>>
    %61 = vector.broadcast %60 : f32 to vector<10x16xf32>
    %62 = arith.mulf %61, %32 : vector<10x16xf32>
    %c192 = arith.constant 192 : index
    %63 = memref.load %arg5[%c192] : memref<256xf32, #tpu.memory_space<smem>>
    %64 = vector.broadcast %63 : f32 to vector<10x16xf32>
    %65 = arith.mulf %64, %32 : vector<10x16xf32>
    %c208 = arith.constant 208 : index
    %66 = memref.load %arg5[%c208] : memref<256xf32, #tpu.memory_space<smem>>
    %67 = vector.broadcast %66 : f32 to vector<10x16xf32>
    %68 = arith.mulf %67, %32 : vector<10x16xf32>
    %c160 = arith.constant 160 : index
    %69 = memref.load %arg5[%c160] : memref<256xf32, #tpu.memory_space<smem>>
    %70 = vector.broadcast %69 : f32 to vector<10x16xf32>
    %71 = arith.mulf %70, %32 : vector<10x16xf32>
    %c176 = arith.constant 176 : index
    %72 = memref.load %arg5[%c176] : memref<256xf32, #tpu.memory_space<smem>>
    %73 = vector.broadcast %72 : f32 to vector<10x16xf32>
    %74 = arith.mulf %73, %32 : vector<10x16xf32>
    %c224 = arith.constant 224 : index
    %75 = memref.load %arg5[%c224] : memref<256xf32, #tpu.memory_space<smem>>
    %76 = vector.broadcast %75 : f32 to vector<10x16xf32>
    %77 = arith.mulf %76, %32 : vector<10x16xf32>
    %c240 = arith.constant 240 : index
    %78 = memref.load %arg5[%c240] : memref<256xf32, #tpu.memory_space<smem>>
    %79 = vector.broadcast %78 : f32 to vector<10x16xf32>
    %80 = arith.mulf %79, %32 : vector<10x16xf32>
    %c1_26 = arith.constant 1 : index
    %c0_27 = arith.constant 0 : index
    %c0_28 = arith.constant 0 : index
    %81 = vector.load %arg8[%c1_26, %c0_27, %c0_28] : memref<4x10x16xf32, #tpu.memory_space<vmem>>, vector<1x10x16xf32>
    %82 = vector.shape_cast %81 : vector<1x10x16xf32> to vector<10x16xf32>
    %c4 = arith.constant 4 : index
    %83 = memref.load %arg5[%c4] : memref<256xf32, #tpu.memory_space<smem>>
    %84 = vector.broadcast %83 : f32 to vector<10x16xf32>
    %85 = arith.mulf %84, %82 : vector<10x16xf32>
    %86 = arith.addf %35, %85 : vector<10x16xf32>
    %c20 = arith.constant 20 : index
    %87 = memref.load %arg5[%c20] : memref<256xf32, #tpu.memory_space<smem>>
    %88 = vector.broadcast %87 : f32 to vector<10x16xf32>
    %89 = arith.mulf %88, %82 : vector<10x16xf32>
    %90 = arith.addf %38, %89 : vector<10x16xf32>
    %c68 = arith.constant 68 : index
    %91 = memref.load %arg5[%c68] : memref<256xf32, #tpu.memory_space<smem>>
    %92 = vector.broadcast %91 : f32 to vector<10x16xf32>
    %93 = arith.mulf %92, %82 : vector<10x16xf32>
    %94 = arith.addf %41, %93 : vector<10x16xf32>
    %c84 = arith.constant 84 : index
    %95 = memref.load %arg5[%c84] : memref<256xf32, #tpu.memory_space<smem>>
    %96 = vector.broadcast %95 : f32 to vector<10x16xf32>
    %97 = arith.mulf %96, %82 : vector<10x16xf32>
    %98 = arith.addf %44, %97 : vector<10x16xf32>
    %c36 = arith.constant 36 : index
    %99 = memref.load %arg5[%c36] : memref<256xf32, #tpu.memory_space<smem>>
    %100 = vector.broadcast %99 : f32 to vector<10x16xf32>
    %101 = arith.mulf %100, %82 : vector<10x16xf32>
    %102 = arith.addf %47, %101 : vector<10x16xf32>
    %c52 = arith.constant 52 : index
    %103 = memref.load %arg5[%c52] : memref<256xf32, #tpu.memory_space<smem>>
    %104 = vector.broadcast %103 : f32 to vector<10x16xf32>
    %105 = arith.mulf %104, %82 : vector<10x16xf32>
    %106 = arith.addf %50, %105 : vector<10x16xf32>
    %c100 = arith.constant 100 : index
    %107 = memref.load %arg5[%c100] : memref<256xf32, #tpu.memory_space<smem>>
    %108 = vector.broadcast %107 : f32 to vector<10x16xf32>
    %109 = arith.mulf %108, %82 : vector<10x16xf32>
    %110 = arith.addf %53, %109 : vector<10x16xf32>
    %c116 = arith.constant 116 : index
    %111 = memref.load %arg5[%c116] : memref<256xf32, #tpu.memory_space<smem>>
    %112 = vector.broadcast %111 : f32 to vector<10x16xf32>
    %113 = arith.mulf %112, %82 : vector<10x16xf32>
    %114 = arith.addf %56, %113 : vector<10x16xf32>
    %c132 = arith.constant 132 : index
    %115 = memref.load %arg5[%c132] : memref<256xf32, #tpu.memory_space<smem>>
    %116 = vector.broadcast %115 : f32 to vector<10x16xf32>
    %117 = arith.mulf %116, %82 : vector<10x16xf32>
    %118 = arith.addf %59, %117 : vector<10x16xf32>
    %c148 = arith.constant 148 : index
    %119 = memref.load %arg5[%c148] : memref<256xf32, #tpu.memory_space<smem>>
    %120 = vector.broadcast %119 : f32 to vector<10x16xf32>
    %121 = arith.mulf %120, %82 : vector<10x16xf32>
    %122 = arith.addf %62, %121 : vector<10x16xf32>
    %c196 = arith.constant 196 : index
    %123 = memref.load %arg5[%c196] : memref<256xf32, #tpu.memory_space<smem>>
    %124 = vector.broadcast %123 : f32 to vector<10x16xf32>
    %125 = arith.mulf %124, %82 : vector<10x16xf32>
    %126 = arith.addf %65, %125 : vector<10x16xf32>
    %c212 = arith.constant 212 : index
    %127 = memref.load %arg5[%c212] : memref<256xf32, #tpu.memory_space<smem>>
    %128 = vector.broadcast %127 : f32 to vector<10x16xf32>
    %129 = arith.mulf %128, %82 : vector<10x16xf32>
    %130 = arith.addf %68, %129 : vector<10x16xf32>
    %c164 = arith.constant 164 : index
    %131 = memref.load %arg5[%c164] : memref<256xf32, #tpu.memory_space<smem>>
    %132 = vector.broadcast %131 : f32 to vector<10x16xf32>
    %133 = arith.mulf %132, %82 : vector<10x16xf32>
    %134 = arith.addf %71, %133 : vector<10x16xf32>
    %c180 = arith.constant 180 : index
    %135 = memref.load %arg5[%c180] : memref<256xf32, #tpu.memory_space<smem>>
    %136 = vector.broadcast %135 : f32 to vector<10x16xf32>
    %137 = arith.mulf %136, %82 : vector<10x16xf32>
    %138 = arith.addf %74, %137 : vector<10x16xf32>
    %c228 = arith.constant 228 : index
    %139 = memref.load %arg5[%c228] : memref<256xf32, #tpu.memory_space<smem>>
    %140 = vector.broadcast %139 : f32 to vector<10x16xf32>
    %141 = arith.mulf %140, %82 : vector<10x16xf32>
    %142 = arith.addf %77, %141 : vector<10x16xf32>
    %c244 = arith.constant 244 : index
    %143 = memref.load %arg5[%c244] : memref<256xf32, #tpu.memory_space<smem>>
    %144 = vector.broadcast %143 : f32 to vector<10x16xf32>
    %145 = arith.mulf %144, %82 : vector<10x16xf32>
    %146 = arith.addf %80, %145 : vector<10x16xf32>
    %c2 = arith.constant 2 : index
    %c0_29 = arith.constant 0 : index
    %c0_30 = arith.constant 0 : index
    %147 = vector.load %arg8[%c2, %c0_29, %c0_30] : memref<4x10x16xf32, #tpu.memory_space<vmem>>, vector<1x10x16xf32>
    %148 = vector.shape_cast %147 : vector<1x10x16xf32> to vector<10x16xf32>
    %c8 = arith.constant 8 : index
    %149 = memref.load %arg5[%c8] : memref<256xf32, #tpu.memory_space<smem>>
    %150 = vector.broadcast %149 : f32 to vector<10x16xf32>
    %151 = arith.mulf %150, %148 : vector<10x16xf32>
    %152 = arith.addf %86, %151 : vector<10x16xf32>
    %c24 = arith.constant 24 : index
    %153 = memref.load %arg5[%c24] : memref<256xf32, #tpu.memory_space<smem>>
    %154 = vector.broadcast %153 : f32 to vector<10x16xf32>
    %155 = arith.mulf %154, %148 : vector<10x16xf32>
    %156 = arith.addf %90, %155 : vector<10x16xf32>
    %c72 = arith.constant 72 : index
    %157 = memref.load %arg5[%c72] : memref<256xf32, #tpu.memory_space<smem>>
    %158 = vector.broadcast %157 : f32 to vector<10x16xf32>
    %159 = arith.mulf %158, %148 : vector<10x16xf32>
    %160 = arith.addf %94, %159 : vector<10x16xf32>
    %c88 = arith.constant 88 : index
    %161 = memref.load %arg5[%c88] : memref<256xf32, #tpu.memory_space<smem>>
    %162 = vector.broadcast %161 : f32 to vector<10x16xf32>
    %163 = arith.mulf %162, %148 : vector<10x16xf32>
    %164 = arith.addf %98, %163 : vector<10x16xf32>
    %c40 = arith.constant 40 : index
    %165 = memref.load %arg5[%c40] : memref<256xf32, #tpu.memory_space<smem>>
    %166 = vector.broadcast %165 : f32 to vector<10x16xf32>
    %167 = arith.mulf %166, %148 : vector<10x16xf32>
    %168 = arith.addf %102, %167 : vector<10x16xf32>
    %c56 = arith.constant 56 : index
    %169 = memref.load %arg5[%c56] : memref<256xf32, #tpu.memory_space<smem>>
    %170 = vector.broadcast %169 : f32 to vector<10x16xf32>
    %171 = arith.mulf %170, %148 : vector<10x16xf32>
    %172 = arith.addf %106, %171 : vector<10x16xf32>
    %c104 = arith.constant 104 : index
    %173 = memref.load %arg5[%c104] : memref<256xf32, #tpu.memory_space<smem>>
    %174 = vector.broadcast %173 : f32 to vector<10x16xf32>
    %175 = arith.mulf %174, %148 : vector<10x16xf32>
    %176 = arith.addf %110, %175 : vector<10x16xf32>
    %c120 = arith.constant 120 : index
    %177 = memref.load %arg5[%c120] : memref<256xf32, #tpu.memory_space<smem>>
    %178 = vector.broadcast %177 : f32 to vector<10x16xf32>
    %179 = arith.mulf %178, %148 : vector<10x16xf32>
    %180 = arith.addf %114, %179 : vector<10x16xf32>
    %c136 = arith.constant 136 : index
    %181 = memref.load %arg5[%c136] : memref<256xf32, #tpu.memory_space<smem>>
    %182 = vector.broadcast %181 : f32 to vector<10x16xf32>
    %183 = arith.mulf %182, %148 : vector<10x16xf32>
    %184 = arith.addf %118, %183 : vector<10x16xf32>
    %c152 = arith.constant 152 : index
    %185 = memref.load %arg5[%c152] : memref<256xf32, #tpu.memory_space<smem>>
    %186 = vector.broadcast %185 : f32 to vector<10x16xf32>
    %187 = arith.mulf %186, %148 : vector<10x16xf32>
    %188 = arith.addf %122, %187 : vector<10x16xf32>
    %c200 = arith.constant 200 : index
    %189 = memref.load %arg5[%c200] : memref<256xf32, #tpu.memory_space<smem>>
    %190 = vector.broadcast %189 : f32 to vector<10x16xf32>
    %191 = arith.mulf %190, %148 : vector<10x16xf32>
    %192 = arith.addf %126, %191 : vector<10x16xf32>
    %c216 = arith.constant 216 : index
    %193 = memref.load %arg5[%c216] : memref<256xf32, #tpu.memory_space<smem>>
    %194 = vector.broadcast %193 : f32 to vector<10x16xf32>
    %195 = arith.mulf %194, %148 : vector<10x16xf32>
    %196 = arith.addf %130, %195 : vector<10x16xf32>
    %c168 = arith.constant 168 : index
    %197 = memref.load %arg5[%c168] : memref<256xf32, #tpu.memory_space<smem>>
    %198 = vector.broadcast %197 : f32 to vector<10x16xf32>
    %199 = arith.mulf %198, %148 : vector<10x16xf32>
    %200 = arith.addf %134, %199 : vector<10x16xf32>
    %c184 = arith.constant 184 : index
    %201 = memref.load %arg5[%c184] : memref<256xf32, #tpu.memory_space<smem>>
    %202 = vector.broadcast %201 : f32 to vector<10x16xf32>
    %203 = arith.mulf %202, %148 : vector<10x16xf32>
    %204 = arith.addf %138, %203 : vector<10x16xf32>
    %c232 = arith.constant 232 : index
    %205 = memref.load %arg5[%c232] : memref<256xf32, #tpu.memory_space<smem>>
    %206 = vector.broadcast %205 : f32 to vector<10x16xf32>
    %207 = arith.mulf %206, %148 : vector<10x16xf32>
    %208 = arith.addf %142, %207 : vector<10x16xf32>
    %c248 = arith.constant 248 : index
    %209 = memref.load %arg5[%c248] : memref<256xf32, #tpu.memory_space<smem>>
    %210 = vector.broadcast %209 : f32 to vector<10x16xf32>
    %211 = arith.mulf %210, %148 : vector<10x16xf32>
    %212 = arith.addf %146, %211 : vector<10x16xf32>
    %c3 = arith.constant 3 : index
    %c0_31 = arith.constant 0 : index
    %c0_32 = arith.constant 0 : index
    %213 = vector.load %arg8[%c3, %c0_31, %c0_32] : memref<4x10x16xf32, #tpu.memory_space<vmem>>, vector<1x10x16xf32>
    %214 = vector.shape_cast %213 : vector<1x10x16xf32> to vector<10x16xf32>
    %c12 = arith.constant 12 : index
    %215 = memref.load %arg5[%c12] : memref<256xf32, #tpu.memory_space<smem>>
    %216 = vector.broadcast %215 : f32 to vector<10x16xf32>
    %217 = arith.mulf %216, %214 : vector<10x16xf32>
    %218 = arith.addf %152, %217 : vector<10x16xf32>
    %c28 = arith.constant 28 : index
    %219 = memref.load %arg5[%c28] : memref<256xf32, #tpu.memory_space<smem>>
    %220 = vector.broadcast %219 : f32 to vector<10x16xf32>
    %221 = arith.mulf %220, %214 : vector<10x16xf32>
    %222 = arith.addf %156, %221 : vector<10x16xf32>
    %c76 = arith.constant 76 : index
    %223 = memref.load %arg5[%c76] : memref<256xf32, #tpu.memory_space<smem>>
    %224 = vector.broadcast %223 : f32 to vector<10x16xf32>
    %225 = arith.mulf %224, %214 : vector<10x16xf32>
    %226 = arith.addf %160, %225 : vector<10x16xf32>
    %c92 = arith.constant 92 : index
    %227 = memref.load %arg5[%c92] : memref<256xf32, #tpu.memory_space<smem>>
    %228 = vector.broadcast %227 : f32 to vector<10x16xf32>
    %229 = arith.mulf %228, %214 : vector<10x16xf32>
    %230 = arith.addf %164, %229 : vector<10x16xf32>
    %c44 = arith.constant 44 : index
    %231 = memref.load %arg5[%c44] : memref<256xf32, #tpu.memory_space<smem>>
    %232 = vector.broadcast %231 : f32 to vector<10x16xf32>
    %233 = arith.mulf %232, %214 : vector<10x16xf32>
    %234 = arith.addf %168, %233 : vector<10x16xf32>
    %c60 = arith.constant 60 : index
    %235 = memref.load %arg5[%c60] : memref<256xf32, #tpu.memory_space<smem>>
    %236 = vector.broadcast %235 : f32 to vector<10x16xf32>
    %237 = arith.mulf %236, %214 : vector<10x16xf32>
    %238 = arith.addf %172, %237 : vector<10x16xf32>
    %c108 = arith.constant 108 : index
    %239 = memref.load %arg5[%c108] : memref<256xf32, #tpu.memory_space<smem>>
    %240 = vector.broadcast %239 : f32 to vector<10x16xf32>
    %241 = arith.mulf %240, %214 : vector<10x16xf32>
    %242 = arith.addf %176, %241 : vector<10x16xf32>
    %c124 = arith.constant 124 : index
    %243 = memref.load %arg5[%c124] : memref<256xf32, #tpu.memory_space<smem>>
    %244 = vector.broadcast %243 : f32 to vector<10x16xf32>
    %245 = arith.mulf %244, %214 : vector<10x16xf32>
    %246 = arith.addf %180, %245 : vector<10x16xf32>
    %c140 = arith.constant 140 : index
    %247 = memref.load %arg5[%c140] : memref<256xf32, #tpu.memory_space<smem>>
    %248 = vector.broadcast %247 : f32 to vector<10x16xf32>
    %249 = arith.mulf %248, %214 : vector<10x16xf32>
    %250 = arith.addf %184, %249 : vector<10x16xf32>
    %c156 = arith.constant 156 : index
    %251 = memref.load %arg5[%c156] : memref<256xf32, #tpu.memory_space<smem>>
    %252 = vector.broadcast %251 : f32 to vector<10x16xf32>
    %253 = arith.mulf %252, %214 : vector<10x16xf32>
    %254 = arith.addf %188, %253 : vector<10x16xf32>
    %c204 = arith.constant 204 : index
    %255 = memref.load %arg5[%c204] : memref<256xf32, #tpu.memory_space<smem>>
    %256 = vector.broadcast %255 : f32 to vector<10x16xf32>
    %257 = arith.mulf %256, %214 : vector<10x16xf32>
    %258 = arith.addf %192, %257 : vector<10x16xf32>
    %c220 = arith.constant 220 : index
    %259 = memref.load %arg5[%c220] : memref<256xf32, #tpu.memory_space<smem>>
    %260 = vector.broadcast %259 : f32 to vector<10x16xf32>
    %261 = arith.mulf %260, %214 : vector<10x16xf32>
    %262 = arith.addf %196, %261 : vector<10x16xf32>
    %c172 = arith.constant 172 : index
    %263 = memref.load %arg5[%c172] : memref<256xf32, #tpu.memory_space<smem>>
    %264 = vector.broadcast %263 : f32 to vector<10x16xf32>
    %265 = arith.mulf %264, %214 : vector<10x16xf32>
    %266 = arith.addf %200, %265 : vector<10x16xf32>
    %c188 = arith.constant 188 : index
    %267 = memref.load %arg5[%c188] : memref<256xf32, #tpu.memory_space<smem>>
    %268 = vector.broadcast %267 : f32 to vector<10x16xf32>
    %269 = arith.mulf %268, %214 : vector<10x16xf32>
    %270 = arith.addf %204, %269 : vector<10x16xf32>
    %c236 = arith.constant 236 : index
    %271 = memref.load %arg5[%c236] : memref<256xf32, #tpu.memory_space<smem>>
    %272 = vector.broadcast %271 : f32 to vector<10x16xf32>
    %273 = arith.mulf %272, %214 : vector<10x16xf32>
    %274 = arith.addf %208, %273 : vector<10x16xf32>
    %c252 = arith.constant 252 : index
    %275 = memref.load %arg5[%c252] : memref<256xf32, #tpu.memory_space<smem>>
    %276 = vector.broadcast %275 : f32 to vector<10x16xf32>
    %277 = arith.mulf %276, %214 : vector<10x16xf32>
    %278 = arith.addf %212, %277 : vector<10x16xf32>
    %c0_33 = arith.constant 0 : index
    %c0_34 = arith.constant 0 : index
    %279 = vector.load %arg9[%c0_33, %c0_34] : memref<40x64xf32, #tpu.memory_space<vmem>>, vector<10x16xf32>
    tpu.vector_store %arg9[%c0_33, %c0_34], %218 {strides = array<i32>} : memref<40x64xf32, #tpu.memory_space<vmem>>, vector<10x16xf32>,
    %c0_35 = arith.constant 0 : index
    %c16_36 = arith.constant 16 : index
    %280 = vector.load %arg9[%c0_35, %c16_36] : memref<40x64xf32, #tpu.memory_space<vmem>>, vector<10x16xf32>
    tpu.vector_store %arg9[%c0_35, %c16_36], %222 {strides = array<i32>} : memref<40x64xf32, #tpu.memory_space<vmem>>, vector<10x16xf32>,
    %c0_37 = arith.constant 0 : index
    %c32_38 = arith.constant 32 : index
    %281 = vector.load %arg9[%c0_37, %c32_38] : memref<40x64xf32, #tpu.memory_space<vmem>>, vector<10x16xf32>
    tpu.vector_store %arg9[%c0_37, %c32_38], %226 {strides = array<i32>} : memref<40x64xf32, #tpu.memory_space<vmem>>, vector<10x16xf32>,
    %c0_39 = arith.constant 0 : index
    %c48_40 = arith.constant 48 : index
    %282 = vector.load %arg9[%c0_39, %c48_40] : memref<40x64xf32, #tpu.memory_space<vmem>>, vector<10x16xf32>
    tpu.vector_store %arg9[%c0_39, %c48_40], %230 {strides = array<i32>} : memref<40x64xf32, #tpu.memory_space<vmem>>, vector<10x16xf32>,
    %c10 = arith.constant 10 : index
    %c0_41 = arith.constant 0 : index
    %283 = vector.load %arg9[%c10, %c0_41] : memref<40x64xf32, #tpu.memory_space<vmem>>, vector<10x16xf32>
    tpu.vector_store %arg9[%c10, %c0_41], %234 {strides = array<i32>} : memref<40x64xf32, #tpu.memory_space<vmem>>, vector<10x16xf32>,
    %c10_42 = arith.constant 10 : index
    %c16_43 = arith.constant 16 : index
    %284 = vector.load %arg9[%c10_42, %c16_43] : memref<40x64xf32, #tpu.memory_space<vmem>>, vector<10x16xf32>
    tpu.vector_store %arg9[%c10_42, %c16_43], %238 {strides = array<i32>} : memref<40x64xf32, #tpu.memory_space<vmem>>, vector<10x16xf32>,
    %c10_44 = arith.constant 10 : index
    %c32_45 = arith.constant 32 : index
    %285 = vector.load %arg9[%c10_44, %c32_45] : memref<40x64xf32, #tpu.memory_space<vmem>>, vector<10x16xf32>
    tpu.vector_store %arg9[%c10_44, %c32_45], %242 {strides = array<i32>} : memref<40x64xf32, #tpu.memory_space<vmem>>, vector<10x16xf32>,
    %c10_46 = arith.constant 10 : index
    %c48_47 = arith.constant 48 : index
    %286 = vector.load %arg9[%c10_46, %c48_47] : memref<40x64xf32, #tpu.memory_space<vmem>>, vector<10x16xf32>
    tpu.vector_store %arg9[%c10_46, %c48_47], %246 {strides = array<i32>} : memref<40x64xf32, #tpu.memory_space<vmem>>, vector<10x16xf32>,
    %c20_48 = arith.constant 20 : index
    %c0_49 = arith.constant 0 : index
    %287 = vector.load %arg9[%c20_48, %c0_49] : memref<40x64xf32, #tpu.memory_space<vmem>>, vector<10x16xf32>
    tpu.vector_store %arg9[%c20_48, %c0_49], %250 {strides = array<i32>} : memref<40x64xf32, #tpu.memory_space<vmem>>, vector<10x16xf32>,
    %c20_50 = arith.constant 20 : index
    %c16_51 = arith.constant 16 : index
    %288 = vector.load %arg9[%c20_50, %c16_51] : memref<40x64xf32, #tpu.memory_space<vmem>>, vector<10x16xf32>
    tpu.vector_store %arg9[%c20_50, %c16_51], %254 {strides = array<i32>} : memref<40x64xf32, #tpu.memory_space<vmem>>, vector<10x16xf32>,
    %c20_52 = arith.constant 20 : index
    %c32_53 = arith.constant 32 : index
    %289 = vector.load %arg9[%c20_52, %c32_53] : memref<40x64xf32, #tpu.memory_space<vmem>>, vector<10x16xf32>
    tpu.vector_store %arg9[%c20_52, %c32_53], %258 {strides = array<i32>} : memref<40x64xf32, #tpu.memory_space<vmem>>, vector<10x16xf32>,
    %c20_54 = arith.constant 20 : index
    %c48_55 = arith.constant 48 : index
    %290 = vector.load %arg9[%c20_54, %c48_55] : memref<40x64xf32, #tpu.memory_space<vmem>>, vector<10x16xf32>
    tpu.vector_store %arg9[%c20_54, %c48_55], %262 {strides = array<i32>} : memref<40x64xf32, #tpu.memory_space<vmem>>, vector<10x16xf32>,
    %c30 = arith.constant 30 : index
    %c0_56 = arith.constant 0 : index
    %291 = vector.load %arg9[%c30, %c0_56] : memref<40x64xf32, #tpu.memory_space<vmem>>, vector<10x16xf32>
    tpu.vector_store %arg9[%c30, %c0_56], %266 {strides = array<i32>} : memref<40x64xf32, #tpu.memory_space<vmem>>, vector<10x16xf32>,
    %c30_57 = arith.constant 30 : index
    %c16_58 = arith.constant 16 : index
    %292 = vector.load %arg9[%c30_57, %c16_58] : memref<40x64xf32, #tpu.memory_space<vmem>>, vector<10x16xf32>
    tpu.vector_store %arg9[%c30_57, %c16_58], %270 {strides = array<i32>} : memref<40x64xf32, #tpu.memory_space<vmem>>, vector<10x16xf32>,
    %c30_59 = arith.constant 30 : index
    %c32_60 = arith.constant 32 : index
    %293 = vector.load %arg9[%c30_59, %c32_60] : memref<40x64xf32, #tpu.memory_space<vmem>>, vector<10x16xf32>
    tpu.vector_store %arg9[%c30_59, %c32_60], %274 {strides = array<i32>} : memref<40x64xf32, #tpu.memory_space<vmem>>, vector<10x16xf32>,
    %c30_61 = arith.constant 30 : index
    %c48_62 = arith.constant 48 : index
    %294 = vector.load %arg9[%c30_61, %c48_62] : memref<40x64xf32, #tpu.memory_space<vmem>>, vector<10x16xf32>
    tpu.vector_store %arg9[%c30_61, %c48_62], %278 {strides = array<i32>} : memref<40x64xf32, #tpu.memory_space<vmem>>, vector<10x16xf32>,
    %c0_63 = arith.constant 0 : index
    %c0_64 = arith.constant 0 : index
    %295 = vector.load %arg9[%c0_63, %c0_64] : memref<40x64xf32, #tpu.memory_space<vmem>>, vector<40x64xf32>
    %cst = arith.constant dense<0.000000e+00> : vector<16x64xf32>
    %296 = tpu.matmul %29, %295, %cst {dimension_numbers = #tpu.dot_dimension_numbers<[1], [0], [0], [1], [0, 0, 1, 1], [], []>} : vector<16x40xf32>, vector<40x64xf32>, vector<16x64xf32> -> vector<16x64xf32>
    %cst_65 = arith.constant dense<0.000000e+00> : vector<16x32xf32>
    %297 = tpu.matmul %296, %30, %cst_65 {dimension_numbers = #tpu.dot_dimension_numbers<[1], [0], [0], [1], [0, 0, 1, 1], [], []>} : vector<16x64xf32>, vector<64x32xf32>, vector<16x32xf32> -> vector<16x32xf32>
    %c0_66 = arith.constant 0 : index
    %298 = memref.load %arg6[%c0_66] : memref<4xf32, #tpu.memory_space<smem>>
    %299 = vector.broadcast %298 : f32 to vector<16x32xf32>
    %300 = arith.addf %297, %299 : vector<16x32xf32>
    %301 = vector.extract_strided_slice %300 {offsets = [0, 0], sizes = [8, 32], strides = [1, 1]} : vector<16x32xf32> to vector<8x32xf32>
    %302 = vector.extract_strided_slice %300 {offsets = [8, 0], sizes = [8, 32], strides = [1, 1]} : vector<16x32xf32> to vector<8x32xf32>
    %303 = tpu.concatenate %301, %302 in 1 : vector<8x32xf32>, vector<8x32xf32> -> vector<8x64xf32>
    %c0_67 = arith.constant 0 : index
    %c0_68 = arith.constant 0 : index
    %c0_69 = arith.constant 0 : index
    %c0_70 = arith.constant 0 : index
    %304 = vector.load %arg7[%c0_67, %c0_68, %c0_69, %c0_70] : memref<1x4x8x64xf32, #tpu.memory_space<vmem>>, vector<1x1x8x64xf32>
    %305 = vector.shape_cast %304 : vector<1x1x8x64xf32> to vector<8x64xf32>
    %306 = vector.shape_cast %303 : vector<8x64xf32> to vector<1x1x8x64xf32>
    tpu.vector_store %arg7[%c0_67, %c0_68, %c0_69, %c0_70], %306 {strides = array<i32>} : memref<1x4x8x64xf32, #tpu.memory_space<vmem>>, vector<1x1x8x64xf32>,
    %c0_71 = arith.constant 0 : index
    %c0_72 = arith.constant 0 : index
    %c0_73 = arith.constant 0 : index
    %307 = vector.load %arg8[%c0_71, %c0_72, %c0_73] : memref<4x10x16xf32, #tpu.memory_space<vmem>>, vector<1x10x16xf32>
    %308 = vector.shape_cast %307 : vector<1x10x16xf32> to vector<10x16xf32>
    %c1_74 = arith.constant 1 : index
    %309 = memref.load %arg5[%c1_74] : memref<256xf32, #tpu.memory_space<smem>>
    %310 = vector.broadcast %309 : f32 to vector<10x16xf32>
    %311 = arith.mulf %310, %308 : vector<10x16xf32>
    %c17 = arith.constant 17 : index
    %312 = memref.load %arg5[%c17] : memref<256xf32, #tpu.memory_space<smem>>
    %313 = vector.broadcast %312 : f32 to vector<10x16xf32>
    %314 = arith.mulf %313, %308 : vector<10x16xf32>
    %c65 = arith.constant 65 : index
    %315 = memref.load %arg5[%c65] : memref<256xf32, #tpu.memory_space<smem>>
    %316 = vector.broadcast %315 : f32 to vector<10x16xf32>
    %317 = arith.mulf %316, %308 : vector<10x16xf32>
    %c81 = arith.constant 81 : index
    %318 = memref.load %arg5[%c81] : memref<256xf32, #tpu.memory_space<smem>>
    %319 = vector.broadcast %318 : f32 to vector<10x16xf32>
    %320 = arith.mulf %319, %308 : vector<10x16xf32>
    %c33 = arith.constant 33 : index
    %321 = memref.load %arg5[%c33] : memref<256xf32, #tpu.memory_space<smem>>
    %322 = vector.broadcast %321 : f32 to vector<10x16xf32>
    %323 = arith.mulf %322, %308 : vector<10x16xf32>
    %c49 = arith.constant 49 : index
    %324 = memref.load %arg5[%c49] : memref<256xf32, #tpu.memory_space<smem>>
    %325 = vector.broadcast %324 : f32 to vector<10x16xf32>
    %326 = arith.mulf %325, %308 : vector<10x16xf32>
    %c97 = arith.constant 97 : index
    %327 = memref.load %arg5[%c97] : memref<256xf32, #tpu.memory_space<smem>>
    %328 = vector.broadcast %327 : f32 to vector<10x16xf32>
    %329 = arith.mulf %328, %308 : vector<10x16xf32>
    %c113 = arith.constant 113 : index
    %330 = memref.load %arg5[%c113] : memref<256xf32, #tpu.memory_space<smem>>
    %331 = vector.broadcast %330 : f32 to vector<10x16xf32>
    %332 = arith.mulf %331, %308 : vector<10x16xf32>
    %c129 = arith.constant 129 : index
    %333 = memref.load %arg5[%c129] : memref<256xf32, #tpu.memory_space<smem>>
    %334 = vector.broadcast %333 : f32 to vector<10x16xf32>
    %335 = arith.mulf %334, %308 : vector<10x16xf32>
    %c145 = arith.constant 145 : index
    %336 = memref.load %arg5[%c145] : memref<256xf32, #tpu.memory_space<smem>>
    %337 = vector.broadcast %336 : f32 to vector<10x16xf32>
    %338 = arith.mulf %337, %308 : vector<10x16xf32>
    %c193 = arith.constant 193 : index
    %339 = memref.load %arg5[%c193] : memref<256xf32, #tpu.memory_space<smem>>
    %340 = vector.broadcast %339 : f32 to vector<10x16xf32>
    %341 = arith.mulf %340, %308 : vector<10x16xf32>
    %c209 = arith.constant 209 : index
    %342 = memref.load %arg5[%c209] : memref<256xf32, #tpu.memory_space<smem>>
    %343 = vector.broadcast %342 : f32 to vector<10x16xf32>
    %344 = arith.mulf %343, %308 : vector<10x16xf32>
    %c161 = arith.constant 161 : index
    %345 = memref.load %arg5[%c161] : memref<256xf32, #tpu.memory_space<smem>>
    %346 = vector.broadcast %345 : f32 to vector<10x16xf32>
    %347 = arith.mulf %346, %308 : vector<10x16xf32>
    %c177 = arith.constant 177 : index
    %348 = memref.load %arg5[%c177] : memref<256xf32, #tpu.memory_space<smem>>
    %349 = vector.broadcast %348 : f32 to vector<10x16xf32>
    %350 = arith.mulf %349, %308 : vector<10x16xf32>
    %c225 = arith.constant 225 : index
    %351 = memref.load %arg5[%c225] : memref<256xf32, #tpu.memory_space<smem>>
    %352 = vector.broadcast %351 : f32 to vector<10x16xf32>
    %353 = arith.mulf %352, %308 : vector<10x16xf32>
    %c241 = arith.constant 241 : index
    %354 = memref.load %arg5[%c241] : memref<256xf32, #tpu.memory_space<smem>>
    %355 = vector.broadcast %354 : f32 to vector<10x16xf32>
    %356 = arith.mulf %355, %308 : vector<10x16xf32>
    %c1_75 = arith.constant 1 : index
    %c0_76 = arith.constant 0 : index
    %c0_77 = arith.constant 0 : index
    %357 = vector.load %arg8[%c1_75, %c0_76, %c0_77] : memref<4x10x16xf32, #tpu.memory_space<vmem>>, vector<1x10x16xf32>
    %358 = vector.shape_cast %357 : vector<1x10x16xf32> to vector<10x16xf32>
    %c5 = arith.constant 5 : index
    %359 = memref.load %arg5[%c5] : memref<256xf32, #tpu.memory_space<smem>>
    %360 = vector.broadcast %359 : f32 to vector<10x16xf32>
    %361 = arith.mulf %360, %358 : vector<10x16xf32>
    %362 = arith.addf %311, %361 : vector<10x16xf32>
    %c21 = arith.constant 21 : index
    %363 = memref.load %arg5[%c21] : memref<256xf32, #tpu.memory_space<smem>>
    %364 = vector.broadcast %363 : f32 to vector<10x16xf32>
    %365 = arith.mulf %364, %358 : vector<10x16xf32>
    %366 = arith.addf %314, %365 : vector<10x16xf32>
    %c69 = arith.constant 69 : index
    %367 = memref.load %arg5[%c69] : memref<256xf32, #tpu.memory_space<smem>>
    %368 = vector.broadcast %367 : f32 to vector<10x16xf32>
    %369 = arith.mulf %368, %358 : vector<10x16xf32>
    %370 = arith.addf %317, %369 : vector<10x16xf32>
    %c85 = arith.constant 85 : index
    %371 = memref.load %arg5[%c85] : memref<256xf32, #tpu.memory_space<smem>>
    %372 = vector.broadcast %371 : f32 to vector<10x16xf32>
    %373 = arith.mulf %372, %358 : vector<10x16xf32>
    %374 = arith.addf %320, %373 : vector<10x16xf32>
    %c37 = arith.constant 37 : index
    %375 = memref.load %arg5[%c37] : memref<256xf32, #tpu.memory_space<smem>>
    %376 = vector.broadcast %375 : f32 to vector<10x16xf32>
    %377 = arith.mulf %376, %358 : vector<10x16xf32>
    %378 = arith.addf %323, %377 : vector<10x16xf32>
    %c53 = arith.constant 53 : index
    %379 = memref.load %arg5[%c53] : memref<256xf32, #tpu.memory_space<smem>>
    %380 = vector.broadcast %379 : f32 to vector<10x16xf32>
    %381 = arith.mulf %380, %358 : vector<10x16xf32>
    %382 = arith.addf %326, %381 : vector<10x16xf32>
    %c101 = arith.constant 101 : index
    %383 = memref.load %arg5[%c101] : memref<256xf32, #tpu.memory_space<smem>>
    %384 = vector.broadcast %383 : f32 to vector<10x16xf32>
    %385 = arith.mulf %384, %358 : vector<10x16xf32>
    %386 = arith.addf %329, %385 : vector<10x16xf32>
    %c117 = arith.constant 117 : index
    %387 = memref.load %arg5[%c117] : memref<256xf32, #tpu.memory_space<smem>>
    %388 = vector.broadcast %387 : f32 to vector<10x16xf32>
    %389 = arith.mulf %388, %358 : vector<10x16xf32>
    %390 = arith.addf %332, %389 : vector<10x16xf32>
    %c133 = arith.constant 133 : index
    %391 = memref.load %arg5[%c133] : memref<256xf32, #tpu.memory_space<smem>>
    %392 = vector.broadcast %391 : f32 to vector<10x16xf32>
    %393 = arith.mulf %392, %358 : vector<10x16xf32>
    %394 = arith.addf %335, %393 : vector<10x16xf32>
    %c149 = arith.constant 149 : index
    %395 = memref.load %arg5[%c149] : memref<256xf32, #tpu.memory_space<smem>>
    %396 = vector.broadcast %395 : f32 to vector<10x16xf32>
    %397 = arith.mulf %396, %358 : vector<10x16xf32>
    %398 = arith.addf %338, %397 : vector<10x16xf32>
    %c197 = arith.constant 197 : index
    %399 = memref.load %arg5[%c197] : memref<256xf32, #tpu.memory_space<smem>>
    %400 = vector.broadcast %399 : f32 to vector<10x16xf32>
    %401 = arith.mulf %400, %358 : vector<10x16xf32>
    %402 = arith.addf %341, %401 : vector<10x16xf32>
    %c213 = arith.constant 213 : index
    %403 = memref.load %arg5[%c213] : memref<256xf32, #tpu.memory_space<smem>>
    %404 = vector.broadcast %403 : f32 to vector<10x16xf32>
    %405 = arith.mulf %404, %358 : vector<10x16xf32>
    %406 = arith.addf %344, %405 : vector<10x16xf32>
    %c165 = arith.constant 165 : index
    %407 = memref.load %arg5[%c165] : memref<256xf32, #tpu.memory_space<smem>>
    %408 = vector.broadcast %407 : f32 to vector<10x16xf32>
    %409 = arith.mulf %408, %358 : vector<10x16xf32>
    %410 = arith.addf %347, %409 : vector<10x16xf32>
    %c181 = arith.constant 181 : index
    %411 = memref.load %arg5[%c181] : memref<256xf32, #tpu.memory_space<smem>>
    %412 = vector.broadcast %411 : f32 to vector<10x16xf32>
    %413 = arith.mulf %412, %358 : vector<10x16xf32>
    %414 = arith.addf %350, %413 : vector<10x16xf32>
    %c229 = arith.constant 229 : index
    %415 = memref.load %arg5[%c229] : memref<256xf32, #tpu.memory_space<smem>>
    %416 = vector.broadcast %415 : f32 to vector<10x16xf32>
    %417 = arith.mulf %416, %358 : vector<10x16xf32>
    %418 = arith.addf %353, %417 : vector<10x16xf32>
    %c245 = arith.constant 245 : index
    %419 = memref.load %arg5[%c245] : memref<256xf32, #tpu.memory_space<smem>>
    %420 = vector.broadcast %419 : f32 to vector<10x16xf32>
    %421 = arith.mulf %420, %358 : vector<10x16xf32>
    %422 = arith.addf %356, %421 : vector<10x16xf32>
    %c2_78 = arith.constant 2 : index
    %c0_79 = arith.constant 0 : index
    %c0_80 = arith.constant 0 : index
    %423 = vector.load %arg8[%c2_78, %c0_79, %c0_80] : memref<4x10x16xf32, #tpu.memory_space<vmem>>, vector<1x10x16xf32>
    %424 = vector.shape_cast %423 : vector<1x10x16xf32> to vector<10x16xf32>
    %c9_81 = arith.constant 9 : index
    %425 = memref.load %arg5[%c9_81] : memref<256xf32, #tpu.memory_space<smem>>
    %426 = vector.broadcast %425 : f32 to vector<10x16xf32>
    %427 = arith.mulf %426, %424 : vector<10x16xf32>
    %428 = arith.addf %362, %427 : vector<10x16xf32>
    %c25 = arith.constant 25 : index
    %429 = memref.load %arg5[%c25] : memref<256xf32, #tpu.memory_space<smem>>
    %430 = vector.broadcast %429 : f32 to vector<10x16xf32>
    %431 = arith.mulf %430, %424 : vector<10x16xf32>
    %432 = arith.addf %366, %431 : vector<10x16xf32>
    %c73 = arith.constant 73 : index
    %433 = memref.load %arg5[%c73] : memref<256xf32, #tpu.memory_space<smem>>
    %434 = vector.broadcast %433 : f32 to vector<10x16xf32>
    %435 = arith.mulf %434, %424 : vector<10x16xf32>
    %436 = arith.addf %370, %435 : vector<10x16xf32>
    %c89 = arith.constant 89 : index
    %437 = memref.load %arg5[%c89] : memref<256xf32, #tpu.memory_space<smem>>
    %438 = vector.broadcast %437 : f32 to vector<10x16xf32>
    %439 = arith.mulf %438, %424 : vector<10x16xf32>
    %440 = arith.addf %374, %439 : vector<10x16xf32>
    %c41 = arith.constant 41 : index
    %441 = memref.load %arg5[%c41] : memref<256xf32, #tpu.memory_space<smem>>
    %442 = vector.broadcast %441 : f32 to vector<10x16xf32>
    %443 = arith.mulf %442, %424 : vector<10x16xf32>
    %444 = arith.addf %378, %443 : vector<10x16xf32>
    %c57 = arith.constant 57 : index
    %445 = memref.load %arg5[%c57] : memref<256xf32, #tpu.memory_space<smem>>
    %446 = vector.broadcast %445 : f32 to vector<10x16xf32>
    %447 = arith.mulf %446, %424 : vector<10x16xf32>
    %448 = arith.addf %382, %447 : vector<10x16xf32>
    %c105 = arith.constant 105 : index
    %449 = memref.load %arg5[%c105] : memref<256xf32, #tpu.memory_space<smem>>
    %450 = vector.broadcast %449 : f32 to vector<10x16xf32>
    %451 = arith.mulf %450, %424 : vector<10x16xf32>
    %452 = arith.addf %386, %451 : vector<10x16xf32>
    %c121 = arith.constant 121 : index
    %453 = memref.load %arg5[%c121] : memref<256xf32, #tpu.memory_space<smem>>
    %454 = vector.broadcast %453 : f32 to vector<10x16xf32>
    %455 = arith.mulf %454, %424 : vector<10x16xf32>
    %456 = arith.addf %390, %455 : vector<10x16xf32>
    %c137 = arith.constant 137 : index
    %457 = memref.load %arg5[%c137] : memref<256xf32, #tpu.memory_space<smem>>
    %458 = vector.broadcast %457 : f32 to vector<10x16xf32>
    %459 = arith.mulf %458, %424 : vector<10x16xf32>
    %460 = arith.addf %394, %459 : vector<10x16xf32>
    %c153 = arith.constant 153 : index
    %461 = memref.load %arg5[%c153] : memref<256xf32, #tpu.memory_space<smem>>
    %462 = vector.broadcast %461 : f32 to vector<10x16xf32>
    %463 = arith.mulf %462, %424 : vector<10x16xf32>
    %464 = arith.addf %398, %463 : vector<10x16xf32>
    %c201 = arith.constant 201 : index
    %465 = memref.load %arg5[%c201] : memref<256xf32, #tpu.memory_space<smem>>
    %466 = vector.broadcast %465 : f32 to vector<10x16xf32>
    %467 = arith.mulf %466, %424 : vector<10x16xf32>
    %468 = arith.addf %402, %467 : vector<10x16xf32>
    %c217 = arith.constant 217 : index
    %469 = memref.load %arg5[%c217] : memref<256xf32, #tpu.memory_space<smem>>
    %470 = vector.broadcast %469 : f32 to vector<10x16xf32>
    %471 = arith.mulf %470, %424 : vector<10x16xf32>
    %472 = arith.addf %406, %471 : vector<10x16xf32>
    %c169 = arith.constant 169 : index
    %473 = memref.load %arg5[%c169] : memref<256xf32, #tpu.memory_space<smem>>
    %474 = vector.broadcast %473 : f32 to vector<10x16xf32>
    %475 = arith.mulf %474, %424 : vector<10x16xf32>
    %476 = arith.addf %410, %475 : vector<10x16xf32>
    %c185 = arith.constant 185 : index
    %477 = memref.load %arg5[%c185] : memref<256xf32, #tpu.memory_space<smem>>
    %478 = vector.broadcast %477 : f32 to vector<10x16xf32>
    %479 = arith.mulf %478, %424 : vector<10x16xf32>
    %480 = arith.addf %414, %479 : vector<10x16xf32>
    %c233 = arith.constant 233 : index
    %481 = memref.load %arg5[%c233] : memref<256xf32, #tpu.memory_space<smem>>
    %482 = vector.broadcast %481 : f32 to vector<10x16xf32>
    %483 = arith.mulf %482, %424 : vector<10x16xf32>
    %484 = arith.addf %418, %483 : vector<10x16xf32>
    %c249 = arith.constant 249 : index
    %485 = memref.load %arg5[%c249] : memref<256xf32, #tpu.memory_space<smem>>
    %486 = vector.broadcast %485 : f32 to vector<10x16xf32>
    %487 = arith.mulf %486, %424 : vector<10x16xf32>
    %488 = arith.addf %422, %487 : vector<10x16xf32>
    %c3_82 = arith.constant 3 : index
    %c0_83 = arith.constant 0 : index
    %c0_84 = arith.constant 0 : index
    %489 = vector.load %arg8[%c3_82, %c0_83, %c0_84] : memref<4x10x16xf32, #tpu.memory_space<vmem>>, vector<1x10x16xf32>
    %490 = vector.shape_cast %489 : vector<1x10x16xf32> to vector<10x16xf32>
    %c13 = arith.constant 13 : index
    %491 = memref.load %arg5[%c13] : memref<256xf32, #tpu.memory_space<smem>>
    %492 = vector.broadcast %491 : f32 to vector<10x16xf32>
    %493 = arith.mulf %492, %490 : vector<10x16xf32>
    %494 = arith.addf %428, %493 : vector<10x16xf32>
    %c29 = arith.constant 29 : index
    %495 = memref.load %arg5[%c29] : memref<256xf32, #tpu.memory_space<smem>>
    %496 = vector.broadcast %495 : f32 to vector<10x16xf32>
    %497 = arith.mulf %496, %490 : vector<10x16xf32>
    %498 = arith.addf %432, %497 : vector<10x16xf32>
    %c77 = arith.constant 77 : index
    %499 = memref.load %arg5[%c77] : memref<256xf32, #tpu.memory_space<smem>>
    %500 = vector.broadcast %499 : f32 to vector<10x16xf32>
    %501 = arith.mulf %500, %490 : vector<10x16xf32>
    %502 = arith.addf %436, %501 : vector<10x16xf32>
    %c93 = arith.constant 93 : index
    %503 = memref.load %arg5[%c93] : memref<256xf32, #tpu.memory_space<smem>>
    %504 = vector.broadcast %503 : f32 to vector<10x16xf32>
    %505 = arith.mulf %504, %490 : vector<10x16xf32>
    %506 = arith.addf %440, %505 : vector<10x16xf32>
    %c45 = arith.constant 45 : index
    %507 = memref.load %arg5[%c45] : memref<256xf32, #tpu.memory_space<smem>>
    %508 = vector.broadcast %507 : f32 to vector<10x16xf32>
    %509 = arith.mulf %508, %490 : vector<10x16xf32>
    %510 = arith.addf %444, %509 : vector<10x16xf32>
    %c61 = arith.constant 61 : index
    %511 = memref.load %arg5[%c61] : memref<256xf32, #tpu.memory_space<smem>>
    %512 = vector.broadcast %511 : f32 to vector<10x16xf32>
    %513 = arith.mulf %512, %490 : vector<10x16xf32>
    %514 = arith.addf %448, %513 : vector<10x16xf32>
    %c109 = arith.constant 109 : index
    %515 = memref.load %arg5[%c109] : memref<256xf32, #tpu.memory_space<smem>>
    %516 = vector.broadcast %515 : f32 to vector<10x16xf32>
    %517 = arith.mulf %516, %490 : vector<10x16xf32>
    %518 = arith.addf %452, %517 : vector<10x16xf32>
    %c125 = arith.constant 125 : index
    %519 = memref.load %arg5[%c125] : memref<256xf32, #tpu.memory_space<smem>>
    %520 = vector.broadcast %519 : f32 to vector<10x16xf32>
    %521 = arith.mulf %520, %490 : vector<10x16xf32>
    %522 = arith.addf %456, %521 : vector<10x16xf32>
    %c141 = arith.constant 141 : index
    %523 = memref.load %arg5[%c141] : memref<256xf32, #tpu.memory_space<smem>>
    %524 = vector.broadcast %523 : f32 to vector<10x16xf32>
    %525 = arith.mulf %524, %490 : vector<10x16xf32>
    %526 = arith.addf %460, %525 : vector<10x16xf32>
    %c157 = arith.constant 157 : index
    %527 = memref.load %arg5[%c157] : memref<256xf32, #tpu.memory_space<smem>>
    %528 = vector.broadcast %527 : f32 to vector<10x16xf32>
    %529 = arith.mulf %528, %490 : vector<10x16xf32>
    %530 = arith.addf %464, %529 : vector<10x16xf32>
    %c205 = arith.constant 205 : index
    %531 = memref.load %arg5[%c205] : memref<256xf32, #tpu.memory_space<smem>>
    %532 = vector.broadcast %531 : f32 to vector<10x16xf32>
    %533 = arith.mulf %532, %490 : vector<10x16xf32>
    %534 = arith.addf %468, %533 : vector<10x16xf32>
    %c221 = arith.constant 221 : index
    %535 = memref.load %arg5[%c221] : memref<256xf32, #tpu.memory_space<smem>>
    %536 = vector.broadcast %535 : f32 to vector<10x16xf32>
    %537 = arith.mulf %536, %490 : vector<10x16xf32>
    %538 = arith.addf %472, %537 : vector<10x16xf32>
    %c173 = arith.constant 173 : index
    %539 = memref.load %arg5[%c173] : memref<256xf32, #tpu.memory_space<smem>>
    %540 = vector.broadcast %539 : f32 to vector<10x16xf32>
    %541 = arith.mulf %540, %490 : vector<10x16xf32>
    %542 = arith.addf %476, %541 : vector<10x16xf32>
    %c189 = arith.constant 189 : index
    %543 = memref.load %arg5[%c189] : memref<256xf32, #tpu.memory_space<smem>>
    %544 = vector.broadcast %543 : f32 to vector<10x16xf32>
    %545 = arith.mulf %544, %490 : vector<10x16xf32>
    %546 = arith.addf %480, %545 : vector<10x16xf32>
    %c237 = arith.constant 237 : index
    %547 = memref.load %arg5[%c237] : memref<256xf32, #tpu.memory_space<smem>>
    %548 = vector.broadcast %547 : f32 to vector<10x16xf32>
    %549 = arith.mulf %548, %490 : vector<10x16xf32>
    %550 = arith.addf %484, %549 : vector<10x16xf32>
    %c253 = arith.constant 253 : index
    %551 = memref.load %arg5[%c253] : memref<256xf32, #tpu.memory_space<smem>>
    %552 = vector.broadcast %551 : f32 to vector<10x16xf32>
    %553 = arith.mulf %552, %490 : vector<10x16xf32>
    %554 = arith.addf %488, %553 : vector<10x16xf32>
    %c0_85 = arith.constant 0 : index
    %c0_86 = arith.constant 0 : index
    %555 = vector.load %arg9[%c0_85, %c0_86] : memref<40x64xf32, #tpu.memory_space<vmem>>, vector<10x16xf32>
    tpu.vector_store %arg9[%c0_85, %c0_86], %494 {strides = array<i32>} : memref<40x64xf32, #tpu.memory_space<vmem>>, vector<10x16xf32>,
    %c0_87 = arith.constant 0 : index
    %c16_88 = arith.constant 16 : index
    %556 = vector.load %arg9[%c0_87, %c16_88] : memref<40x64xf32, #tpu.memory_space<vmem>>, vector<10x16xf32>
    tpu.vector_store %arg9[%c0_87, %c16_88], %498 {strides = array<i32>} : memref<40x64xf32, #tpu.memory_space<vmem>>, vector<10x16xf32>,
    %c0_89 = arith.constant 0 : index
    %c32_90 = arith.constant 32 : index
    %557 = vector.load %arg9[%c0_89, %c32_90] : memref<40x64xf32, #tpu.memory_space<vmem>>, vector<10x16xf32>
    tpu.vector_store %arg9[%c0_89, %c32_90], %502 {strides = array<i32>} : memref<40x64xf32, #tpu.memory_space<vmem>>, vector<10x16xf32>,
    %c0_91 = arith.constant 0 : index
    %c48_92 = arith.constant 48 : index
    %558 = vector.load %arg9[%c0_91, %c48_92] : memref<40x64xf32, #tpu.memory_space<vmem>>, vector<10x16xf32>
    tpu.vector_store %arg9[%c0_91, %c48_92], %506 {strides = array<i32>} : memref<40x64xf32, #tpu.memory_space<vmem>>, vector<10x16xf32>,
    %c10_93 = arith.constant 10 : index
    %c0_94 = arith.constant 0 : index
    %559 = vector.load %arg9[%c10_93, %c0_94] : memref<40x64xf32, #tpu.memory_space<vmem>>, vector<10x16xf32>
    tpu.vector_store %arg9[%c10_93, %c0_94], %510 {strides = array<i32>} : memref<40x64xf32, #tpu.memory_space<vmem>>, vector<10x16xf32>,
    %c10_95 = arith.constant 10 : index
    %c16_96 = arith.constant 16 : index
    %560 = vector.load %arg9[%c10_95, %c16_96] : memref<40x64xf32, #tpu.memory_space<vmem>>, vector<10x16xf32>
    tpu.vector_store %arg9[%c10_95, %c16_96], %514 {strides = array<i32>} : memref<40x64xf32, #tpu.memory_space<vmem>>, vector<10x16xf32>,
    %c10_97 = arith.constant 10 : index
    %c32_98 = arith.constant 32 : index
    %561 = vector.load %arg9[%c10_97, %c32_98] : memref<40x64xf32, #tpu.memory_space<vmem>>, vector<10x16xf32>
    tpu.vector_store %arg9[%c10_97, %c32_98], %518 {strides = array<i32>} : memref<40x64xf32, #tpu.memory_space<vmem>>, vector<10x16xf32>,
    %c10_99 = arith.constant 10 : index
    %c48_100 = arith.constant 48 : index
    %562 = vector.load %arg9[%c10_99, %c48_100] : memref<40x64xf32, #tpu.memory_space<vmem>>, vector<10x16xf32>
    tpu.vector_store %arg9[%c10_99, %c48_100], %522 {strides = array<i32>} : memref<40x64xf32, #tpu.memory_space<vmem>>, vector<10x16xf32>,
    %c20_101 = arith.constant 20 : index
    %c0_102 = arith.constant 0 : index
    %563 = vector.load %arg9[%c20_101, %c0_102] : memref<40x64xf32, #tpu.memory_space<vmem>>, vector<10x16xf32>
    tpu.vector_store %arg9[%c20_101, %c0_102], %526 {strides = array<i32>} : memref<40x64xf32, #tpu.memory_space<vmem>>, vector<10x16xf32>,
    %c20_103 = arith.constant 20 : index
    %c16_104 = arith.constant 16 : index
    %564 = vector.load %arg9[%c20_103, %c16_104] : memref<40x64xf32, #tpu.memory_space<vmem>>, vector<10x16xf32>
    tpu.vector_store %arg9[%c20_103, %c16_104], %530 {strides = array<i32>} : memref<40x64xf32, #tpu.memory_space<vmem>>, vector<10x16xf32>,
    %c20_105 = arith.constant 20 : index
    %c32_106 = arith.constant 32 : index
    %565 = vector.load %arg9[%c20_105, %c32_106] : memref<40x64xf32, #tpu.memory_space<vmem>>, vector<10x16xf32>
    tpu.vector_store %arg9[%c20_105, %c32_106], %534 {strides = array<i32>} : memref<40x64xf32, #tpu.memory_space<vmem>>, vector<10x16xf32>,
    %c20_107 = arith.constant 20 : index
    %c48_108 = arith.constant 48 : index
    %566 = vector.load %arg9[%c20_107, %c48_108] : memref<40x64xf32, #tpu.memory_space<vmem>>, vector<10x16xf32>
    tpu.vector_store %arg9[%c20_107, %c48_108], %538 {strides = array<i32>} : memref<40x64xf32, #tpu.memory_space<vmem>>, vector<10x16xf32>,
    %c30_109 = arith.constant 30 : index
    %c0_110 = arith.constant 0 : index
    %567 = vector.load %arg9[%c30_109, %c0_110] : memref<40x64xf32, #tpu.memory_space<vmem>>, vector<10x16xf32>
    tpu.vector_store %arg9[%c30_109, %c0_110], %542 {strides = array<i32>} : memref<40x64xf32, #tpu.memory_space<vmem>>, vector<10x16xf32>,
    %c30_111 = arith.constant 30 : index
    %c16_112 = arith.constant 16 : index
    %568 = vector.load %arg9[%c30_111, %c16_112] : memref<40x64xf32, #tpu.memory_space<vmem>>, vector<10x16xf32>
    tpu.vector_store %arg9[%c30_111, %c16_112], %546 {strides = array<i32>} : memref<40x64xf32, #tpu.memory_space<vmem>>, vector<10x16xf32>,
    %c30_113 = arith.constant 30 : index
    %c32_114 = arith.constant 32 : index
    %569 = vector.load %arg9[%c30_113, %c32_114] : memref<40x64xf32, #tpu.memory_space<vmem>>, vector<10x16xf32>
    tpu.vector_store %arg9[%c30_113, %c32_114], %550 {strides = array<i32>} : memref<40x64xf32, #tpu.memory_space<vmem>>, vector<10x16xf32>,
    %c30_115 = arith.constant 30 : index
    %c48_116 = arith.constant 48 : index
    %570 = vector.load %arg9[%c30_115, %c48_116] : memref<40x64xf32, #tpu.memory_space<vmem>>, vector<10x16xf32>
    tpu.vector_store %arg9[%c30_115, %c48_116], %554 {strides = array<i32>} : memref<40x64xf32, #tpu.memory_space<vmem>>, vector<10x16xf32>,
    %c0_117 = arith.constant 0 : index
    %c0_118 = arith.constant 0 : index
    %571 = vector.load %arg9[%c0_117, %c0_118] : memref<40x64xf32, #tpu.memory_space<vmem>>, vector<40x64xf32>
    %cst_119 = arith.constant dense<0.000000e+00> : vector<16x64xf32>
    %572 = tpu.matmul %29, %571, %cst_119 {dimension_numbers = #tpu.dot_dimension_numbers<[1], [0], [0], [1], [0, 0, 1, 1], [], []>} : vector<16x40xf32>, vector<40x64xf32>, vector<16x64xf32> -> vector<16x64xf32>
    %cst_120 = arith.constant dense<0.000000e+00> : vector<16x32xf32>
    %573 = tpu.matmul %572, %30, %cst_120 {dimension_numbers = #tpu.dot_dimension_numbers<[1], [0], [0], [1], [0, 0, 1, 1], [], []>} : vector<16x64xf32>, vector<64x32xf32>, vector<16x32xf32> -> vector<16x32xf32>
    %c1_121 = arith.constant 1 : index
    %574 = memref.load %arg6[%c1_121] : memref<4xf32, #tpu.memory_space<smem>>
    %575 = vector.broadcast %574 : f32 to vector<16x32xf32>
    %576 = arith.addf %573, %575 : vector<16x32xf32>
    %577 = vector.extract_strided_slice %576 {offsets = [0, 0], sizes = [8, 32], strides = [1, 1]} : vector<16x32xf32> to vector<8x32xf32>
    %578 = vector.extract_strided_slice %576 {offsets = [8, 0], sizes = [8, 32], strides = [1, 1]} : vector<16x32xf32> to vector<8x32xf32>
    %579 = tpu.concatenate %577, %578 in 1 : vector<8x32xf32>, vector<8x32xf32> -> vector<8x64xf32>
    %c0_122 = arith.constant 0 : index
    %c1_123 = arith.constant 1 : index
    %c0_124 = arith.constant 0 : index
    %c0_125 = arith.constant 0 : index
    %580 = vector.load %arg7[%c0_122, %c1_123, %c0_124, %c0_125] : memref<1x4x8x64xf32, #tpu.memory_space<vmem>>, vector<1x1x8x64xf32>
    %581 = vector.shape_cast %580 : vector<1x1x8x64xf32> to vector<8x64xf32>
    %582 = vector.shape_cast %579 : vector<8x64xf32> to vector<1x1x8x64xf32>
    tpu.vector_store %arg7[%c0_122, %c1_123, %c0_124, %c0_125], %582 {strides = array<i32>} : memref<1x4x8x64xf32, #tpu.memory_space<vmem>>, vector<1x1x8x64xf32>,
    %c0_126 = arith.constant 0 : index
    %c0_127 = arith.constant 0 : index
    %c0_128 = arith.constant 0 : index
    %583 = vector.load %arg8[%c0_126, %c0_127, %c0_128] : memref<4x10x16xf32, #tpu.memory_space<vmem>>, vector<1x10x16xf32>
    %584 = vector.shape_cast %583 : vector<1x10x16xf32> to vector<10x16xf32>
    %c2_129 = arith.constant 2 : index
    %585 = memref.load %arg5[%c2_129] : memref<256xf32, #tpu.memory_space<smem>>
    %586 = vector.broadcast %585 : f32 to vector<10x16xf32>
    %587 = arith.mulf %586, %584 : vector<10x16xf32>
    %c18 = arith.constant 18 : index
    %588 = memref.load %arg5[%c18] : memref<256xf32, #tpu.memory_space<smem>>
    %589 = vector.broadcast %588 : f32 to vector<10x16xf32>
    %590 = arith.mulf %589, %584 : vector<10x16xf32>
    %c66 = arith.constant 66 : index
    %591 = memref.load %arg5[%c66] : memref<256xf32, #tpu.memory_space<smem>>
    %592 = vector.broadcast %591 : f32 to vector<10x16xf32>
    %593 = arith.mulf %592, %584 : vector<10x16xf32>
    %c82 = arith.constant 82 : index
    %594 = memref.load %arg5[%c82] : memref<256xf32, #tpu.memory_space<smem>>
    %595 = vector.broadcast %594 : f32 to vector<10x16xf32>
    %596 = arith.mulf %595, %584 : vector<10x16xf32>
    %c34 = arith.constant 34 : index
    %597 = memref.load %arg5[%c34] : memref<256xf32, #tpu.memory_space<smem>>
    %598 = vector.broadcast %597 : f32 to vector<10x16xf32>
    %599 = arith.mulf %598, %584 : vector<10x16xf32>
    %c50 = arith.constant 50 : index
    %600 = memref.load %arg5[%c50] : memref<256xf32, #tpu.memory_space<smem>>
    %601 = vector.broadcast %600 : f32 to vector<10x16xf32>
    %602 = arith.mulf %601, %584 : vector<10x16xf32>
    %c98 = arith.constant 98 : index
    %603 = memref.load %arg5[%c98] : memref<256xf32, #tpu.memory_space<smem>>
    %604 = vector.broadcast %603 : f32 to vector<10x16xf32>
    %605 = arith.mulf %604, %584 : vector<10x16xf32>
    %c114 = arith.constant 114 : index
    %606 = memref.load %arg5[%c114] : memref<256xf32, #tpu.memory_space<smem>>
    %607 = vector.broadcast %606 : f32 to vector<10x16xf32>
    %608 = arith.mulf %607, %584 : vector<10x16xf32>
    %c130 = arith.constant 130 : index
    %609 = memref.load %arg5[%c130] : memref<256xf32, #tpu.memory_space<smem>>
    %610 = vector.broadcast %609 : f32 to vector<10x16xf32>
    %611 = arith.mulf %610, %584 : vector<10x16xf32>
    %c146 = arith.constant 146 : index
    %612 = memref.load %arg5[%c146] : memref<256xf32, #tpu.memory_space<smem>>
    %613 = vector.broadcast %612 : f32 to vector<10x16xf32>
    %614 = arith.mulf %613, %584 : vector<10x16xf32>
    %c194 = arith.constant 194 : index
    %615 = memref.load %arg5[%c194] : memref<256xf32, #tpu.memory_space<smem>>
    %616 = vector.broadcast %615 : f32 to vector<10x16xf32>
    %617 = arith.mulf %616, %584 : vector<10x16xf32>
    %c210 = arith.constant 210 : index
    %618 = memref.load %arg5[%c210] : memref<256xf32, #tpu.memory_space<smem>>
    %619 = vector.broadcast %618 : f32 to vector<10x16xf32>
    %620 = arith.mulf %619, %584 : vector<10x16xf32>
    %c162 = arith.constant 162 : index
    %621 = memref.load %arg5[%c162] : memref<256xf32, #tpu.memory_space<smem>>
    %622 = vector.broadcast %621 : f32 to vector<10x16xf32>
    %623 = arith.mulf %622, %584 : vector<10x16xf32>
    %c178 = arith.constant 178 : index
    %624 = memref.load %arg5[%c178] : memref<256xf32, #tpu.memory_space<smem>>
    %625 = vector.broadcast %624 : f32 to vector<10x16xf32>
    %626 = arith.mulf %625, %584 : vector<10x16xf32>
    %c226 = arith.constant 226 : index
    %627 = memref.load %arg5[%c226] : memref<256xf32, #tpu.memory_space<smem>>
    %628 = vector.broadcast %627 : f32 to vector<10x16xf32>
    %629 = arith.mulf %628, %584 : vector<10x16xf32>
    %c242 = arith.constant 242 : index
    %630 = memref.load %arg5[%c242] : memref<256xf32, #tpu.memory_space<smem>>
    %631 = vector.broadcast %630 : f32 to vector<10x16xf32>
    %632 = arith.mulf %631, %584 : vector<10x16xf32>
    %c1_130 = arith.constant 1 : index
    %c0_131 = arith.constant 0 : index
    %c0_132 = arith.constant 0 : index
    %633 = vector.load %arg8[%c1_130, %c0_131, %c0_132] : memref<4x10x16xf32, #tpu.memory_space<vmem>>, vector<1x10x16xf32>
    %634 = vector.shape_cast %633 : vector<1x10x16xf32> to vector<10x16xf32>
    %c6 = arith.constant 6 : index
    %635 = memref.load %arg5[%c6] : memref<256xf32, #tpu.memory_space<smem>>
    %636 = vector.broadcast %635 : f32 to vector<10x16xf32>
    %637 = arith.mulf %636, %634 : vector<10x16xf32>
    %638 = arith.addf %587, %637 : vector<10x16xf32>
    %c22 = arith.constant 22 : index
    %639 = memref.load %arg5[%c22] : memref<256xf32, #tpu.memory_space<smem>>
    %640 = vector.broadcast %639 : f32 to vector<10x16xf32>
    %641 = arith.mulf %640, %634 : vector<10x16xf32>
    %642 = arith.addf %590, %641 : vector<10x16xf32>
    %c70 = arith.constant 70 : index
    %643 = memref.load %arg5[%c70] : memref<256xf32, #tpu.memory_space<smem>>
    %644 = vector.broadcast %643 : f32 to vector<10x16xf32>
    %645 = arith.mulf %644, %634 : vector<10x16xf32>
    %646 = arith.addf %593, %645 : vector<10x16xf32>
    %c86 = arith.constant 86 : index
    %647 = memref.load %arg5[%c86] : memref<256xf32, #tpu.memory_space<smem>>
    %648 = vector.broadcast %647 : f32 to vector<10x16xf32>
    %649 = arith.mulf %648, %634 : vector<10x16xf32>
    %650 = arith.addf %596, %649 : vector<10x16xf32>
    %c38 = arith.constant 38 : index
    %651 = memref.load %arg5[%c38] : memref<256xf32, #tpu.memory_space<smem>>
    %652 = vector.broadcast %651 : f32 to vector<10x16xf32>
    %653 = arith.mulf %652, %634 : vector<10x16xf32>
    %654 = arith.addf %599, %653 : vector<10x16xf32>
    %c54 = arith.constant 54 : index
    %655 = memref.load %arg5[%c54] : memref<256xf32, #tpu.memory_space<smem>>
    %656 = vector.broadcast %655 : f32 to vector<10x16xf32>
    %657 = arith.mulf %656, %634 : vector<10x16xf32>
    %658 = arith.addf %602, %657 : vector<10x16xf32>
    %c102 = arith.constant 102 : index
    %659 = memref.load %arg5[%c102] : memref<256xf32, #tpu.memory_space<smem>>
    %660 = vector.broadcast %659 : f32 to vector<10x16xf32>
    %661 = arith.mulf %660, %634 : vector<10x16xf32>
    %662 = arith.addf %605, %661 : vector<10x16xf32>
    %c118 = arith.constant 118 : index
    %663 = memref.load %arg5[%c118] : memref<256xf32, #tpu.memory_space<smem>>
    %664 = vector.broadcast %663 : f32 to vector<10x16xf32>
    %665 = arith.mulf %664, %634 : vector<10x16xf32>
    %666 = arith.addf %608, %665 : vector<10x16xf32>
    %c134 = arith.constant 134 : index
    %667 = memref.load %arg5[%c134] : memref<256xf32, #tpu.memory_space<smem>>
    %668 = vector.broadcast %667 : f32 to vector<10x16xf32>
    %669 = arith.mulf %668, %634 : vector<10x16xf32>
    %670 = arith.addf %611, %669 : vector<10x16xf32>
    %c150 = arith.constant 150 : index
    %671 = memref.load %arg5[%c150] : memref<256xf32, #tpu.memory_space<smem>>
    %672 = vector.broadcast %671 : f32 to vector<10x16xf32>
    %673 = arith.mulf %672, %634 : vector<10x16xf32>
    %674 = arith.addf %614, %673 : vector<10x16xf32>
    %c198 = arith.constant 198 : index
    %675 = memref.load %arg5[%c198] : memref<256xf32, #tpu.memory_space<smem>>
    %676 = vector.broadcast %675 : f32 to vector<10x16xf32>
    %677 = arith.mulf %676, %634 : vector<10x16xf32>
    %678 = arith.addf %617, %677 : vector<10x16xf32>
    %c214 = arith.constant 214 : index
    %679 = memref.load %arg5[%c214] : memref<256xf32, #tpu.memory_space<smem>>
    %680 = vector.broadcast %679 : f32 to vector<10x16xf32>
    %681 = arith.mulf %680, %634 : vector<10x16xf32>
    %682 = arith.addf %620, %681 : vector<10x16xf32>
    %c166 = arith.constant 166 : index
    %683 = memref.load %arg5[%c166] : memref<256xf32, #tpu.memory_space<smem>>
    %684 = vector.broadcast %683 : f32 to vector<10x16xf32>
    %685 = arith.mulf %684, %634 : vector<10x16xf32>
    %686 = arith.addf %623, %685 : vector<10x16xf32>
    %c182 = arith.constant 182 : index
    %687 = memref.load %arg5[%c182] : memref<256xf32, #tpu.memory_space<smem>>
    %688 = vector.broadcast %687 : f32 to vector<10x16xf32>
    %689 = arith.mulf %688, %634 : vector<10x16xf32>
    %690 = arith.addf %626, %689 : vector<10x16xf32>
    %c230 = arith.constant 230 : index
    %691 = memref.load %arg5[%c230] : memref<256xf32, #tpu.memory_space<smem>>
    %692 = vector.broadcast %691 : f32 to vector<10x16xf32>
    %693 = arith.mulf %692, %634 : vector<10x16xf32>
    %694 = arith.addf %629, %693 : vector<10x16xf32>
    %c246 = arith.constant 246 : index
    %695 = memref.load %arg5[%c246] : memref<256xf32, #tpu.memory_space<smem>>
    %696 = vector.broadcast %695 : f32 to vector<10x16xf32>
    %697 = arith.mulf %696, %634 : vector<10x16xf32>
    %698 = arith.addf %632, %697 : vector<10x16xf32>
    %c2_133 = arith.constant 2 : index
    %c0_134 = arith.constant 0 : index
    %c0_135 = arith.constant 0 : index
    %699 = vector.load %arg8[%c2_133, %c0_134, %c0_135] : memref<4x10x16xf32, #tpu.memory_space<vmem>>, vector<1x10x16xf32>
    %700 = vector.shape_cast %699 : vector<1x10x16xf32> to vector<10x16xf32>
    %c10_136 = arith.constant 10 : index
    %701 = memref.load %arg5[%c10_136] : memref<256xf32, #tpu.memory_space<smem>>
    %702 = vector.broadcast %701 : f32 to vector<10x16xf32>
    %703 = arith.mulf %702, %700 : vector<10x16xf32>
    %704 = arith.addf %638, %703 : vector<10x16xf32>
    %c26 = arith.constant 26 : index
    %705 = memref.load %arg5[%c26] : memref<256xf32, #tpu.memory_space<smem>>
    %706 = vector.broadcast %705 : f32 to vector<10x16xf32>
    %707 = arith.mulf %706, %700 : vector<10x16xf32>
    %708 = arith.addf %642, %707 : vector<10x16xf32>
    %c74 = arith.constant 74 : index
    %709 = memref.load %arg5[%c74] : memref<256xf32, #tpu.memory_space<smem>>
    %710 = vector.broadcast %709 : f32 to vector<10x16xf32>
    %711 = arith.mulf %710, %700 : vector<10x16xf32>
    %712 = arith.addf %646, %711 : vector<10x16xf32>
    %c90 = arith.constant 90 : index
    %713 = memref.load %arg5[%c90] : memref<256xf32, #tpu.memory_space<smem>>
    %714 = vector.broadcast %713 : f32 to vector<10x16xf32>
    %715 = arith.mulf %714, %700 : vector<10x16xf32>
    %716 = arith.addf %650, %715 : vector<10x16xf32>
    %c42 = arith.constant 42 : index
    %717 = memref.load %arg5[%c42] : memref<256xf32, #tpu.memory_space<smem>>
    %718 = vector.broadcast %717 : f32 to vector<10x16xf32>
    %719 = arith.mulf %718, %700 : vector<10x16xf32>
    %720 = arith.addf %654, %719 : vector<10x16xf32>
    %c58 = arith.constant 58 : index
    %721 = memref.load %arg5[%c58] : memref<256xf32, #tpu.memory_space<smem>>
    %722 = vector.broadcast %721 : f32 to vector<10x16xf32>
    %723 = arith.mulf %722, %700 : vector<10x16xf32>
    %724 = arith.addf %658, %723 : vector<10x16xf32>
    %c106 = arith.constant 106 : index
    %725 = memref.load %arg5[%c106] : memref<256xf32, #tpu.memory_space<smem>>
    %726 = vector.broadcast %725 : f32 to vector<10x16xf32>
    %727 = arith.mulf %726, %700 : vector<10x16xf32>
    %728 = arith.addf %662, %727 : vector<10x16xf32>
    %c122 = arith.constant 122 : index
    %729 = memref.load %arg5[%c122] : memref<256xf32, #tpu.memory_space<smem>>
    %730 = vector.broadcast %729 : f32 to vector<10x16xf32>
    %731 = arith.mulf %730, %700 : vector<10x16xf32>
    %732 = arith.addf %666, %731 : vector<10x16xf32>
    %c138 = arith.constant 138 : index
    %733 = memref.load %arg5[%c138] : memref<256xf32, #tpu.memory_space<smem>>
    %734 = vector.broadcast %733 : f32 to vector<10x16xf32>
    %735 = arith.mulf %734, %700 : vector<10x16xf32>
    %736 = arith.addf %670, %735 : vector<10x16xf32>
    %c154 = arith.constant 154 : index
    %737 = memref.load %arg5[%c154] : memref<256xf32, #tpu.memory_space<smem>>
    %738 = vector.broadcast %737 : f32 to vector<10x16xf32>
    %739 = arith.mulf %738, %700 : vector<10x16xf32>
    %740 = arith.addf %674, %739 : vector<10x16xf32>
    %c202 = arith.constant 202 : index
    %741 = memref.load %arg5[%c202] : memref<256xf32, #tpu.memory_space<smem>>
    %742 = vector.broadcast %741 : f32 to vector<10x16xf32>
    %743 = arith.mulf %742, %700 : vector<10x16xf32>
    %744 = arith.addf %678, %743 : vector<10x16xf32>
    %c218 = arith.constant 218 : index
    %745 = memref.load %arg5[%c218] : memref<256xf32, #tpu.memory_space<smem>>
    %746 = vector.broadcast %745 : f32 to vector<10x16xf32>
    %747 = arith.mulf %746, %700 : vector<10x16xf32>
    %748 = arith.addf %682, %747 : vector<10x16xf32>
    %c170 = arith.constant 170 : index
    %749 = memref.load %arg5[%c170] : memref<256xf32, #tpu.memory_space<smem>>
    %750 = vector.broadcast %749 : f32 to vector<10x16xf32>
    %751 = arith.mulf %750, %700 : vector<10x16xf32>
    %752 = arith.addf %686, %751 : vector<10x16xf32>
    %c186 = arith.constant 186 : index
    %753 = memref.load %arg5[%c186] : memref<256xf32, #tpu.memory_space<smem>>
    %754 = vector.broadcast %753 : f32 to vector<10x16xf32>
    %755 = arith.mulf %754, %700 : vector<10x16xf32>
    %756 = arith.addf %690, %755 : vector<10x16xf32>
    %c234 = arith.constant 234 : index
    %757 = memref.load %arg5[%c234] : memref<256xf32, #tpu.memory_space<smem>>
    %758 = vector.broadcast %757 : f32 to vector<10x16xf32>
    %759 = arith.mulf %758, %700 : vector<10x16xf32>
    %760 = arith.addf %694, %759 : vector<10x16xf32>
    %c250 = arith.constant 250 : index
    %761 = memref.load %arg5[%c250] : memref<256xf32, #tpu.memory_space<smem>>
    %762 = vector.broadcast %761 : f32 to vector<10x16xf32>
    %763 = arith.mulf %762, %700 : vector<10x16xf32>
    %764 = arith.addf %698, %763 : vector<10x16xf32>
    %c3_137 = arith.constant 3 : index
    %c0_138 = arith.constant 0 : index
    %c0_139 = arith.constant 0 : index
    %765 = vector.load %arg8[%c3_137, %c0_138, %c0_139] : memref<4x10x16xf32, #tpu.memory_space<vmem>>, vector<1x10x16xf32>
    %766 = vector.shape_cast %765 : vector<1x10x16xf32> to vector<10x16xf32>
    %c14 = arith.constant 14 : index
    %767 = memref.load %arg5[%c14] : memref<256xf32, #tpu.memory_space<smem>>
    %768 = vector.broadcast %767 : f32 to vector<10x16xf32>
    %769 = arith.mulf %768, %766 : vector<10x16xf32>
    %770 = arith.addf %704, %769 : vector<10x16xf32>
    %c30_140 = arith.constant 30 : index
    %771 = memref.load %arg5[%c30_140] : memref<256xf32, #tpu.memory_space<smem>>
    %772 = vector.broadcast %771 : f32 to vector<10x16xf32>
    %773 = arith.mulf %772, %766 : vector<10x16xf32>
    %774 = arith.addf %708, %773 : vector<10x16xf32>
    %c78 = arith.constant 78 : index
    %775 = memref.load %arg5[%c78] : memref<256xf32, #tpu.memory_space<smem>>
    %776 = vector.broadcast %775 : f32 to vector<10x16xf32>
    %777 = arith.mulf %776, %766 : vector<10x16xf32>
    %778 = arith.addf %712, %777 : vector<10x16xf32>
    %c94 = arith.constant 94 : index
    %779 = memref.load %arg5[%c94] : memref<256xf32, #tpu.memory_space<smem>>
    %780 = vector.broadcast %779 : f32 to vector<10x16xf32>
    %781 = arith.mulf %780, %766 : vector<10x16xf32>
    %782 = arith.addf %716, %781 : vector<10x16xf32>
    %c46 = arith.constant 46 : index
    %783 = memref.load %arg5[%c46] : memref<256xf32, #tpu.memory_space<smem>>
    %784 = vector.broadcast %783 : f32 to vector<10x16xf32>
    %785 = arith.mulf %784, %766 : vector<10x16xf32>
    %786 = arith.addf %720, %785 : vector<10x16xf32>
    %c62 = arith.constant 62 : index
    %787 = memref.load %arg5[%c62] : memref<256xf32, #tpu.memory_space<smem>>
    %788 = vector.broadcast %787 : f32 to vector<10x16xf32>
    %789 = arith.mulf %788, %766 : vector<10x16xf32>
    %790 = arith.addf %724, %789 : vector<10x16xf32>
    %c110 = arith.constant 110 : index
    %791 = memref.load %arg5[%c110] : memref<256xf32, #tpu.memory_space<smem>>
    %792 = vector.broadcast %791 : f32 to vector<10x16xf32>
    %793 = arith.mulf %792, %766 : vector<10x16xf32>
    %794 = arith.addf %728, %793 : vector<10x16xf32>
    %c126 = arith.constant 126 : index
    %795 = memref.load %arg5[%c126] : memref<256xf32, #tpu.memory_space<smem>>
    %796 = vector.broadcast %795 : f32 to vector<10x16xf32>
    %797 = arith.mulf %796, %766 : vector<10x16xf32>
    %798 = arith.addf %732, %797 : vector<10x16xf32>
    %c142 = arith.constant 142 : index
    %799 = memref.load %arg5[%c142] : memref<256xf32, #tpu.memory_space<smem>>
    %800 = vector.broadcast %799 : f32 to vector<10x16xf32>
    %801 = arith.mulf %800, %766 : vector<10x16xf32>
    %802 = arith.addf %736, %801 : vector<10x16xf32>
    %c158 = arith.constant 158 : index
    %803 = memref.load %arg5[%c158] : memref<256xf32, #tpu.memory_space<smem>>
    %804 = vector.broadcast %803 : f32 to vector<10x16xf32>
    %805 = arith.mulf %804, %766 : vector<10x16xf32>
    %806 = arith.addf %740, %805 : vector<10x16xf32>
    %c206 = arith.constant 206 : index
    %807 = memref.load %arg5[%c206] : memref<256xf32, #tpu.memory_space<smem>>
    %808 = vector.broadcast %807 : f32 to vector<10x16xf32>
    %809 = arith.mulf %808, %766 : vector<10x16xf32>
    %810 = arith.addf %744, %809 : vector<10x16xf32>
    %c222 = arith.constant 222 : index
    %811 = memref.load %arg5[%c222] : memref<256xf32, #tpu.memory_space<smem>>
    %812 = vector.broadcast %811 : f32 to vector<10x16xf32>
    %813 = arith.mulf %812, %766 : vector<10x16xf32>
    %814 = arith.addf %748, %813 : vector<10x16xf32>
    %c174 = arith.constant 174 : index
    %815 = memref.load %arg5[%c174] : memref<256xf32, #tpu.memory_space<smem>>
    %816 = vector.broadcast %815 : f32 to vector<10x16xf32>
    %817 = arith.mulf %816, %766 : vector<10x16xf32>
    %818 = arith.addf %752, %817 : vector<10x16xf32>
    %c190 = arith.constant 190 : index
    %819 = memref.load %arg5[%c190] : memref<256xf32, #tpu.memory_space<smem>>
    %820 = vector.broadcast %819 : f32 to vector<10x16xf32>
    %821 = arith.mulf %820, %766 : vector<10x16xf32>
    %822 = arith.addf %756, %821 : vector<10x16xf32>
    %c238 = arith.constant 238 : index
    %823 = memref.load %arg5[%c238] : memref<256xf32, #tpu.memory_space<smem>>
    %824 = vector.broadcast %823 : f32 to vector<10x16xf32>
    %825 = arith.mulf %824, %766 : vector<10x16xf32>
    %826 = arith.addf %760, %825 : vector<10x16xf32>
    %c254 = arith.constant 254 : index
    %827 = memref.load %arg5[%c254] : memref<256xf32, #tpu.memory_space<smem>>
    %828 = vector.broadcast %827 : f32 to vector<10x16xf32>
    %829 = arith.mulf %828, %766 : vector<10x16xf32>
    %830 = arith.addf %764, %829 : vector<10x16xf32>
    %c0_141 = arith.constant 0 : index
    %c0_142 = arith.constant 0 : index
    %831 = vector.load %arg9[%c0_141, %c0_142] : memref<40x64xf32, #tpu.memory_space<vmem>>, vector<10x16xf32>
    tpu.vector_store %arg9[%c0_141, %c0_142], %770 {strides = array<i32>} : memref<40x64xf32, #tpu.memory_space<vmem>>, vector<10x16xf32>,
    %c0_143 = arith.constant 0 : index
    %c16_144 = arith.constant 16 : index
    %832 = vector.load %arg9[%c0_143, %c16_144] : memref<40x64xf32, #tpu.memory_space<vmem>>, vector<10x16xf32>
    tpu.vector_store %arg9[%c0_143, %c16_144], %774 {strides = array<i32>} : memref<40x64xf32, #tpu.memory_space<vmem>>, vector<10x16xf32>,
    %c0_145 = arith.constant 0 : index
    %c32_146 = arith.constant 32 : index
    %833 = vector.load %arg9[%c0_145, %c32_146] : memref<40x64xf32, #tpu.memory_space<vmem>>, vector<10x16xf32>
    tpu.vector_store %arg9[%c0_145, %c32_146], %778 {strides = array<i32>} : memref<40x64xf32, #tpu.memory_space<vmem>>, vector<10x16xf32>,
    %c0_147 = arith.constant 0 : index
    %c48_148 = arith.constant 48 : index
    %834 = vector.load %arg9[%c0_147, %c48_148] : memref<40x64xf32, #tpu.memory_space<vmem>>, vector<10x16xf32>
    tpu.vector_store %arg9[%c0_147, %c48_148], %782 {strides = array<i32>} : memref<40x64xf32, #tpu.memory_space<vmem>>, vector<10x16xf32>,
    %c10_149 = arith.constant 10 : index
    %c0_150 = arith.constant 0 : index
    %835 = vector.load %arg9[%c10_149, %c0_150] : memref<40x64xf32, #tpu.memory_space<vmem>>, vector<10x16xf32>
    tpu.vector_store %arg9[%c10_149, %c0_150], %786 {strides = array<i32>} : memref<40x64xf32, #tpu.memory_space<vmem>>, vector<10x16xf32>,
    %c10_151 = arith.constant 10 : index
    %c16_152 = arith.constant 16 : index
    %836 = vector.load %arg9[%c10_151, %c16_152] : memref<40x64xf32, #tpu.memory_space<vmem>>, vector<10x16xf32>
    tpu.vector_store %arg9[%c10_151, %c16_152], %790 {strides = array<i32>} : memref<40x64xf32, #tpu.memory_space<vmem>>, vector<10x16xf32>,
    %c10_153 = arith.constant 10 : index
    %c32_154 = arith.constant 32 : index
    %837 = vector.load %arg9[%c10_153, %c32_154] : memref<40x64xf32, #tpu.memory_space<vmem>>, vector<10x16xf32>
    tpu.vector_store %arg9[%c10_153, %c32_154], %794 {strides = array<i32>} : memref<40x64xf32, #tpu.memory_space<vmem>>, vector<10x16xf32>,
    %c10_155 = arith.constant 10 : index
    %c48_156 = arith.constant 48 : index
    %838 = vector.load %arg9[%c10_155, %c48_156] : memref<40x64xf32, #tpu.memory_space<vmem>>, vector<10x16xf32>
    tpu.vector_store %arg9[%c10_155, %c48_156], %798 {strides = array<i32>} : memref<40x64xf32, #tpu.memory_space<vmem>>, vector<10x16xf32>,
    %c20_157 = arith.constant 20 : index
    %c0_158 = arith.constant 0 : index
    %839 = vector.load %arg9[%c20_157, %c0_158] : memref<40x64xf32, #tpu.memory_space<vmem>>, vector<10x16xf32>
    tpu.vector_store %arg9[%c20_157, %c0_158], %802 {strides = array<i32>} : memref<40x64xf32, #tpu.memory_space<vmem>>, vector<10x16xf32>,
    %c20_159 = arith.constant 20 : index
    %c16_160 = arith.constant 16 : index
    %840 = vector.load %arg9[%c20_159, %c16_160] : memref<40x64xf32, #tpu.memory_space<vmem>>, vector<10x16xf32>
    tpu.vector_store %arg9[%c20_159, %c16_160], %806 {strides = array<i32>} : memref<40x64xf32, #tpu.memory_space<vmem>>, vector<10x16xf32>,
    %c20_161 = arith.constant 20 : index
    %c32_162 = arith.constant 32 : index
    %841 = vector.load %arg9[%c20_161, %c32_162] : memref<40x64xf32, #tpu.memory_space<vmem>>, vector<10x16xf32>
    tpu.vector_store %arg9[%c20_161, %c32_162], %810 {strides = array<i32>} : memref<40x64xf32, #tpu.memory_space<vmem>>, vector<10x16xf32>,
    %c20_163 = arith.constant 20 : index
    %c48_164 = arith.constant 48 : index
    %842 = vector.load %arg9[%c20_163, %c48_164] : memref<40x64xf32, #tpu.memory_space<vmem>>, vector<10x16xf32>
    tpu.vector_store %arg9[%c20_163, %c48_164], %814 {strides = array<i32>} : memref<40x64xf32, #tpu.memory_space<vmem>>, vector<10x16xf32>,
    %c30_165 = arith.constant 30 : index
    %c0_166 = arith.constant 0 : index
    %843 = vector.load %arg9[%c30_165, %c0_166] : memref<40x64xf32, #tpu.memory_space<vmem>>, vector<10x16xf32>
    tpu.vector_store %arg9[%c30_165, %c0_166], %818 {strides = array<i32>} : memref<40x64xf32, #tpu.memory_space<vmem>>, vector<10x16xf32>,
    %c30_167 = arith.constant 30 : index
    %c16_168 = arith.constant 16 : index
    %844 = vector.load %arg9[%c30_167, %c16_168] : memref<40x64xf32, #tpu.memory_space<vmem>>, vector<10x16xf32>
    tpu.vector_store %arg9[%c30_167, %c16_168], %822 {strides = array<i32>} : memref<40x64xf32, #tpu.memory_space<vmem>>, vector<10x16xf32>,
    %c30_169 = arith.constant 30 : index
    %c32_170 = arith.constant 32 : index
    %845 = vector.load %arg9[%c30_169, %c32_170] : memref<40x64xf32, #tpu.memory_space<vmem>>, vector<10x16xf32>
    tpu.vector_store %arg9[%c30_169, %c32_170], %826 {strides = array<i32>} : memref<40x64xf32, #tpu.memory_space<vmem>>, vector<10x16xf32>,
    %c30_171 = arith.constant 30 : index
    %c48_172 = arith.constant 48 : index
    %846 = vector.load %arg9[%c30_171, %c48_172] : memref<40x64xf32, #tpu.memory_space<vmem>>, vector<10x16xf32>
    tpu.vector_store %arg9[%c30_171, %c48_172], %830 {strides = array<i32>} : memref<40x64xf32, #tpu.memory_space<vmem>>, vector<10x16xf32>,
    %c0_173 = arith.constant 0 : index
    %c0_174 = arith.constant 0 : index
    %847 = vector.load %arg9[%c0_173, %c0_174] : memref<40x64xf32, #tpu.memory_space<vmem>>, vector<40x64xf32>
    %cst_175 = arith.constant dense<0.000000e+00> : vector<16x64xf32>
    %848 = tpu.matmul %29, %847, %cst_175 {dimension_numbers = #tpu.dot_dimension_numbers<[1], [0], [0], [1], [0, 0, 1, 1], [], []>} : vector<16x40xf32>, vector<40x64xf32>, vector<16x64xf32> -> vector<16x64xf32>
    %cst_176 = arith.constant dense<0.000000e+00> : vector<16x32xf32>
    %849 = tpu.matmul %848, %30, %cst_176 {dimension_numbers = #tpu.dot_dimension_numbers<[1], [0], [0], [1], [0, 0, 1, 1], [], []>} : vector<16x64xf32>, vector<64x32xf32>, vector<16x32xf32> -> vector<16x32xf32>
    %c2_177 = arith.constant 2 : index
    %850 = memref.load %arg6[%c2_177] : memref<4xf32, #tpu.memory_space<smem>>
    %851 = vector.broadcast %850 : f32 to vector<16x32xf32>
    %852 = arith.addf %849, %851 : vector<16x32xf32>
    %853 = vector.extract_strided_slice %852 {offsets = [0, 0], sizes = [8, 32], strides = [1, 1]} : vector<16x32xf32> to vector<8x32xf32>
    %854 = vector.extract_strided_slice %852 {offsets = [8, 0], sizes = [8, 32], strides = [1, 1]} : vector<16x32xf32> to vector<8x32xf32>
    %855 = tpu.concatenate %853, %854 in 1 : vector<8x32xf32>, vector<8x32xf32> -> vector<8x64xf32>
    %c0_178 = arith.constant 0 : index
    %c2_179 = arith.constant 2 : index
    %c0_180 = arith.constant 0 : index
    %c0_181 = arith.constant 0 : index
    %856 = vector.load %arg7[%c0_178, %c2_179, %c0_180, %c0_181] : memref<1x4x8x64xf32, #tpu.memory_space<vmem>>, vector<1x1x8x64xf32>
    %857 = vector.shape_cast %856 : vector<1x1x8x64xf32> to vector<8x64xf32>
    %858 = vector.shape_cast %855 : vector<8x64xf32> to vector<1x1x8x64xf32>
    tpu.vector_store %arg7[%c0_178, %c2_179, %c0_180, %c0_181], %858 {strides = array<i32>} : memref<1x4x8x64xf32, #tpu.memory_space<vmem>>, vector<1x1x8x64xf32>,
    %c0_182 = arith.constant 0 : index
    %c0_183 = arith.constant 0 : index
    %c0_184 = arith.constant 0 : index
    %859 = vector.load %arg8[%c0_182, %c0_183, %c0_184] : memref<4x10x16xf32, #tpu.memory_space<vmem>>, vector<1x10x16xf32>
    %860 = vector.shape_cast %859 : vector<1x10x16xf32> to vector<10x16xf32>
    %c3_185 = arith.constant 3 : index
    %861 = memref.load %arg5[%c3_185] : memref<256xf32, #tpu.memory_space<smem>>
    %862 = vector.broadcast %861 : f32 to vector<10x16xf32>
    %863 = arith.mulf %862, %860 : vector<10x16xf32>
    %c19 = arith.constant 19 : index
    %864 = memref.load %arg5[%c19] : memref<256xf32, #tpu.memory_space<smem>>
    %865 = vector.broadcast %864 : f32 to vector<10x16xf32>
    %866 = arith.mulf %865, %860 : vector<10x16xf32>
    %c67 = arith.constant 67 : index
    %867 = memref.load %arg5[%c67] : memref<256xf32, #tpu.memory_space<smem>>
    %868 = vector.broadcast %867 : f32 to vector<10x16xf32>
    %869 = arith.mulf %868, %860 : vector<10x16xf32>
    %c83 = arith.constant 83 : index
    %870 = memref.load %arg5[%c83] : memref<256xf32, #tpu.memory_space<smem>>
    %871 = vector.broadcast %870 : f32 to vector<10x16xf32>
    %872 = arith.mulf %871, %860 : vector<10x16xf32>
    %c35 = arith.constant 35 : index
    %873 = memref.load %arg5[%c35] : memref<256xf32, #tpu.memory_space<smem>>
    %874 = vector.broadcast %873 : f32 to vector<10x16xf32>
    %875 = arith.mulf %874, %860 : vector<10x16xf32>
    %c51 = arith.constant 51 : index
    %876 = memref.load %arg5[%c51] : memref<256xf32, #tpu.memory_space<smem>>
    %877 = vector.broadcast %876 : f32 to vector<10x16xf32>
    %878 = arith.mulf %877, %860 : vector<10x16xf32>
    %c99 = arith.constant 99 : index
    %879 = memref.load %arg5[%c99] : memref<256xf32, #tpu.memory_space<smem>>
    %880 = vector.broadcast %879 : f32 to vector<10x16xf32>
    %881 = arith.mulf %880, %860 : vector<10x16xf32>
    %c115 = arith.constant 115 : index
    %882 = memref.load %arg5[%c115] : memref<256xf32, #tpu.memory_space<smem>>
    %883 = vector.broadcast %882 : f32 to vector<10x16xf32>
    %884 = arith.mulf %883, %860 : vector<10x16xf32>
    %c131 = arith.constant 131 : index
    %885 = memref.load %arg5[%c131] : memref<256xf32, #tpu.memory_space<smem>>
    %886 = vector.broadcast %885 : f32 to vector<10x16xf32>
    %887 = arith.mulf %886, %860 : vector<10x16xf32>
    %c147 = arith.constant 147 : index
    %888 = memref.load %arg5[%c147] : memref<256xf32, #tpu.memory_space<smem>>
    %889 = vector.broadcast %888 : f32 to vector<10x16xf32>
    %890 = arith.mulf %889, %860 : vector<10x16xf32>
    %c195 = arith.constant 195 : index
    %891 = memref.load %arg5[%c195] : memref<256xf32, #tpu.memory_space<smem>>
    %892 = vector.broadcast %891 : f32 to vector<10x16xf32>
    %893 = arith.mulf %892, %860 : vector<10x16xf32>
    %c211 = arith.constant 211 : index
    %894 = memref.load %arg5[%c211] : memref<256xf32, #tpu.memory_space<smem>>
    %895 = vector.broadcast %894 : f32 to vector<10x16xf32>
    %896 = arith.mulf %895, %860 : vector<10x16xf32>
    %c163 = arith.constant 163 : index
    %897 = memref.load %arg5[%c163] : memref<256xf32, #tpu.memory_space<smem>>
    %898 = vector.broadcast %897 : f32 to vector<10x16xf32>
    %899 = arith.mulf %898, %860 : vector<10x16xf32>
    %c179 = arith.constant 179 : index
    %900 = memref.load %arg5[%c179] : memref<256xf32, #tpu.memory_space<smem>>
    %901 = vector.broadcast %900 : f32 to vector<10x16xf32>
    %902 = arith.mulf %901, %860 : vector<10x16xf32>
    %c227 = arith.constant 227 : index
    %903 = memref.load %arg5[%c227] : memref<256xf32, #tpu.memory_space<smem>>
    %904 = vector.broadcast %903 : f32 to vector<10x16xf32>
    %905 = arith.mulf %904, %860 : vector<10x16xf32>
    %c243 = arith.constant 243 : index
    %906 = memref.load %arg5[%c243] : memref<256xf32, #tpu.memory_space<smem>>
    %907 = vector.broadcast %906 : f32 to vector<10x16xf32>
    %908 = arith.mulf %907, %860 : vector<10x16xf32>
    %c1_186 = arith.constant 1 : index
    %c0_187 = arith.constant 0 : index
    %c0_188 = arith.constant 0 : index
    %909 = vector.load %arg8[%c1_186, %c0_187, %c0_188] : memref<4x10x16xf32, #tpu.memory_space<vmem>>, vector<1x10x16xf32>
    %910 = vector.shape_cast %909 : vector<1x10x16xf32> to vector<10x16xf32>
    %c7 = arith.constant 7 : index
    %911 = memref.load %arg5[%c7] : memref<256xf32, #tpu.memory_space<smem>>
    %912 = vector.broadcast %911 : f32 to vector<10x16xf32>
    %913 = arith.mulf %912, %910 : vector<10x16xf32>
    %914 = arith.addf %863, %913 : vector<10x16xf32>
    %c23 = arith.constant 23 : index
    %915 = memref.load %arg5[%c23] : memref<256xf32, #tpu.memory_space<smem>>
    %916 = vector.broadcast %915 : f32 to vector<10x16xf32>
    %917 = arith.mulf %916, %910 : vector<10x16xf32>
    %918 = arith.addf %866, %917 : vector<10x16xf32>
    %c71 = arith.constant 71 : index
    %919 = memref.load %arg5[%c71] : memref<256xf32, #tpu.memory_space<smem>>
    %920 = vector.broadcast %919 : f32 to vector<10x16xf32>
    %921 = arith.mulf %920, %910 : vector<10x16xf32>
    %922 = arith.addf %869, %921 : vector<10x16xf32>
    %c87 = arith.constant 87 : index
    %923 = memref.load %arg5[%c87] : memref<256xf32, #tpu.memory_space<smem>>
    %924 = vector.broadcast %923 : f32 to vector<10x16xf32>
    %925 = arith.mulf %924, %910 : vector<10x16xf32>
    %926 = arith.addf %872, %925 : vector<10x16xf32>
    %c39 = arith.constant 39 : index
    %927 = memref.load %arg5[%c39] : memref<256xf32, #tpu.memory_space<smem>>
    %928 = vector.broadcast %927 : f32 to vector<10x16xf32>
    %929 = arith.mulf %928, %910 : vector<10x16xf32>
    %930 = arith.addf %875, %929 : vector<10x16xf32>
    %c55 = arith.constant 55 : index
    %931 = memref.load %arg5[%c55] : memref<256xf32, #tpu.memory_space<smem>>
    %932 = vector.broadcast %931 : f32 to vector<10x16xf32>
    %933 = arith.mulf %932, %910 : vector<10x16xf32>
    %934 = arith.addf %878, %933 : vector<10x16xf32>
    %c103 = arith.constant 103 : index
    %935 = memref.load %arg5[%c103] : memref<256xf32, #tpu.memory_space<smem>>
    %936 = vector.broadcast %935 : f32 to vector<10x16xf32>
    %937 = arith.mulf %936, %910 : vector<10x16xf32>
    %938 = arith.addf %881, %937 : vector<10x16xf32>
    %c119 = arith.constant 119 : index
    %939 = memref.load %arg5[%c119] : memref<256xf32, #tpu.memory_space<smem>>
    %940 = vector.broadcast %939 : f32 to vector<10x16xf32>
    %941 = arith.mulf %940, %910 : vector<10x16xf32>
    %942 = arith.addf %884, %941 : vector<10x16xf32>
    %c135 = arith.constant 135 : index
    %943 = memref.load %arg5[%c135] : memref<256xf32, #tpu.memory_space<smem>>
    %944 = vector.broadcast %943 : f32 to vector<10x16xf32>
    %945 = arith.mulf %944, %910 : vector<10x16xf32>
    %946 = arith.addf %887, %945 : vector<10x16xf32>
    %c151 = arith.constant 151 : index
    %947 = memref.load %arg5[%c151] : memref<256xf32, #tpu.memory_space<smem>>
    %948 = vector.broadcast %947 : f32 to vector<10x16xf32>
    %949 = arith.mulf %948, %910 : vector<10x16xf32>
    %950 = arith.addf %890, %949 : vector<10x16xf32>
    %c199 = arith.constant 199 : index
    %951 = memref.load %arg5[%c199] : memref<256xf32, #tpu.memory_space<smem>>
    %952 = vector.broadcast %951 : f32 to vector<10x16xf32>
    %953 = arith.mulf %952, %910 : vector<10x16xf32>
    %954 = arith.addf %893, %953 : vector<10x16xf32>
    %c215 = arith.constant 215 : index
    %955 = memref.load %arg5[%c215] : memref<256xf32, #tpu.memory_space<smem>>
    %956 = vector.broadcast %955 : f32 to vector<10x16xf32>
    %957 = arith.mulf %956, %910 : vector<10x16xf32>
    %958 = arith.addf %896, %957 : vector<10x16xf32>
    %c167 = arith.constant 167 : index
    %959 = memref.load %arg5[%c167] : memref<256xf32, #tpu.memory_space<smem>>
    %960 = vector.broadcast %959 : f32 to vector<10x16xf32>
    %961 = arith.mulf %960, %910 : vector<10x16xf32>
    %962 = arith.addf %899, %961 : vector<10x16xf32>
    %c183 = arith.constant 183 : index
    %963 = memref.load %arg5[%c183] : memref<256xf32, #tpu.memory_space<smem>>
    %964 = vector.broadcast %963 : f32 to vector<10x16xf32>
    %965 = arith.mulf %964, %910 : vector<10x16xf32>
    %966 = arith.addf %902, %965 : vector<10x16xf32>
    %c231 = arith.constant 231 : index
    %967 = memref.load %arg5[%c231] : memref<256xf32, #tpu.memory_space<smem>>
    %968 = vector.broadcast %967 : f32 to vector<10x16xf32>
    %969 = arith.mulf %968, %910 : vector<10x16xf32>
    %970 = arith.addf %905, %969 : vector<10x16xf32>
    %c247 = arith.constant 247 : index
    %971 = memref.load %arg5[%c247] : memref<256xf32, #tpu.memory_space<smem>>
    %972 = vector.broadcast %971 : f32 to vector<10x16xf32>
    %973 = arith.mulf %972, %910 : vector<10x16xf32>
    %974 = arith.addf %908, %973 : vector<10x16xf32>
    %c2_189 = arith.constant 2 : index
    %c0_190 = arith.constant 0 : index
    %c0_191 = arith.constant 0 : index
    %975 = vector.load %arg8[%c2_189, %c0_190, %c0_191] : memref<4x10x16xf32, #tpu.memory_space<vmem>>, vector<1x10x16xf32>
    %976 = vector.shape_cast %975 : vector<1x10x16xf32> to vector<10x16xf32>
    %c11 = arith.constant 11 : index
    %977 = memref.load %arg5[%c11] : memref<256xf32, #tpu.memory_space<smem>>
    %978 = vector.broadcast %977 : f32 to vector<10x16xf32>
    %979 = arith.mulf %978, %976 : vector<10x16xf32>
    %980 = arith.addf %914, %979 : vector<10x16xf32>
    %c27 = arith.constant 27 : index
    %981 = memref.load %arg5[%c27] : memref<256xf32, #tpu.memory_space<smem>>
    %982 = vector.broadcast %981 : f32 to vector<10x16xf32>
    %983 = arith.mulf %982, %976 : vector<10x16xf32>
    %984 = arith.addf %918, %983 : vector<10x16xf32>
    %c75 = arith.constant 75 : index
    %985 = memref.load %arg5[%c75] : memref<256xf32, #tpu.memory_space<smem>>
    %986 = vector.broadcast %985 : f32 to vector<10x16xf32>
    %987 = arith.mulf %986, %976 : vector<10x16xf32>
    %988 = arith.addf %922, %987 : vector<10x16xf32>
    %c91 = arith.constant 91 : index
    %989 = memref.load %arg5[%c91] : memref<256xf32, #tpu.memory_space<smem>>
    %990 = vector.broadcast %989 : f32 to vector<10x16xf32>
    %991 = arith.mulf %990, %976 : vector<10x16xf32>
    %992 = arith.addf %926, %991 : vector<10x16xf32>
    %c43 = arith.constant 43 : index
    %993 = memref.load %arg5[%c43] : memref<256xf32, #tpu.memory_space<smem>>
    %994 = vector.broadcast %993 : f32 to vector<10x16xf32>
    %995 = arith.mulf %994, %976 : vector<10x16xf32>
    %996 = arith.addf %930, %995 : vector<10x16xf32>
    %c59 = arith.constant 59 : index
    %997 = memref.load %arg5[%c59] : memref<256xf32, #tpu.memory_space<smem>>
    %998 = vector.broadcast %997 : f32 to vector<10x16xf32>
    %999 = arith.mulf %998, %976 : vector<10x16xf32>
    %1000 = arith.addf %934, %999 : vector<10x16xf32>
    %c107 = arith.constant 107 : index
    %1001 = memref.load %arg5[%c107] : memref<256xf32, #tpu.memory_space<smem>>
    %1002 = vector.broadcast %1001 : f32 to vector<10x16xf32>
    %1003 = arith.mulf %1002, %976 : vector<10x16xf32>
    %1004 = arith.addf %938, %1003 : vector<10x16xf32>
    %c123 = arith.constant 123 : index
    %1005 = memref.load %arg5[%c123] : memref<256xf32, #tpu.memory_space<smem>>
    %1006 = vector.broadcast %1005 : f32 to vector<10x16xf32>
    %1007 = arith.mulf %1006, %976 : vector<10x16xf32>
    %1008 = arith.addf %942, %1007 : vector<10x16xf32>
    %c139 = arith.constant 139 : index
    %1009 = memref.load %arg5[%c139] : memref<256xf32, #tpu.memory_space<smem>>
    %1010 = vector.broadcast %1009 : f32 to vector<10x16xf32>
    %1011 = arith.mulf %1010, %976 : vector<10x16xf32>
    %1012 = arith.addf %946, %1011 : vector<10x16xf32>
    %c155 = arith.constant 155 : index
    %1013 = memref.load %arg5[%c155] : memref<256xf32, #tpu.memory_space<smem>>
    %1014 = vector.broadcast %1013 : f32 to vector<10x16xf32>
    %1015 = arith.mulf %1014, %976 : vector<10x16xf32>
    %1016 = arith.addf %950, %1015 : vector<10x16xf32>
    %c203 = arith.constant 203 : index
    %1017 = memref.load %arg5[%c203] : memref<256xf32, #tpu.memory_space<smem>>
    %1018 = vector.broadcast %1017 : f32 to vector<10x16xf32>
    %1019 = arith.mulf %1018, %976 : vector<10x16xf32>
    %1020 = arith.addf %954, %1019 : vector<10x16xf32>
    %c219 = arith.constant 219 : index
    %1021 = memref.load %arg5[%c219] : memref<256xf32, #tpu.memory_space<smem>>
    %1022 = vector.broadcast %1021 : f32 to vector<10x16xf32>
    %1023 = arith.mulf %1022, %976 : vector<10x16xf32>
    %1024 = arith.addf %958, %1023 : vector<10x16xf32>
    %c171 = arith.constant 171 : index
    %1025 = memref.load %arg5[%c171] : memref<256xf32, #tpu.memory_space<smem>>
    %1026 = vector.broadcast %1025 : f32 to vector<10x16xf32>
    %1027 = arith.mulf %1026, %976 : vector<10x16xf32>
    %1028 = arith.addf %962, %1027 : vector<10x16xf32>
    %c187 = arith.constant 187 : index
    %1029 = memref.load %arg5[%c187] : memref<256xf32, #tpu.memory_space<smem>>
    %1030 = vector.broadcast %1029 : f32 to vector<10x16xf32>
    %1031 = arith.mulf %1030, %976 : vector<10x16xf32>
    %1032 = arith.addf %966, %1031 : vector<10x16xf32>
    %c235 = arith.constant 235 : index
    %1033 = memref.load %arg5[%c235] : memref<256xf32, #tpu.memory_space<smem>>
    %1034 = vector.broadcast %1033 : f32 to vector<10x16xf32>
    %1035 = arith.mulf %1034, %976 : vector<10x16xf32>
    %1036 = arith.addf %970, %1035 : vector<10x16xf32>
    %c251 = arith.constant 251 : index
    %1037 = memref.load %arg5[%c251] : memref<256xf32, #tpu.memory_space<smem>>
    %1038 = vector.broadcast %1037 : f32 to vector<10x16xf32>
    %1039 = arith.mulf %1038, %976 : vector<10x16xf32>
    %1040 = arith.addf %974, %1039 : vector<10x16xf32>
    %c3_192 = arith.constant 3 : index
    %c0_193 = arith.constant 0 : index
    %c0_194 = arith.constant 0 : index
    %1041 = vector.load %arg8[%c3_192, %c0_193, %c0_194] : memref<4x10x16xf32, #tpu.memory_space<vmem>>, vector<1x10x16xf32>
    %1042 = vector.shape_cast %1041 : vector<1x10x16xf32> to vector<10x16xf32>
    %c15 = arith.constant 15 : index
    %1043 = memref.load %arg5[%c15] : memref<256xf32, #tpu.memory_space<smem>>
    %1044 = vector.broadcast %1043 : f32 to vector<10x16xf32>
    %1045 = arith.mulf %1044, %1042 : vector<10x16xf32>
    %1046 = arith.addf %980, %1045 : vector<10x16xf32>
    %c31 = arith.constant 31 : index
    %1047 = memref.load %arg5[%c31] : memref<256xf32, #tpu.memory_space<smem>>
    %1048 = vector.broadcast %1047 : f32 to vector<10x16xf32>
    %1049 = arith.mulf %1048, %1042 : vector<10x16xf32>
    %1050 = arith.addf %984, %1049 : vector<10x16xf32>
    %c79 = arith.constant 79 : index
    %1051 = memref.load %arg5[%c79] : memref<256xf32, #tpu.memory_space<smem>>
    %1052 = vector.broadcast %1051 : f32 to vector<10x16xf32>
    %1053 = arith.mulf %1052, %1042 : vector<10x16xf32>
    %1054 = arith.addf %988, %1053 : vector<10x16xf32>
    %c95 = arith.constant 95 : index
    %1055 = memref.load %arg5[%c95] : memref<256xf32, #tpu.memory_space<smem>>
    %1056 = vector.broadcast %1055 : f32 to vector<10x16xf32>
    %1057 = arith.mulf %1056, %1042 : vector<10x16xf32>
    %1058 = arith.addf %992, %1057 : vector<10x16xf32>
    %c47 = arith.constant 47 : index
    %1059 = memref.load %arg5[%c47] : memref<256xf32, #tpu.memory_space<smem>>
    %1060 = vector.broadcast %1059 : f32 to vector<10x16xf32>
    %1061 = arith.mulf %1060, %1042 : vector<10x16xf32>
    %1062 = arith.addf %996, %1061 : vector<10x16xf32>
    %c63 = arith.constant 63 : index
    %1063 = memref.load %arg5[%c63] : memref<256xf32, #tpu.memory_space<smem>>
    %1064 = vector.broadcast %1063 : f32 to vector<10x16xf32>
    %1065 = arith.mulf %1064, %1042 : vector<10x16xf32>
    %1066 = arith.addf %1000, %1065 : vector<10x16xf32>
    %c111 = arith.constant 111 : index
    %1067 = memref.load %arg5[%c111] : memref<256xf32, #tpu.memory_space<smem>>
    %1068 = vector.broadcast %1067 : f32 to vector<10x16xf32>
    %1069 = arith.mulf %1068, %1042 : vector<10x16xf32>
    %1070 = arith.addf %1004, %1069 : vector<10x16xf32>
    %c127 = arith.constant 127 : index
    %1071 = memref.load %arg5[%c127] : memref<256xf32, #tpu.memory_space<smem>>
    %1072 = vector.broadcast %1071 : f32 to vector<10x16xf32>
    %1073 = arith.mulf %1072, %1042 : vector<10x16xf32>
    %1074 = arith.addf %1008, %1073 : vector<10x16xf32>
    %c143 = arith.constant 143 : index
    %1075 = memref.load %arg5[%c143] : memref<256xf32, #tpu.memory_space<smem>>
    %1076 = vector.broadcast %1075 : f32 to vector<10x16xf32>
    %1077 = arith.mulf %1076, %1042 : vector<10x16xf32>
    %1078 = arith.addf %1012, %1077 : vector<10x16xf32>
    %c159 = arith.constant 159 : index
    %1079 = memref.load %arg5[%c159] : memref<256xf32, #tpu.memory_space<smem>>
    %1080 = vector.broadcast %1079 : f32 to vector<10x16xf32>
    %1081 = arith.mulf %1080, %1042 : vector<10x16xf32>
    %1082 = arith.addf %1016, %1081 : vector<10x16xf32>
    %c207 = arith.constant 207 : index
    %1083 = memref.load %arg5[%c207] : memref<256xf32, #tpu.memory_space<smem>>
    %1084 = vector.broadcast %1083 : f32 to vector<10x16xf32>
    %1085 = arith.mulf %1084, %1042 : vector<10x16xf32>
    %1086 = arith.addf %1020, %1085 : vector<10x16xf32>
    %c223 = arith.constant 223 : index
    %1087 = memref.load %arg5[%c223] : memref<256xf32, #tpu.memory_space<smem>>
    %1088 = vector.broadcast %1087 : f32 to vector<10x16xf32>
    %1089 = arith.mulf %1088, %1042 : vector<10x16xf32>
    %1090 = arith.addf %1024, %1089 : vector<10x16xf32>
    %c175 = arith.constant 175 : index
    %1091 = memref.load %arg5[%c175] : memref<256xf32, #tpu.memory_space<smem>>
    %1092 = vector.broadcast %1091 : f32 to vector<10x16xf32>
    %1093 = arith.mulf %1092, %1042 : vector<10x16xf32>
    %1094 = arith.addf %1028, %1093 : vector<10x16xf32>
    %c191 = arith.constant 191 : index
    %1095 = memref.load %arg5[%c191] : memref<256xf32, #tpu.memory_space<smem>>
    %1096 = vector.broadcast %1095 : f32 to vector<10x16xf32>
    %1097 = arith.mulf %1096, %1042 : vector<10x16xf32>
    %1098 = arith.addf %1032, %1097 : vector<10x16xf32>
    %c239 = arith.constant 239 : index
    %1099 = memref.load %arg5[%c239] : memref<256xf32, #tpu.memory_space<smem>>
    %1100 = vector.broadcast %1099 : f32 to vector<10x16xf32>
    %1101 = arith.mulf %1100, %1042 : vector<10x16xf32>
    %1102 = arith.addf %1036, %1101 : vector<10x16xf32>
    %c255 = arith.constant 255 : index
    %1103 = memref.load %arg5[%c255] : memref<256xf32, #tpu.memory_space<smem>>
    %1104 = vector.broadcast %1103 : f32 to vector<10x16xf32>
    %1105 = arith.mulf %1104, %1042 : vector<10x16xf32>
    %1106 = arith.addf %1040, %1105 : vector<10x16xf32>
    %c0_195 = arith.constant 0 : index
    %c0_196 = arith.constant 0 : index
    %1107 = vector.load %arg9[%c0_195, %c0_196] : memref<40x64xf32, #tpu.memory_space<vmem>>, vector<10x16xf32>
    tpu.vector_store %arg9[%c0_195, %c0_196], %1046 {strides = array<i32>} : memref<40x64xf32, #tpu.memory_space<vmem>>, vector<10x16xf32>,
    %c0_197 = arith.constant 0 : index
    %c16_198 = arith.constant 16 : index
    %1108 = vector.load %arg9[%c0_197, %c16_198] : memref<40x64xf32, #tpu.memory_space<vmem>>, vector<10x16xf32>
    tpu.vector_store %arg9[%c0_197, %c16_198], %1050 {strides = array<i32>} : memref<40x64xf32, #tpu.memory_space<vmem>>, vector<10x16xf32>,
    %c0_199 = arith.constant 0 : index
    %c32_200 = arith.constant 32 : index
    %1109 = vector.load %arg9[%c0_199, %c32_200] : memref<40x64xf32, #tpu.memory_space<vmem>>, vector<10x16xf32>
    tpu.vector_store %arg9[%c0_199, %c32_200], %1054 {strides = array<i32>} : memref<40x64xf32, #tpu.memory_space<vmem>>, vector<10x16xf32>,
    %c0_201 = arith.constant 0 : index
    %c48_202 = arith.constant 48 : index
    %1110 = vector.load %arg9[%c0_201, %c48_202] : memref<40x64xf32, #tpu.memory_space<vmem>>, vector<10x16xf32>
    tpu.vector_store %arg9[%c0_201, %c48_202], %1058 {strides = array<i32>} : memref<40x64xf32, #tpu.memory_space<vmem>>, vector<10x16xf32>,
    %c10_203 = arith.constant 10 : index
    %c0_204 = arith.constant 0 : index
    %1111 = vector.load %arg9[%c10_203, %c0_204] : memref<40x64xf32, #tpu.memory_space<vmem>>, vector<10x16xf32>
    tpu.vector_store %arg9[%c10_203, %c0_204], %1062 {strides = array<i32>} : memref<40x64xf32, #tpu.memory_space<vmem>>, vector<10x16xf32>,
    %c10_205 = arith.constant 10 : index
    %c16_206 = arith.constant 16 : index
    %1112 = vector.load %arg9[%c10_205, %c16_206] : memref<40x64xf32, #tpu.memory_space<vmem>>, vector<10x16xf32>
    tpu.vector_store %arg9[%c10_205, %c16_206], %1066 {strides = array<i32>} : memref<40x64xf32, #tpu.memory_space<vmem>>, vector<10x16xf32>,
    %c10_207 = arith.constant 10 : index
    %c32_208 = arith.constant 32 : index
    %1113 = vector.load %arg9[%c10_207, %c32_208] : memref<40x64xf32, #tpu.memory_space<vmem>>, vector<10x16xf32>
    tpu.vector_store %arg9[%c10_207, %c32_208], %1070 {strides = array<i32>} : memref<40x64xf32, #tpu.memory_space<vmem>>, vector<10x16xf32>,
    %c10_209 = arith.constant 10 : index
    %c48_210 = arith.constant 48 : index
    %1114 = vector.load %arg9[%c10_209, %c48_210] : memref<40x64xf32, #tpu.memory_space<vmem>>, vector<10x16xf32>
    tpu.vector_store %arg9[%c10_209, %c48_210], %1074 {strides = array<i32>} : memref<40x64xf32, #tpu.memory_space<vmem>>, vector<10x16xf32>,
    %c20_211 = arith.constant 20 : index
    %c0_212 = arith.constant 0 : index
    %1115 = vector.load %arg9[%c20_211, %c0_212] : memref<40x64xf32, #tpu.memory_space<vmem>>, vector<10x16xf32>
    tpu.vector_store %arg9[%c20_211, %c0_212], %1078 {strides = array<i32>} : memref<40x64xf32, #tpu.memory_space<vmem>>, vector<10x16xf32>,
    %c20_213 = arith.constant 20 : index
    %c16_214 = arith.constant 16 : index
    %1116 = vector.load %arg9[%c20_213, %c16_214] : memref<40x64xf32, #tpu.memory_space<vmem>>, vector<10x16xf32>
    tpu.vector_store %arg9[%c20_213, %c16_214], %1082 {strides = array<i32>} : memref<40x64xf32, #tpu.memory_space<vmem>>, vector<10x16xf32>,
    %c20_215 = arith.constant 20 : index
    %c32_216 = arith.constant 32 : index
    %1117 = vector.load %arg9[%c20_215, %c32_216] : memref<40x64xf32, #tpu.memory_space<vmem>>, vector<10x16xf32>
    tpu.vector_store %arg9[%c20_215, %c32_216], %1086 {strides = array<i32>} : memref<40x64xf32, #tpu.memory_space<vmem>>, vector<10x16xf32>,
    %c20_217 = arith.constant 20 : index
    %c48_218 = arith.constant 48 : index
    %1118 = vector.load %arg9[%c20_217, %c48_218] : memref<40x64xf32, #tpu.memory_space<vmem>>, vector<10x16xf32>
    tpu.vector_store %arg9[%c20_217, %c48_218], %1090 {strides = array<i32>} : memref<40x64xf32, #tpu.memory_space<vmem>>, vector<10x16xf32>,
    %c30_219 = arith.constant 30 : index
    %c0_220 = arith.constant 0 : index
    %1119 = vector.load %arg9[%c30_219, %c0_220] : memref<40x64xf32, #tpu.memory_space<vmem>>, vector<10x16xf32>
    tpu.vector_store %arg9[%c30_219, %c0_220], %1094 {strides = array<i32>} : memref<40x64xf32, #tpu.memory_space<vmem>>, vector<10x16xf32>,
    %c30_221 = arith.constant 30 : index
    %c16_222 = arith.constant 16 : index
    %1120 = vector.load %arg9[%c30_221, %c16_222] : memref<40x64xf32, #tpu.memory_space<vmem>>, vector<10x16xf32>
    tpu.vector_store %arg9[%c30_221, %c16_222], %1098 {strides = array<i32>} : memref<40x64xf32, #tpu.memory_space<vmem>>, vector<10x16xf32>,
    %c30_223 = arith.constant 30 : index
    %c32_224 = arith.constant 32 : index
    %1121 = vector.load %arg9[%c30_223, %c32_224] : memref<40x64xf32, #tpu.memory_space<vmem>>, vector<10x16xf32>
    tpu.vector_store %arg9[%c30_223, %c32_224], %1102 {strides = array<i32>} : memref<40x64xf32, #tpu.memory_space<vmem>>, vector<10x16xf32>,
    %c30_225 = arith.constant 30 : index
    %c48_226 = arith.constant 48 : index
    %1122 = vector.load %arg9[%c30_225, %c48_226] : memref<40x64xf32, #tpu.memory_space<vmem>>, vector<10x16xf32>
    tpu.vector_store %arg9[%c30_225, %c48_226], %1106 {strides = array<i32>} : memref<40x64xf32, #tpu.memory_space<vmem>>, vector<10x16xf32>,
    %c0_227 = arith.constant 0 : index
    %c0_228 = arith.constant 0 : index
    %1123 = vector.load %arg9[%c0_227, %c0_228] : memref<40x64xf32, #tpu.memory_space<vmem>>, vector<40x64xf32>
    %cst_229 = arith.constant dense<0.000000e+00> : vector<16x64xf32>
    %1124 = tpu.matmul %29, %1123, %cst_229 {dimension_numbers = #tpu.dot_dimension_numbers<[1], [0], [0], [1], [0, 0, 1, 1], [], []>} : vector<16x40xf32>, vector<40x64xf32>, vector<16x64xf32> -> vector<16x64xf32>
    %cst_230 = arith.constant dense<0.000000e+00> : vector<16x32xf32>
    %1125 = tpu.matmul %1124, %30, %cst_230 {dimension_numbers = #tpu.dot_dimension_numbers<[1], [0], [0], [1], [0, 0, 1, 1], [], []>} : vector<16x64xf32>, vector<64x32xf32>, vector<16x32xf32> -> vector<16x32xf32>
    %c3_231 = arith.constant 3 : index
    %1126 = memref.load %arg6[%c3_231] : memref<4xf32, #tpu.memory_space<smem>>
    %1127 = vector.broadcast %1126 : f32 to vector<16x32xf32>
    %1128 = arith.addf %1125, %1127 : vector<16x32xf32>
    %1129 = vector.extract_strided_slice %1128 {offsets = [0, 0], sizes = [8, 32], strides = [1, 1]} : vector<16x32xf32> to vector<8x32xf32>
    %1130 = vector.extract_strided_slice %1128 {offsets = [8, 0], sizes = [8, 32], strides = [1, 1]} : vector<16x32xf32> to vector<8x32xf32>
    %1131 = tpu.concatenate %1129, %1130 in 1 : vector<8x32xf32>, vector<8x32xf32> -> vector<8x64xf32>
    %c0_232 = arith.constant 0 : index
    %c3_233 = arith.constant 3 : index
    %c0_234 = arith.constant 0 : index
    %c0_235 = arith.constant 0 : index
    %1132 = vector.load %arg7[%c0_232, %c3_233, %c0_234, %c0_235] : memref<1x4x8x64xf32, #tpu.memory_space<vmem>>, vector<1x1x8x64xf32>
    %1133 = vector.shape_cast %1132 : vector<1x1x8x64xf32> to vector<8x64xf32>
    %1134 = vector.shape_cast %1131 : vector<8x64xf32> to vector<1x1x8x64xf32>
    tpu.vector_store %arg7[%c0_232, %c3_233, %c0_234, %c0_235], %1134 {strides = array<i32>} : memref<1x4x8x64xf32, #tpu.memory_space<vmem>>, vector<1x1x8x64xf32>,
    return
  }
  func.func @transform_0(%arg0: i32, %arg1: i32) -> (i32, i32, i32, i32) {
    %c0_i32 = arith.constant 0 : i32
    %c0_i32_0 = arith.constant 0 : i32
    %c0_i32_1 = arith.constant 0 : i32
    %c0_i32_2 = arith.constant 0 : i32
    return %arg0, %c0_i32, %c0_i32_0, %c0_i32_1 : i32, i32, i32, i32
  }
  func.func @transform_1(%arg0: i32, %arg1: i32) -> (i32, i32) {
    %c0_i32 = arith.constant 0 : i32
    %c0_i32_0 = arith.constant 0 : i32
    %c0_i32_1 = arith.constant 0 : i32
    return %c0_i32, %c0_i32_0 : i32, i32
  }
  func.func @transform_2(%arg0: i32, %arg1: i32) -> (i32, i32) {
    %c0_i32 = arith.constant 0 : i32
    %c0_i32_0 = arith.constant 0 : i32
    %c0_i32_1 = arith.constant 0 : i32
    return %c0_i32, %c0_i32_0 : i32, i32
  }
  func.func @transform_3(%arg0: i32, %arg1: i32) -> i32 {
    %c0_i32 = arith.constant 0 : i32
    %c0_i32_0 = arith.constant 0 : i32
    return %c0_i32 : i32
  }
  func.func @transform_4(%arg0: i32, %arg1: i32) -> i32 {
    %c0_i32 = arith.constant 0 : i32
    %c0_i32_0 = arith.constant 0 : i32
    return %c0_i32 : i32
  }
  func.func @transform_5(%arg0: i32, %arg1: i32) -> (i32, i32, i32, i32) {
    %c0_i32 = arith.constant 0 : i32
    %c0_i32_0 = arith.constant 0 : i32
    %c0_i32_1 = arith.constant 0 : i32
    return %arg0, %c0_i32, %arg1, %c0_i32_0 : i32, i32, i32, i32
  }
}

</mosaic_0001>

<bundles_post_ra>
// kernel: tpu_custom_call.1
= control target key start
LH: loop header
LB: loop body
LE: loop exit
PB: predicated region body
PF: predicated region fallthrough
CT: control target
= control target key end

     0   :  { %s6080_s0 = inlined_call_operand.hbm [shape: f32[2,4,16,16], index: 0, kind: input, shape index: {}]   ;;  %s6081_s1 = inlined_call_operand.vmem [shape: f32[16,40], index: 1, kind: input, shape index: {}]   ;;  %s6082_s2 = inlined_call_operand.vmem [shape: f32[64,32], index: 2, kind: input, shape index: {}]   ;;  %s6083_s3 = inlined_call_operand.vmem [shape: f32[256], index: 3, kind: input, shape index: {}]   ;;  %s6084_s4 = inlined_call_operand.vmem [shape: f32[4], index: 4, kind: input, shape index: {}]   ;;  %s6085_s5 = inlined_call_operand.hbm [shape: f32[2,4,16,64], index: 5, kind: output, shape index: {}]  }
   0x1   :  { %6119 = sst [smem:[#allocation37_spill]] %s6080_s0 }
   0x2   :  { %6120 = sst [smem:[#allocation38_spill]] %s6081_s1 }
   0x3   :  { %6121 = sst [smem:[#allocation39_spill]] %s6082_s2 }
   0x4   :  { %6122 = sst [smem:[#allocation40_spill]] %s6083_s3 }
   0x5   :  { %6123 = sst [smem:[#allocation41_spill]] %s6084_s4 }
   0x6   :  { %6124 = sst [smem:[#allocation42_spill]] %s6085_s5 }
   0x7   :  { %10 = vsyncpa [#allocation5], 0 }
   0x8   :  { %12 = vsyncpa [#allocation5 + $0x1], 0 }
   0x9   :  { %13 = vsyncpa [#allocation7], 0 }
   0xa   :  { %14 = vsyncpa [#allocation10], 0 }
   0xb   :  { %15 = vsyncpa [#allocation6], 0 }
   0xc   :  { %17 = vsyncpa [#allocation6 + $0x1], 0  ;;  %s3407_s18 = smov 0   ;;  %s3409_s19 = smov 0  }
   0xd   :  { %s3411_s20 = smov 0   ;;  %s3413_s21 = smov 0  }
   0xe   :  { %s3415_s22 = smov 0   ;;  %s3417_s23 = smov 0  }
   0xf   :  { %s3419_s24 = smov 0   ;;  %s3421_s25 = smov 0  }
  0x10   :  { %s3423_s26 = smov 0   ;;  %s3425_s27 = smov 0  }
  0x11   :  { %s3427_s28 = smov 0  }
  0x12 LB: > { %6125 = sst [smem:[#allocation16_spill]] %s3325_s18  ;;  %s2711_s29 = sadd.s32 4294967295, %s3365_s28   ;;  %s3365_s28 = sphi %s3427_s28, %s23_s28   ;;  %s3361_s27 = sphi %s3425_s27, %s6193_s27   ;;  %s3357_s26 = sphi %s3423_s26, %s6192_s26   ;;  %s3353_s25 = sphi %s3421_s25, %s6191_s25   ;;  %s3349_s24 = sphi %s3419_s24, %s6190_s24   ;;  %s3345_s23 = sphi %s3417_s23, %s6189_s23   ;;  %s3341_s22 = sphi %s3415_s22, %s6188_s22   ;;  %s3337_s21 = sphi %s3413_s21, %s6187_s21   ;;  %s3333_s20 = sphi %s3411_s20, %s6186_s20   ;;  %s3329_s19 = sphi %s3409_s19, %s6185_s19   ;;  %s3325_s18 = sphi %s3407_s18, %s6184_s18  }
  0x13   : > { %6126 = sst [smem:[#allocation17_spill]] %s3329_s19  ;;  %s2712_s30 = sadd.s32 4294967294, %s3365_s28  }
  0x14   : > { %6127 = sst [smem:[#allocation18_spill]] %s3333_s20  ;;  %p49_p0 = scmp.ne.s32.totalorder %s3345_s23, %s3341_s22 }
  0x15   : > { %6128 = sst [smem:[#allocation19_spill]] %s3341_s22  ;;  %p50_p1 = scmp.eq.s32.totalorder %s3365_s28, 0 }
  0x16   : > { %6129 = sst [smem:[#allocation20_spill]] %s3345_s23  ;;  %p55_p2 = scmp.ne.s32.totalorder %s3341_s22, %s3337_s21 }
  0x17   : > { %6130 = sst [smem:[#allocation21_spill]] %s3349_s24  ;;  %p3467_p3 = scmp.eq.s32.totalorder %s2711_s29, 0 }
  0x18   : > { %6131 = sst [smem:[#allocation22_spill]] %s3353_s25  ;;  %p3472_p4 = por %p50_p1, %p49_p0 }
  0x19   : > { %6132 = sst [smem:[#allocation23_spill]] %s3357_s26  ;;  %p164_p5 = scmp.ne.s32.totalorder %s3333_s20, %s3329_s19 }
  0x1a   : > { %6133 = sst [smem:[#allocation24_spill]] %s3361_s27  ;;  %p3480_p6 = por %p3467_p3, %p55_p2 }
  0x1b   : > { %6134 = sst [smem:[#allocation25_spill]] %s3365_s28  ;;  %p165_p7 = scmp.eq.s32.totalorder %s2711_s29, 3 }
  0x1c   : > { %p170_p8 = scmp.ne.s32.totalorder %s3329_s19, %s3325_s18  ;;  %p171_p9 = scmp.eq.s32.totalorder %s2712_s30, 3 }
  0x1d   : > { %p3486_p10 = por %p165_p7, %p164_p5  ;;  %p2713_p11 = scmp.ge.s32.totalorder %s3365_s28, 1 }
  0x1e   : > { %p3491_p12 = por %p171_p9, %p170_p8  ;;  %p178_p13 = scmp.lt.s32.totalorder %s3365_s28, 5 }
  0x1f   : > { %s6138_s11 = scalar_select %p3486_p10, 1, 0 }
  0x20   : > { %s6140_s12 = scalar_select %p3491_p12, 1, 0 }
  0x21   : > { %6139 = sst [smem:[#allocation26_spill]] %s6138_s11  ;;  %p3499_p0 = pnand %p2713_p11, %p178_p13 }
  0x22   : > { %6141 = sst [smem:[#allocation27_spill]] %s6140_s12  ;;  %p3039_p2 = scmp.lt.s32.totalorder %s3365_s28, 4 }
  0x23   : > { %s6142_s3 = sld [smem:[#allocation40_spill]]  ;;  %p3022_p1 = pneg %p3499_p0 }
  0x24   : > { %s6144_s4 = sld [smem:[#allocation41_spill]]  ;;  %p3513_p7 = pnand %p3039_p2, %p3472_p4 }
  0x25   : > { %p3023_p5 = pnand %p3022_p1, %p3467_p3  ;;  %s3367_s13 = smov [#allocation8]  }
  0x26   : > { %s3368_s14 = smov [#allocation9]   ;;  %s32_s8 = sadd.s32 1, %s3357_s26 }
  0x27   : > { %p33_p8 = scmp.ge.s32.totalorder %s32_s8, 2  ;;  %s35_s6 = sadd.s32 1, %s3361_s27 }
  0x28   : > { %s3009_s17 = sshll.u32 %s3361_s27, 6  ;;  %s6147_s0 = sld [smem:[#allocation37_spill]] }
  0x29   : > { %s196_s15 = sshll.u32 %s6142_s3, 4  ;;  %s217_s3 = sand.u32 1, %s3345_s23   ;;  %s197_s15 = int_to_ptr.vmem [resolvable:$true] %s196_s15 }
  0x2a   : > { %s206_s29 = sshll.u32 %s6144_s4, 4  ;;  %s6195_s8 = smov (%p33_p8, %s32_s8), 0  ;;  %s207_s29 = int_to_ptr.vmem [resolvable:$true] %s206_s29 }
  0x2b   : > { %3025 = dma.vmem_to_smem (!%p3023_p5), %s197_s15, 32, %s3367_s13, [#allocation7]  }
  0x2c   : > { %3028 = dma.vmem_to_smem (!%p3023_p5), %s207_s29, 16, %s3368_s14, [#allocation10]  }
  0x2d   : > { %6146 = sst [smem:[#allocation28_spill]] %s6195_s8  ;;  %s6197_s6 = smov (!%p33_p8, %s35_s6), %s3361_s27 }
  0x2e   : > { %s150_s9 = ssub.s32 %s3357_s26, %s6195_s8  ;;  %p37_p4 = scmp.ge.s32.totalorder %s6197_s6, 2 }
  0x2f   : > { %s2717_s21 = sshll.u32 %s217_s3, 6  ;;  %s226_s29 = scalar_lea.hbm %s6147_s0, %s3009_s17 }
  0x30   : > { %s6199_s6 = smov (%p37_p4, %s6197_s6), 0  ;;  %s227_s14 = sshll.u32 %s226_s29, 4  ;;  %s228_s14 = int_to_ptr.hbm [resolvable:$true] %s227_s14 }
  0x31   : > { %6148 = sst [smem:[#allocation29_spill]] %s6199_s6  ;;  %s221_s4 = scalar_lea.vmem [#allocation4], %s2717_s21 }
  0x32   : > { %s229_s12 = sshll.u32 %s221_s4, 4  ;;  %s39_s18 = ssub.s32 %s3361_s27, %s6199_s6  ;;  %s230_s12 = int_to_ptr.vmem [resolvable:$true] %s229_s12 }
  0x33   : > { %p40_p9 = scmp.eq.s32.totalorder %s39_s18, 0  ;;  %s151_s28 = sor.u32 %s150_s9, %s39_s18 }
  0x34   : > { %p152_p11 = scmp.eq.s32.totalorder %s151_s28, 0  ;;  %s6149_s8 = sadd.s32 1, %s3345_s23 }
  0x35   : > { %s3536_s26 = scalar_select %p40_p9, %s3345_s23, %s6149_s8  }
  0x36   : > { %s6151_s5 = sadd.s32 1, %s3333_s20  ;;  %s218_s17 = scalar_lea.sflag [#allocation5], %s217_s3 }
  0x37   : > { %6150 = sst [smem:[#allocation30_spill]] %s3536_s26  ;;  %s3369_s15 = smov 128  }
  0x38   : > { %s3541_s11 = scalar_select %p152_p11, %s3333_s20, %s6151_s5  }
  0x39   : > { %s3370_s13 = smov 8   ;;  %241 = sbr.rel (%p3499_p0) target bundleno = 873 (0x369), region = 40 }
  0x3a   : > { %6152 = sst [smem:[#allocation31_spill]] %s3541_s11 }
  0x3b   : > { %3032 = dma.hbm_to_vmem [thread:$0]  (!%p3513_p7), %s228_s14, 1024, %s230_s12, %s218_s17, %s3369_s15, %s3369_s15, %s3370_s13  }
  0x3e   : > { %s243_s4 = sand.u32 1, %s3341_s22  }
  0x3f   : > { %s2721_s18 = sshll.u32 %s243_s4, 6  ;;  %s244_s28 = scalar_lea.sflag [#allocation5], %s243_s4 }
  0x40   : > { %s3548_s9 = scalar_lea.vmem [#allocation4], %s2721_s18 }
  0x41   : > { %3308 = dma.done.wait (%p3480_p6), %s244_s28, 1024  }
  0x42   : > { %3310 = vsyncadd (%p3480_p6), %s244_s28, 4294966272 }
  0x43   : > { %3312 = dma.done.wait (%p3467_p3), [#allocation7], 32  }
  0x44   : > { %3314 = vsyncadd (%p3467_p3), [#allocation7], 4294967264 }
  0x45   : > { %3316 = dma.done.wait (%p3467_p3), [#allocation10], 16  }
  0x46   : > { %3318 = vsyncadd (%p3467_p3), [#allocation10], 4294967280 }
  0x47   : > { %263 = sfence }
  0x48   : > { %s2725_s3 = sshll.u32 %s3349_s24, 3  ;;  %vm309_vm0 = vcmask 122880   ;;  %vm319_vm1 = vcmask 130048   ;;  %s3566_s14 = sld [smem:[#allocation8 + $0xe0]]  ;;  %vm722_vm2 = vcmask 261248   ;;  %vm734_vm3 = vcmask 392448  }
  0x49   : > { %s2726_s5 = sadd.s32 4294967295, %s2725_s3  ;;  %s290_s8 = sadd.s32 8, %s2725_s3  ;;  %vm712_vm4 = vcmask 123904   ;;  %vm746_vm5 = vcmask 523648   ;;  %vm724_vm6 = vcmask 255104   ;;  %vm736_vm7 = vcmask 386304  }
  0x4a   : > { %p288_p13 = scmp.gt.s32.totalorder %s2726_s5, 0  ;;  %p291_p6 = scmp.lt.s32.totalorder %s290_s8, 15  ;;  %vm748_vm8 = vcmask 517504   ;;  %vm851_vm9 = vcmask 326656   ;;  %vm883_vm10 = vcmask 523264   ;;  %vm917_vm11 = vcmask 261120  }
  0x4b   : > { %p293_p0 = scmp.gt.s32.totalorder %s2725_s3, 0  ;;  %p296_p1 = scmp.lt.s32.totalorder %s290_s8, 16 }
  0x4c   : > { %s6201_s5 = smov (!%p288_p13, %s2726_s5), 0  ;;  %s6203_s8 = smov (!%p291_p6, %s290_s8), 15 }
  0x4d   : > { %s294_s10 = scalar_select %p293_p0, 1, 0 }
  0x4e   : > { %s297_s12 = scalar_select %p296_p1, 1, 0  ;;  %v407_v22 = vstv %s3566_s14 }
  0x4f   : > { %s295_s16 = scvt.s32.f32 %s294_s10  ;;  %s299_s30 = scalar_lea.vmem %s3548_s9, %s6201_s5 [#allocation4] }
  0x50   : > { %s298_s7 = scvt.s32.f32 %s297_s12  ;;  %v300_v0 = vld [vmem:[%s299_s30] sm:$0x1]  ;;  %v301_v1 = vld [vmem:[%s299_s30 + $0x10] sm:$0x1]  ;;  %s314_s21 = scalar_lea.vmem %s3548_s9, %s2725_s3 [#allocation4] }
  0x51   : > { %v302_v2 = vld [vmem:[%s299_s30 + $0x20] sm:$0x1]  ;;  %v303_v3 = vld [vmem:[%s299_s30 + $0x30] sm:$0x1]  ;;  %v304_v4 = vstv %s295_s16  ;;  %s324_s29 = scalar_lea.vmem %s3548_s9, %s6203_s8 [#allocation4]  ;;  %s3569_s17 = sld [smem:[#allocation8 + $0xe4]] }
  0x52   : > { %v315_v5 = vld [vmem:[%s314_s21] sm:$0xff]  ;;  %v316_v6 = vld [vmem:[%s314_s21 + $0x10] sm:$0xff]  ;;  %v305_v7 = vmul.f32 %v304_v4, %v300_v0  ;;  %v306_v8 = vmul.f32 %v304_v4, %v301_v1  ;;  %v307_v9 = vmul.f32 %v304_v4, %v302_v2  ;;  %v308_v10 = vmul.f32 %v304_v4, %v303_v3  ;;  %s3573_s15 = sld [smem:[#allocation8 + $0xe8]]  ;;  %s6153_s0 = smov 16  }
  0x53   : > { %320 = vst.msk [vmem:[#allocation2 + $0x1] sm:$0xff] %vm319_vm1, %v315_v5  ;;  %v317_v11 = vld [vmem:[%s314_s21 + $0x20] sm:$0xff]  ;;  %v329_v13 = vstv %s298_s7  ;;  %v318_v14 = vld [vmem:[%s314_s21 + $0x30] sm:$0xff]  ;;  %s3576_s13 = sld [smem:[#allocation8 + $0xec]]  ;;  %s6155_s11 = smov 48  }
  0x54   : > { %321 = vst.msk [vmem:[#allocation2 + $0x11] sm:$0xff] %vm319_vm1, %v316_v6  ;;  %v325_v12 = vld [vmem:[%s324_s29] sm:$0x1]  ;;  %v326_v15 = vld [vmem:[%s324_s29 + $0x10] sm:$0x1]  ;;  %s3579_s4 = sld [smem:[#allocation8 + $0xb0]] }
  0x55   : > { %310 = vst.msk [vmem:[#allocation2] sm:$0x1] %vm309_vm0, %v305_v7  ;;  %v327_v16 = vld [vmem:[%s324_s29 + $0x20] sm:$0x1]  ;;  %v328_v17 = vld [vmem:[%s324_s29 + $0x30] sm:$0x1]  ;;  %v330_v18 = vmul.f32 %v329_v13, %v325_v12  ;;  %v331_v19 = vmul.f32 %v329_v13, %v326_v15 }
  0x56   : > { %311 = vst.msk [vmem:[#allocation2 + $0x10] sm:$0x1] %vm309_vm0, %v306_v8  ;;  %s3582_s18 = sld [smem:[#allocation8 + $0xb4]]  ;;  %v332_v20 = vmul.f32 %v329_v13, %v327_v16  ;;  %v333_v21 = vmul.f32 %v329_v13, %v328_v17 }
  0x57   : > { %312 = vst.msk [vmem:[#allocation2 + $0x20] sm:$0x1] %vm309_vm0, %v307_v9  ;;  %s3585_s28 = sld [smem:[#allocation8 + $0xb8]]  ;;  %v502_v23 = vstv %s3569_s17 }
  0x58   : > { %313 = vst.msk [vmem:[#allocation2 + $0x30] sm:$0x1] %vm309_vm0, %v308_v10  ;;  %s3589_s9 = sld [smem:[#allocation8 + $0xbc]]  ;;  %v601_v29 = vstv %s3573_s15  ;;  %s6095_s15 = smov 32  }
  0x59   : > { %322 = vst.msk [vmem:[#allocation2 + $0x21] sm:$0xff] %vm319_vm1, %v317_v11  ;;  %s3593_s3 = sld [smem:[#allocation8 + $0xf0]]  ;;  %v700_v32 = vstv %s3576_s13  ;;  %s6097_s13 = smov 16  }
  0x5a   : > { %323 = vst.msk [vmem:[#allocation2 + $0x31] sm:$0xff] %vm319_vm1, %v318_v14  ;;  %s3598_s5 = sld [smem:[#allocation8 + $0xf4]]  ;;  %v403_v27 = vstv %s3579_s4 }
  0x5b   : > { %334 = vst.msk [vmem:[#allocation2 + $0x9] sm:$0x1] %vm309_vm0, %v330_v18  ;;  %s3605_s8 = sld [smem:[#allocation8 + $0xf8]] }
  0x5c   : > { %335 = vst.msk [vmem:[#allocation2 + $0x19] sm:$0x1] %vm309_vm0, %v331_v19  ;;  %v3596_v24 = vld [vmem:[#allocation2] sm:$0xff]  ;;  %v496_v31 = vstv %s3582_s18  ;;  %s3612_s10 = sld [smem:[#allocation8 + $0xfc]] }
  0x5d   : > { %336 = vst.msk [vmem:[#allocation2 + $0x29] sm:$0x1] %vm309_vm0, %v332_v20  ;;  %v408_v25 = vmul.f32 %v407_v22, %v3596_v24  ;;  %v3602_v26 = vld [vmem:[#allocation2 + $0x10] sm:$0xff]  ;;  %v404_v30 = vmul.f32 %v403_v27, %v3596_v24  ;;  %v595_v34 = vstv %s3585_s28  ;;  %s3617_s12 = sld [smem:[#allocation8 + $0x30]] }
  0x5e   : > { %337 = vst.msk [vmem:[#allocation2 + $0x39] sm:$0x1] %vm309_vm0, %v333_v21  ;;  %v503_v28 = vmul.f32 %v502_v23, %v3602_v26  ;;  %v497_v33 = vmul.f32 %v496_v31, %v3602_v26  ;;  %v694_v37 = vstv %s3589_s9  ;;  %s3622_s16 = sld [smem:[#allocation8 + $0x34]] }
  0x5f   : > { %v411_v42 = vstv %s3593_s3  ;;  %s3629_s30 = sld [smem:[#allocation8 + $0x38]] }
  0x60   : > { %v505_v35 = vadd.f32 %v503_v28, %v408_v25  ;;  %v3619_v36 = vld [vmem:[#allocation2 + $0x20] sm:$0xff]  ;;  %v499_v40 = vadd.f32 %v497_v33, %v404_v30  ;;  %v412_v46 = vmul.f32 %v411_v42, %v3596_v24  ;;  %v508_v47 = vstv %s3598_s5  ;;  %s3639_s7 = sld [smem:[#allocation8 + $0x3c]] }
  0x61   : > { %v602_v38 = vmul.f32 %v601_v29, %v3619_v36  ;;  %v3625_v39 = vld [vmem:[#allocation2 + $0x30] sm:$0xff]  ;;  %v596_v41 = vmul.f32 %v595_v34, %v3619_v36  ;;  %s3645_s21 = sld [smem:[#allocation8 + $0xc0]]  ;;  %v509_v56 = vmul.f32 %v508_v47, %v3602_v26  ;;  %v607_v57 = vstv %s3605_s8 }
  0x62   : > { %v3631_v43 = vld [vmem:[#allocation2 + $0x8] sm:$0x3]  ;;  %v701_v44 = vmul.f32 %v700_v32, %v3625_v39  ;;  %v695_v45 = vmul.f32 %v694_v37, %v3625_v39  ;;  %s3655_s29 = sld [smem:[#allocation8 + $0xc4]]  ;;  %v608_v0 = vmul.f32 %v607_v57, %v3619_v36  ;;  %v706_v1 = vstv %s3612_s10 }
  0x63   : > { %v409_v48 = vmul.f32 %v407_v22, %v3631_v43  ;;  %v3642_v49 = vld [vmem:[#allocation2 + $0x18] sm:$0x3]  ;;  %v604_v50 = vadd.f32 %v602_v38, %v505_v35  ;;  %v405_v51 = vmul.f32 %v403_v27, %v3631_v43  ;;  %v598_v52 = vadd.f32 %v596_v41, %v499_v40  ;;  %s3657_s14 = sld [smem:[#allocation8 + $0xc8]] }
  0x64   : > { %v504_v53 = vmul.f32 %v502_v23, %v3642_v49  ;;  %v3648_v54 = vld [vmem:[#allocation2 + $0x28] sm:$0x3]  ;;  %v498_v55 = vmul.f32 %v496_v31, %v3642_v49  ;;  %v511_v63 = vadd.f32 %v509_v56, %v412_v46  ;;  %s3666_s17 = sld [smem:[#allocation8 + $0xcc]]  ;;  %v371_v2 = vstv %s3617_s12 }
  0x65   : > { %v703_v58 = vadd.f32 %v701_v44, %v604_v50  ;;  %v697_v59 = vadd.f32 %v695_v45, %v598_v52  ;;  %v603_v60 = vmul.f32 %v601_v29, %v3648_v54  ;;  %v3660_v61 = vld [vmem:[#allocation2 + $0x38] sm:$0x3]  ;;  %v597_v62 = vmul.f32 %v595_v34, %v3648_v54  ;;  %s3672_s4 = sld [smem:[#allocation8 + $0x90]] }
  0x66   : > { %v500_v3 = vadd.f32 %v498_v55, %v405_v51  ;;  %v506_v4 = vadd.f32 %v504_v53, %v409_v48  ;;  %v610_v5 = vadd.f32 %v608_v0, %v511_v63  ;;  %v707_v6 = vmul.f32 %v706_v1, %v3625_v39  ;;  %s3681_s18 = sld [smem:[#allocation8 + $0x94]] }
  0x67   : > { %828 = vrot.lane.b32.xlu1 %v703_v58, %s6095_s15  ;;  %818 = vrot.lane.b32.xlu0 %v697_v59, %s6097_s13  ;;  %v372_v7 = vmul.f32 %v371_v2, %v3596_v24  ;;  %v448_v8 = vstv %s3622_s16  ;;  %v702_v9 = vmul.f32 %v700_v32, %v3660_v61  ;;  %v547_v11 = vstv %s3629_s30  ;;  %s3689_s28 = sld [smem:[#allocation8 + $0x98]] }
  0x68   : > { %v449_v10 = vmul.f32 %v448_v8, %v3602_v26  ;;  %v646_v12 = vstv %s3639_s7  ;;  %v696_v13 = vmul.f32 %v694_v37, %v3660_v61  ;;  %v709_v14 = vadd.f32 %v707_v6, %v610_v5  ;;  %s3695_s9 = sld [smem:[#allocation8 + $0x9c]] }
  0x69   : > { %v548_v15 = vmul.f32 %v547_v11, %v3619_v36  ;;  %v599_v16 = vadd.f32 %v597_v62, %v500_v3  ;;  %v647_v18 = vmul.f32 %v646_v12, %v3625_v39  ;;  %v391_v19 = vstv %s3645_s21  ;;  %s3702_s15 = sld [smem:[#allocation8 + $0xd0]] }
  0x6a   : > { %v451_v17 = vadd.f32 %v449_v10, %v372_v7  ;;  %v478_v20 = vstv %s3655_s29  ;;  %v605_v21 = vadd.f32 %v603_v60, %v506_v4  ;;  %v393_v22 = vmul.f32 %v391_v19, %v3631_v43  ;;  %s3707_s13 = sld [smem:[#allocation8 + $0xd4]] }
  0x6b   : > { %v480_v23 = vmul.f32 %v478_v20, %v3642_v49  ;;  %v577_v25 = vstv %s3657_s14  ;;  %v676_v29 = vstv %s3666_s17  ;;  %v387_v30 = vstv %s3672_s4  ;;  %s3712_s21 = sld [smem:[#allocation8 + $0xd8]]  ;;  %s6099_s14 = smov 48  }
  0x6c   : > { %v550_v27 = vadd.f32 %v548_v15, %v451_v17  ;;  %v579_v28 = vmul.f32 %v577_v25, %v3648_v54  ;;  %v698_v31 = vadd.f32 %v696_v13, %v599_v16  ;;  %v678_v33 = vmul.f32 %v676_v29, %v3660_v61  ;;  %s3716_s29 = sld [smem:[#allocation8 + $0xdc]] }
  0x6d   : > { %v482_v32 = vadd.f32 %v480_v23, %v393_v22  ;;  %v388_v34 = vmul.f32 %v387_v30, %v3596_v24  ;;  %v472_v37 = vstv %s3681_s18  ;;  %v571_v38 = vstv %s3689_s28  ;;  %s3724_s17 = sld [smem:[#allocation8 + $0x60]] }
  0x6e   : > { %v649_v35 = vadd.f32 %v647_v18, %v550_v27  ;;  %v413_v40 = vmul.f32 %v411_v42, %v3631_v43  ;;  %v704_v41 = vadd.f32 %v702_v9, %v605_v21  ;;  %v473_v45 = vmul.f32 %v472_v37, %v3602_v26  ;;  %s3728_s4 = sld [smem:[#allocation8 + $0x64]] }
  0x6f   : > { %838 = vrot.lane.b32.xlu0 %v709_v14, %s6099_s14  ;;  %v581_v44 = vadd.f32 %v579_v28, %v482_v32  ;;  %v572_v46 = vmul.f32 %v571_v38, %v3619_v36  ;;  %v389_v48 = vmul.f32 %v387_v30, %v3631_v43  ;;  %v670_v50 = vstv %s3695_s9  ;;  %s3739_s3 = sld [smem:[#allocation8 + $0x68]]  ;;  %s6154_s9 = smov 32  }
  0x70   : > { %754 = vrot.lane.b32.xlu1 %v649_v35, %s6153_s0  ;;  %v510_v42 = vmul.f32 %v508_v47, %v3642_v49  ;;  %v609_v51 = vmul.f32 %v607_v57, %v3648_v54  ;;  %v474_v52 = vmul.f32 %v472_v37, %v3642_v49  ;;  %v475_v53 = vadd.f32 %v473_v45, %v388_v34  ;;  %s3744_s18 = sld [smem:[#allocation8 + $0x6c]] }
  0x71   : > { %v573_v55 = vmul.f32 %v571_v38, %v3648_v54  ;;  %v671_v56 = vmul.f32 %v670_v50, %v3625_v39  ;;  %v680_v58 = vadd.f32 %v678_v33, %v581_v44  ;;  %v395_v47 = vstv %s3702_s15  ;;  %s3748_s5 = sld [smem:[#allocation8 + $0x10]] }
  0x72   : > { %v512_v59 = vadd.f32 %v510_v42, %v413_v40  ;;  %v484_v60 = vstv %s3707_s13  ;;  %v574_v57 = vadd.f32 %v572_v46, %v475_v53  ;;  %v396_v62 = vmul.f32 %v395_v47, %v3596_v24  ;;  %s3753_s8 = sld [smem:[#allocation8 + $0x14]] }
  0x73   : > { %v485_v63 = vmul.f32 %v484_v60, %v3602_v26  ;;  %v583_v0 = vstv %s3712_s21  ;;  %v708_v4 = vmul.f32 %v706_v1, %v3660_v61  ;;  %v682_v5 = vstv %s3716_s29  ;;  %s3760_s28 = sld [smem:[#allocation8 + $0x18]] }
  0x74   : > { %v611_v3 = vadd.f32 %v609_v51, %v512_v59  ;;  %v392_v6 = vmul.f32 %v391_v19, %v3596_v24  ;;  %v673_v7 = vadd.f32 %v671_v56, %v574_v57  ;;  %v584_v10 = vmul.f32 %v583_v0, %v3619_v36  ;;  %s3764_s15 = sld [smem:[#allocation8 + $0x1c]] }
  0x75   : > { %v487_v9 = vadd.f32 %v485_v63, %v396_v62  ;;  %v479_v13 = vmul.f32 %v478_v20, %v3602_v26  ;;  %v672_v1 = vmul.f32 %v670_v50, %v3660_v61  ;;  %v683_v14 = vmul.f32 %v682_v5, %v3625_v39  ;;  %s3771_s10 = sld [smem:[#allocation8 + $0x70]] }
  0x76   : > { %v578_v15 = vmul.f32 %v577_v25, %v3619_v36  ;;  %v397_v16 = vmul.f32 %v395_v47, %v3631_v43  ;;  %786 = vrot.lane.b32.xlu2 %v673_v7, %s6153_s0  ;;  %v677_v18 = vmul.f32 %v676_v29, %v3625_v39  ;;  %v486_v19 = vmul.f32 %v484_v60, %v3642_v49  ;;  %s3777_s13 = sld [smem:[#allocation8 + $0x74]] }
  0x77   : > { %820 = vrot.lane.b32.xlu0 %v698_v31, %s6153_s0  ;;  %v481_v17 = vadd.f32 %v479_v13, %v392_v6  ;;  %v585_v20 = vmul.f32 %v583_v0, %v3648_v54  ;;  %v710_v21 = vadd.f32 %v708_v4, %v611_v3  ;;  %v375_v22 = vstv %s3724_s17  ;;  %s3783_s21 = sld [smem:[#allocation8 + $0x78]] }
  0x78   : > { %830 = vrot.lane.b32.xlu1 %v704_v41, %s6154_s9  ;;  %v454_v23 = vstv %s3728_s4  ;;  %v553_v25 = vstv %s3739_s3  ;;  %v586_v27 = vadd.f32 %v584_v10, %v487_v9  ;;  %v488_v29 = vadd.f32 %v486_v19, %v397_v16  ;;  %s3788_s29 = sld [smem:[#allocation8 + $0x7c]] }
  0x79   : > { %v580_v28 = vadd.f32 %v578_v15, %v481_v17  ;;  %v377_v30 = vmul.f32 %v375_v22, %v3631_v43  ;;  %v456_v31 = vmul.f32 %v454_v23, %v3642_v49  ;;  %v555_v32 = vmul.f32 %v553_v25, %v3648_v54  ;;  %s3797_s14 = sld [smem:[#allocation8 + $0x40]] }
  0x7a   : > { %v652_v33 = vstv %s3744_s18  ;;  %v476_v34 = vadd.f32 %v474_v52, %v389_v48  ;;  %v587_v37 = vadd.f32 %v585_v20, %v488_v29  ;;  %v684_v38 = vmul.f32 %v682_v5, %v3660_v61  ;;  %s3801_s6 = sld [smem:[#allocation8 + $0x44]] }
  0x7b   : > { %v679_v35 = vadd.f32 %v677_v18, %v580_v28  ;;  %v355_v40 = vstv %s3748_s5  ;;  %v458_v41 = vadd.f32 %v456_v31, %v377_v30  ;;  %v424_v46 = vstv %s3753_s8  ;;  %s3807_s27 = sld [smem:[#allocation8 + $0x48]] }
  0x7c   : > { %v575_v44 = vadd.f32 %v573_v55, %v476_v34  ;;  %v357_v45 = vmul.f32 %v355_v40, %v3631_v43  ;;  %v654_v48 = vmul.f32 %v652_v33, %v3660_v61  ;;  %v426_v50 = vmul.f32 %v424_v46, %v3642_v49  ;;  %s3816_s26 = sld [smem:[#allocation8 + $0x4c]] }
  0x7d   : > { %v523_v42 = vstv %s3760_s28  ;;  %v685_v51 = vadd.f32 %v683_v14, %v586_v27  ;;  %v557_v52 = vadd.f32 %v555_v32, %v458_v41  ;;  %v622_v55 = vstv %s3764_s15  ;;  %s3823_s23 = sld [smem:[#allocation8 + $0x50]] }
  0x7e   : > { %v525_v53 = vmul.f32 %v523_v42, %v3648_v54  ;;  %796 = vrot.lane.b32.xlu2 %v679_v35, %s6154_s9  ;;  %v428_v56 = vadd.f32 %v426_v50, %v357_v45  ;;  %v379_v59 = vstv %s3771_s10  ;;  %v460_v47 = vstv %s3777_s13  ;;  %s3829_s22 = sld [smem:[#allocation8 + $0x54]] }
  0x7f   : > { %798 = vrot.lane.b32.xlu0 %v680_v58, %s6154_s9  ;;  %v559_v58 = vstv %s3783_s21  ;;  %v686_v60 = vadd.f32 %v684_v38, %v587_v37  ;;  %v674_v57 = vadd.f32 %v672_v1, %v575_v44  ;;  %v381_v62 = vmul.f32 %v379_v59, %v3631_v43  ;;  %s3838_s20 = sld [smem:[#allocation8 + $0x58]] }
  0x80   : > { %840 = vrot.lane.b32.xlu1 %v710_v21, %s6155_s11  ;;  %v462_v63 = vmul.f32 %v460_v47, %v3642_v49  ;;  %v3840_v0 = vadd.f32 %v654_v48, %v557_v52  ;;  %v624_v3 = vmul.f32 %v622_v55, %v3660_v61  ;;  %v373_v4 = vmul.f32 %v371_v2, %v3631_v43  ;;  %s3851_s24 = sld [smem:[#allocation8 + $0x5c]] }
  0x81   : > { %v450_v5 = vmul.f32 %v448_v8, %v3642_v49  ;;  %v527_v6 = vadd.f32 %v525_v53, %v428_v56  ;;  %v561_v7 = vmul.f32 %v559_v58, %v3648_v54  ;;  %v658_v9 = vstv %s3788_s29  ;;  %s3860_s25 = sld [smem:[#allocation8 + $0x31]] }
  0x82   : > { %v549_v10 = vmul.f32 %v547_v11, %v3648_v54  ;;  %v464_v13 = vadd.f32 %v462_v63, %v381_v62  ;;  %v359_v1 = vstv %s3797_s14  ;;  %v430_v14 = vstv %s3801_s6  ;;  %s3864_s12 = sld [smem:[#allocation8 + $0x35]] }
  0x83   : > { %v452_v2 = vadd.f32 %v450_v5, %v373_v4  ;;  %v648_v8 = vmul.f32 %v646_v12, %v3660_v61  ;;  %v361_v15 = vmul.f32 %v359_v1, %v3631_v43  ;;  %v432_v16 = vmul.f32 %v430_v14, %v3642_v49  ;;  %s3872_s16 = sld [smem:[#allocation8 + $0x39]]  ;;  %v3938_v5 = vld [vmem:[#allocation2 + $0x18] sm:$0x3] }
  0x84   : > { %v529_v11 = vstv %s3807_s27  ;;  %v628_v19 = vstv %s3816_s26  ;;  %v363_v20 = vstv %s3823_s23  ;;  %s3877_s6 = sld [smem:[#allocation8 + $0x3d]]  ;;  %v626_v12 = vadd.f32 %v624_v3, %v527_v6 }
  0x85   : > { %v551_v17 = vadd.f32 %v549_v10, %v452_v2  ;;  %v531_v18 = vmul.f32 %v529_v11, %v3648_v54  ;;  %v660_v21 = vmul.f32 %v658_v9, %v3660_v61  ;;  %v434_v27 = vadd.f32 %v432_v16, %v361_v15  ;;  %s3898_s26 = sld [smem:[#allocation8 + $0x91]] }
  0x86   : > { %v365_v28 = vmul.f32 %v363_v20, %v3631_v43  ;;  %788 = vrot.lane.b32.xlu2 %v674_v57, %s6153_s0  ;;  %v563_v29 = vadd.f32 %v561_v7, %v464_v13  ;;  %v436_v30 = vstv %s3829_s22  ;;  %v535_v31 = vstv %s3838_s20  ;;  %s3909_s27 = sld [smem:[#allocation8 + $0x95]] }
  0x87   : > { %806 = vrot.lane.b32.xlu0 %v685_v51, %s6155_s11  ;;  %v634_v32 = vstv %s3851_s24  ;;  %v650_v34 = vadd.f32 %v648_v8, %v551_v17  ;;  %v630_v35 = vmul.f32 %v628_v19, %v3660_v61  ;;  %v438_v37 = vmul.f32 %v436_v30, %v3642_v49  ;;  %s3916_s30 = sld [smem:[#allocation8 + $0x99]]  ;;  %v3970_v17 = vld [vmem:[#allocation2 + $0x38] sm:$0x3] }
  0x88   : > { %808 = vrot.lane.b32.xlu1 %v686_v60, %s6155_s11  ;;  %v537_v43 = vmul.f32 %v535_v31, %v3648_v54  ;;  %v533_v38 = vadd.f32 %v531_v18, %v434_v27  ;;  %v376_v41 = vmul.f32 %v375_v22, %v3596_v24  ;;  %v455_v44 = vmul.f32 %v454_v23, %v3602_v26  ;;  %s3923_s7 = sld [smem:[#allocation8 + $0x9d]] }
  0x89   : > { %v554_v45 = vmul.f32 %v553_v25, %v3619_v36  ;;  %v440_v49 = vadd.f32 %v438_v37, %v365_v28  ;;  %v636_v48 = vmul.f32 %v634_v32, %v3660_v61  ;;  %v360_v54 = vmul.f32 %v359_v1, %v3596_v24  ;;  %s3927_s14 = sld [smem:[#allocation8 + $0xb1]] }
  0x8a   : > { %v431_v50 = vmul.f32 %v430_v14, %v3602_v26  ;;  %v457_v22 = vadd.f32 %v455_v44, %v376_v41  ;;  %v653_v23 = vmul.f32 %v652_v33, %v3625_v39  ;;  %v530_v25 = vmul.f32 %v529_v11, %v3619_v36  ;;  %v3932_v33 = vld [vmem:[#allocation2 + $0x8] sm:$0x3]  ;;  %s3934_s17 = sld [smem:[#allocation8 + $0xb5]] }
  0x8b   : > { %v943_v51 = vstv %s3860_s25  ;;  %v539_v52 = vadd.f32 %v537_v43, %v440_v49  ;;  %v1019_v56 = vstv %s3864_s12  ;;  %v1117_v62 = vstv %s3872_s16  ;;  %s3940_s25 = sld [smem:[#allocation8 + $0xb9]] }
  0x8c   : > { %v433_v53 = vadd.f32 %v431_v50, %v360_v54  ;;  %v944_v61 = vmul.f32 %v943_v51, %v3596_v24  ;;  %v556_v60 = vadd.f32 %v554_v45, %v457_v22  ;;  %v1020_v57 = vmul.f32 %v1019_v56, %v3602_v26  ;;  %s3950_s4 = sld [smem:[#allocation8 + $0xbd]] }
  0x8d   : > { %v1215_v63 = vstv %s3877_s6  ;;  %v662_v3 = vadd.f32 %v660_v21, %v563_v29  ;;  %v632_v4 = vadd.f32 %v630_v35, %v533_v38  ;;  %v629_v7 = vmul.f32 %v628_v19, %v3625_v39  ;;  %s3962_s3 = sld [smem:[#allocation8 + $0x61]] }
  0x8e   : > { %756 = vrot.lane.b32.xlu2 %v650_v34, %s6153_s0  ;;  %v532_v6 = vadd.f32 %v530_v25, %v433_v53  ;;  %v380_v10 = vmul.f32 %v379_v59, %v3596_v24  ;;  %v461_v13 = vmul.f32 %v460_v47, %v3602_v26  ;;  %v1118_v2 = vmul.f32 %v1117_v62, %v3619_v36  ;;  %v3960_v59 = vld [vmem:[#allocation2 + $0x28] sm:$0x3]  ;;  %s3968_s18 = sld [smem:[#allocation8 + $0x65]] }
  0x8f   : > { %766 = vrot.lane.b32.xlu0 %v3840_v0, %s6154_s9  ;;  %v3953_v0 = vadd.f32 %v636_v48, %v539_v52  ;;  %v3957_v1 = vmul.f32 %v1215_v63, %v3625_v39  ;;  %v945_v14 = vmul.f32 %v943_v51, %v3932_v33  ;;  %v655_v47 = vadd.f32 %v653_v23, %v556_v60  ;;  %s3975_s10 = sld [smem:[#allocation8 + $0x69]] }
  0x90   : > { %718 = vrot.lane.b32.xlu1 %v626_v12, %s6153_s0  ;;  %v1022_v8 = vadd.f32 %v1020_v57, %v944_v61  ;;  %v560_v15 = vmul.f32 %v559_v58, %v3619_v36  ;;  %v1021_v16 = vmul.f32 %v1019_v56, %v3938_v5  ;;  %v463_v11 = vadd.f32 %v461_v13, %v380_v10  ;;  %s3983_s13 = sld [smem:[#allocation8 + $0x6d]] }
  0x91   : > { %v959_v18 = vstv %s3898_s26  ;;  %v1043_v19 = vstv %s3909_s27  ;;  %v1141_v12 = vstv %s3916_s30  ;;  %v3977_v21 = vadd.f32 %v629_v7, %v532_v6  ;;  %s3993_s21 = sld [smem:[#allocation8 + $0xc1]] }
  0x92   : > { %v1023_v27 = vadd.f32 %v1021_v16, %v945_v14  ;;  %v1119_v58 = vmul.f32 %v1117_v62, %v3960_v59  ;;  %v961_v28 = vmul.f32 %v959_v18, %v3932_v33  ;;  %v659_v29 = vmul.f32 %v658_v9, %v3625_v39  ;;  %s4002_s29 = sld [smem:[#allocation8 + $0xc5]] }
  0x93   : > { %v1045_v34 = vmul.f32 %v1043_v19, %v3938_v5  ;;  %v1239_v35 = vstv %s3923_s7  ;;  %v975_v37 = vstv %s3927_s14  ;;  %v1120_v43 = vadd.f32 %v1118_v2, %v1022_v8  ;;  %s4007_s12 = sld [smem:[#allocation8 + $0xc9]] }
  0x94   : > { %v1217_v38 = vmul.f32 %v1215_v63, %v3970_v17  ;;  %v1143_v41 = vmul.f32 %v1141_v12, %v3960_v59  ;;  %v976_v9 = vmul.f32 %v975_v37, %v3596_v24  ;;  %v562_v44 = vadd.f32 %v560_v15, %v463_v11  ;;  %s4019_s16 = sld [smem:[#allocation8 + $0xcd]] }
  0x95   : > { %v1047_v45 = vadd.f32 %v1045_v34, %v961_v28  ;;  %v1067_v49 = vstv %s3934_s17  ;;  %v1165_v48 = vstv %s3940_s25  ;;  %v1121_v54 = vadd.f32 %v1119_v58, %v1023_v27  ;;  %s4032_s6 = sld [smem:[#allocation8 + $0xe1]] }
  0x96   : > { %764 = vrot.lane.b32.xlu2 %v655_v47, %s6154_s9  ;;  %v1241_v50 = vmul.f32 %v1239_v35, %v3970_v17  ;;  %v1068_v22 = vmul.f32 %v1067_v49, %v3602_v26  ;;  %v1166_v23 = vmul.f32 %v1165_v48, %v3619_v36  ;;  %v1263_v25 = vstv %s3950_s4  ;;  %s4036_s19 = sld [smem:[#allocation8 + $0xe5]] }
  0x97   : > { %776 = vrot.lane.b32.xlu0 %v662_v3, %s6155_s11  ;;  %v356_v51 = vmul.f32 %v355_v40, %v3596_v24  ;;  %v425_v52 = vmul.f32 %v424_v46, %v3602_v26  ;;  %v524_v53 = vmul.f32 %v523_v42, %v3619_v36  ;;  %v1145_v61 = vadd.f32 %v1143_v41, %v1047_v45  ;;  %s4040_s5 = sld [smem:[#allocation8 + $0xe9]] }
  0x98   : > { %730 = vrot.lane.b32.xlu1 %v632_v4, %s6154_s9  ;;  %v1070_v56 = vadd.f32 %v1068_v22, %v976_v9  ;;  %v947_v60 = vstv %s3962_s3  ;;  %v1025_v57 = vstv %s3968_s18  ;;  %v661_v62 = vadd.f32 %v659_v29, %v562_v44  ;;  %s4047_s8 = sld [smem:[#allocation8 + $0xed]] }
  0x99   : > { %v427_v63 = vadd.f32 %v425_v52, %v356_v51  ;;  %v948_v40 = vmul.f32 %v947_v60, %v3596_v24  ;;  %v1026_v3 = vmul.f32 %v1025_v57, %v3602_v26  ;;  %v1264_v42 = vmul.f32 %v1263_v25, %v3625_v39  ;;  %s4054_s28 = sld [smem:[#allocation8 + $0x11]] }
  0x9a   : > { %v1168_v46 = vadd.f32 %v1166_v23, %v1070_v56  ;;  %v1123_v4 = vstv %s3975_s10  ;;  %v1221_v6 = vstv %s3983_s13  ;;  %v1218_v7 = vadd.f32 %v3957_v1, %v1120_v43  ;;  %s4059_s3 = sld [smem:[#allocation8 + $0x15]] }
  0x9b   : > { %v526_v10 = vadd.f32 %v524_v53, %v427_v63  ;;  %v623_v13 = vmul.f32 %v622_v55, %v3625_v39  ;;  %v949_v2 = vmul.f32 %v947_v60, %v3932_v33  ;;  %v1219_v14 = vadd.f32 %v1217_v38, %v1121_v54  ;;  %s4073_s15 = sld [smem:[#allocation8 + $0x19]] }
  0x9c   : > { %v4056_v47 = vadd.f32 %v1241_v50, %v1145_v61  ;;  %v1028_v8 = vadd.f32 %v1026_v3, %v948_v40  ;;  %v1027_v15 = vmul.f32 %v1025_v57, %v3938_v5  ;;  %v1124_v55 = vmul.f32 %v1123_v4, %v3619_v36  ;;  %s4081_s23 = sld [smem:[#allocation8 + $0x1d]] }
  0x9d   : > { %v4065_v1 = vmul.f32 %v1221_v6, %v3625_v39  ;;  %v364_v16 = vmul.f32 %v363_v20, %v3596_v24  ;;  %v437_v11 = vmul.f32 %v436_v30, %v3602_v26  ;;  %v1125_v27 = vmul.f32 %v1123_v4, %v3960_v59  ;;  %s4089_s22 = sld [smem:[#allocation8 + $0x71]] }
  0x9e   : > { %774 = vrot.lane.b32.xlu2 %v661_v62, %s6155_s11  ;;  %v1223_v58 = vmul.f32 %v1221_v6, %v3970_v17  ;;  %v963_v28 = vstv %s3993_s21  ;;  %v625_v20 = vadd.f32 %v623_v13, %v526_v10  ;;  %v1029_v30 = vadd.f32 %v1027_v15, %v949_v2  ;;  %s4098_s18 = sld [smem:[#allocation8 + $0x75]] }
  0x9f   : > { %742 = vrot.lane.b32.xlu0 %v3953_v0, %s6155_s11  ;;  %v4076_v0 = vadd.f32 %v1264_v42, %v1168_v46  ;;  %v965_v29 = vmul.f32 %v963_v28, %v3932_v33  ;;  %v1049_v34 = vstv %s4002_s29  ;;  %v439_v43 = vadd.f32 %v437_v11, %v364_v16  ;;  %s4112_s20 = sld [smem:[#allocation8 + $0x79]] }
  0xa0   : > { %728 = vrot.lane.b32.xlu1 %v3977_v21, %s6154_s9  ;;  %v536_v38 = vmul.f32 %v535_v31, %v3619_v36  ;;  %v1051_v21 = vmul.f32 %v1049_v34, %v3938_v5  ;;  %v1147_v41 = vstv %s4007_s12  ;;  %v1126_v9 = vadd.f32 %v1124_v55, %v1028_v8  ;;  %s4119_s24 = sld [smem:[#allocation8 + $0x7d]] }
  0xa1   : > { %v1149_v44 = vmul.f32 %v1147_v41, %v3960_v59  ;;  %v1245_v45 = vstv %s4019_s16  ;;  %v979_v54 = vstv %s4032_s6  ;;  %v635_v50 = vmul.f32 %v634_v32, %v3625_v39  ;;  %s4130_s10 = sld [smem:[#allocation8 + $0xd1]] }
  0xa2   : > { %v1053_v31 = vadd.f32 %v1051_v21, %v965_v29  ;;  %v980_v22 = vmul.f32 %v979_v54, %v3596_v24  ;;  %v1073_v23 = vstv %s4036_s19  ;;  %v1127_v51 = vadd.f32 %v1125_v27, %v1029_v30  ;;  %s4139_s13 = sld [smem:[#allocation8 + $0xd5]] }
  0xa3   : > { %6156 = sst [smem:[#allocation32_spill]] %s4089_s22  ;;  %v1074_v52 = vmul.f32 %v1073_v23, %v3602_v26  ;;  %v1171_v53 = vstv %s4040_s5  ;;  %v1269_v61 = vstv %s4047_s8  ;;  %v538_v32 = vadd.f32 %v536_v38, %v439_v43 }
  0xa4   : > { %6157 = sst [smem:[#allocation33_spill]] %s4098_s18  ;;  %v1247_v56 = vmul.f32 %v1245_v45, %v3970_v17  ;;  %v1172_v60 = vmul.f32 %v1171_v53, %v3619_v36  ;;  %v960_v57 = vmul.f32 %v959_v18, %v3596_v24  ;;  %v1151_v62 = vadd.f32 %v1149_v44, %v1053_v31 }
  0xa5   : > { %v1076_v63 = vadd.f32 %v1074_v52, %v980_v22  ;;  %v1270_v40 = vmul.f32 %v1269_v61, %v3625_v39  ;;  %v1044_v3 = vmul.f32 %v1043_v19, %v3602_v26  ;;  %v1142_v18 = vmul.f32 %v1141_v12, %v3619_v36  ;;  %s4148_s26 = sld [smem:[#allocation8 + $0xd9]] }
  0xa6   : > { %716 = vrot.lane.b32.xlu2 %v625_v20, %s6153_s0  ;;  %v927_v46 = vstv %s4054_s28  ;;  %v995_v42 = vstv %s4059_s3  ;;  %v1093_v4 = vstv %s4073_s15  ;;  %s4157_s27 = sld [smem:[#allocation8 + $0xdd]]  ;;  %v1224_v8 = vadd.f32 %v4065_v1, %v1126_v9 }
  0xa7   : > { %1316 = vrot.lane.b32.xlu0 %v1218_v7, %s6153_s0  ;;  %v1174_v6 = vadd.f32 %v1172_v60, %v1076_v63  ;;  %v1046_v19 = vadd.f32 %v1044_v3, %v960_v57  ;;  %v929_v7 = vmul.f32 %v927_v46, %v3932_v33  ;;  %v997_v10 = vmul.f32 %v995_v42, %v3938_v5  ;;  %s4165_s30 = sld [smem:[#allocation8 + $0xf1]] }
  0xa8   : > { %1318 = vrot.lane.b32.xlu1 %v1219_v14, %s6153_s0  ;;  %v1095_v12 = vmul.f32 %v1093_v4, %v3960_v59  ;;  %v1191_v13 = vstv %s4081_s23  ;;  %v951_v2 = vstv %s4089_s22  ;;  %v1031_v14 = vstv %s4098_s18  ;;  %s4170_s2 = sld [smem:[#allocation8 + $0xf5]] }
  0xa9   : > { %v4168_v15 = vadd.f32 %v1223_v58, %v1127_v51  ;;  %v637_v55 = vadd.f32 %v635_v50, %v538_v32  ;;  %v999_v16 = vadd.f32 %v997_v10, %v929_v7  ;;  %v1240_v11 = vmul.f32 %v1239_v35, %v3625_v39  ;;  %s4182_s1 = sld [smem:[#allocation8 + $0xf9]] }
  0xaa   : > { %v952_v27 = vmul.f32 %v951_v2, %v3596_v24  ;;  %v1032_v20 = vmul.f32 %v1031_v14, %v3602_v26  ;;  %v1129_v1 = vstv %s4112_s20  ;;  %v4184_v58 = vadd.f32 %v1247_v56, %v1151_v62  ;;  %s4191_s7 = sld [smem:[#allocation8 + $0xfd]] }
  0xab   : > { %v4186_v30 = vadd.f32 %v1270_v40, %v1174_v6  ;;  %v1144_v29 = vadd.f32 %v1142_v18, %v1046_v19  ;;  %v1193_v35 = vmul.f32 %v1191_v13, %v3970_v17  ;;  %v1097_v43 = vadd.f32 %v1095_v12, %v999_v16  ;;  %s4200_s18 = sld [smem:[#allocation8 + $0x41]] }
  0xac   : > { %v1227_v38 = vstv %s4119_s24  ;;  %v977_v21 = vmul.f32 %v975_v37, %v3932_v33  ;;  %v1069_v9 = vmul.f32 %v1067_v49, %v3938_v5  ;;  %v1034_v44 = vadd.f32 %v1032_v20, %v952_v27  ;;  %s4209_s22 = sld [smem:[#allocation8 + $0x45]] }
  0xad   : > { %v1130_v50 = vmul.f32 %v1129_v1, %v3619_v36  ;;  %v967_v31 = vstv %s4130_s10  ;;  %v1055_v22 = vstv %s4139_s13  ;;  %v1167_v49 = vmul.f32 %v1165_v48, %v3960_v59  ;;  %s4217_s14 = sld [smem:[#allocation8 + $0x49]] }
  0xae   : > { %740 = vrot.lane.b32.xlu2 %v637_v55, %s6155_s11  ;;  %v1071_v37 = vadd.f32 %v1069_v9, %v977_v21  ;;  %v968_v51 = vmul.f32 %v967_v31, %v3596_v24  ;;  %v1242_v52 = vadd.f32 %v1240_v11, %v1144_v29  ;;  %v1153_v32 = vstv %s4148_s26  ;;  %s4224_s17 = sld [smem:[#allocation8 + $0x4d]] }
  0xaf   : > { %1350 = vrot.lane.b32.xlu0 %v4056_v47, %s6153_s0  ;;  %v1056_v47 = vmul.f32 %v1055_v22, %v3602_v26  ;;  %v969_v56 = vmul.f32 %v967_v31, %v3932_v33  ;;  %v1057_v60 = vmul.f32 %v1055_v22, %v3938_v5  ;;  %v1228_v48 = vmul.f32 %v1227_v38, %v3625_v39  ;;  %s4231_s25 = sld [smem:[#allocation8 + $0xa0]] }
  0xb0   : > { %1380 = vrot.lane.b32.xlu1 %v4076_v0, %s6153_s0  ;;  %v1154_v62 = vmul.f32 %v1153_v32, %v3619_v36  ;;  %v1251_v63 = vstv %s4157_s27  ;;  %v4233_v0 = vadd.f32 %v1193_v35, %v1097_v43  ;;  %v1265_v40 = vmul.f32 %v1263_v25, %v3970_v17  ;;  %s4239_s10 = sld [smem:[#allocation8 + $0xa4]] }
  0xb1   : > { %v1058_v57 = vadd.f32 %v1056_v47, %v968_v51  ;;  %v1059_v3 = vadd.f32 %v1057_v60, %v969_v56  ;;  %v1155_v18 = vmul.f32 %v1153_v32, %v3960_v59  ;;  %v1132_v6 = vadd.f32 %v1130_v50, %v1034_v44  ;;  %s4247_s4 = sld [smem:[#allocation8 + $0xa8]] }
  0xb2   : > { %v1169_v19 = vadd.f32 %v1167_v49, %v1071_v37  ;;  %v964_v7 = vmul.f32 %v963_v28, %v3596_v24  ;;  %v1050_v10 = vmul.f32 %v1049_v34, %v3602_v26  ;;  %v1252_v25 = vmul.f32 %v1251_v63, %v3625_v39  ;;  %s4255_s21 = sld [smem:[#allocation8 + $0xac]] }
  0xb3   : > { %v1253_v12 = vmul.f32 %v1251_v63, %v3970_v17  ;;  %v1148_v55 = vmul.f32 %v1147_v41, %v3619_v36  ;;  %v983_v16 = vstv %s4165_s30  ;;  %v1156_v24 = vadd.f32 %v1154_v62, %v1058_v57  ;;  %s4261_s29 = sld [smem:[#allocation8 + $0x80]]  ;;  %v4317_v63 = vld [vmem:[#allocation2 + $0x10] sm:$0xff] }
  0xb4   : > { %v1052_v28 = vadd.f32 %v1050_v10, %v964_v7  ;;  %v985_v26 = vmul.f32 %v983_v16, %v3932_v33  ;;  %v1079_v34 = vstv %s4170_s2  ;;  %v1157_v41 = vadd.f32 %v1155_v18, %v1059_v3  ;;  %s4271_s12 = sld [smem:[#allocation8 + $0x84]] }
  0xb5   : > { %v1246_v11 = vmul.f32 %v1245_v45, %v3625_v39  ;;  %v1081_v27 = vmul.f32 %v1079_v34, %v3938_v5  ;;  %v1177_v20 = vstv %s4182_s1  ;;  %v931_v43 = vstv %s4200_s18  ;;  %s4279_s16 = sld [smem:[#allocation8 + $0x88]] }
  0xb6   : > { %1348 = vrot.lane.b32.xlu2 %v1242_v52, %s6153_s0  ;;  %v1150_v29 = vadd.f32 %v1148_v55, %v1052_v28  ;;  %v1179_v35 = vmul.f32 %v1177_v20, %v3960_v59  ;;  %v933_v45 = vmul.f32 %v931_v43, %v3932_v33  ;;  %v1001_v21 = vstv %s4209_s22  ;;  %s4293_s13 = sld [smem:[#allocation8 + $0x8c]]  ;;  %v4356_v28 = vld [vmem:[#allocation2 + $0x20] sm:$0xff] }
  0xb7   : > { %1326 = vrot.lane.b32.xlu0 %v1224_v8, %s6154_s9  ;;  %v1275_v8 = vstv %s4191_s7  ;;  %v1083_v39 = vadd.f32 %v1081_v27, %v985_v26  ;;  %v1099_v9 = vstv %s4217_s14  ;;  %v4288_v44 = vadd.f32 %v1228_v48, %v1132_v6  ;;  %s4323_s19 = sld [smem:[#allocation8 + $0x20]] }
  0xb8   : > { %1328 = vrot.lane.b32.xlu1 %v4168_v15, %s6154_s9  ;;  %v1267_v50 = vadd.f32 %v1265_v40, %v1169_v19  ;;  %v4290_v31 = vadd.f32 %v1252_v25, %v1156_v24  ;;  %v1003_v22 = vmul.f32 %v1001_v21, %v3938_v5  ;;  %v4295_v15 = vadd.f32 %v1253_v12, %v1157_v41  ;;  %v4333_v19 = vld [vmem:[#allocation2] sm:$0xff]  ;;  %s4338_s6 = sld [smem:[#allocation8 + $0x24]] }
  0xb9   : > { %v1197_v37 = vstv %s4224_s17  ;;  %v981_v49 = vmul.f32 %v979_v54, %v3932_v33  ;;  %v1075_v51 = vmul.f32 %v1073_v23, %v3938_v5  ;;  %v1277_v47 = vmul.f32 %v1275_v8, %v3970_v17  ;;  %s4344_s5 = sld [smem:[#allocation8 + $0x28]] }
  0xba   : > { %v1005_v52 = vadd.f32 %v1003_v22, %v933_v45  ;;  %v1101_v32 = vmul.f32 %v1099_v9, %v3960_v59  ;;  %v399_v56 = vstv %s4231_s25  ;;  %v1248_v60 = vadd.f32 %v1246_v11, %v1150_v29  ;;  %s4361_s8 = sld [smem:[#allocation8 + $0x2c]] }
  0xbb   : > { %v1181_v48 = vadd.f32 %v1179_v35, %v1083_v39  ;;  %v490_v57 = vstv %s4239_s10  ;;  %v589_v62 = vstv %s4247_s4  ;;  %v1199_v54 = vmul.f32 %v1197_v37, %v3970_v17  ;;  %s4373_s26 = sld [smem:[#allocation8 + $0x92]] }
  0xbc   : > { %v1173_v23 = vmul.f32 %v1171_v53, %v3960_v59  ;;  %v491_v40 = vmul.f32 %v4317_v63, %v490_v57  ;;  %v688_v3 = vstv %s4255_s21  ;;  %v1077_v18 = vadd.f32 %v1075_v51, %v981_v49  ;;  %s4381_s14 = sld [smem:[#allocation8 + $0x96]] }
  0xbd   : > { %v1271_v6 = vmul.f32 %v1269_v61, %v3970_v17  ;;  %v590_v53 = vmul.f32 %v589_v62, %v3619_v36  ;;  %v400_v7 = vmul.f32 %v4333_v19, %v399_v56  ;;  %v383_v10 = vstv %s4261_s29  ;;  %v4348_v36 = vld [vmem:[#allocation2 + $0x30] sm:$0xff]  ;;  %s4387_s28 = sld [smem:[#allocation8 + $0x9a]] }
  0xbe   : > { %1382 = vrot.lane.b32.xlu2 %v1267_v50, %s6153_s0  ;;  %v466_v61 = vstv %s4271_s12  ;;  %v565_v25 = vstv %s4279_s16  ;;  %v689_v12 = vmul.f32 %v4348_v36, %v688_v3  ;;  %v664_v41 = vstv %s4293_s13  ;;  %s4396_s3 = sld [smem:[#allocation8 + $0x9e]] }
  0xbf   : > { %1360 = vrot.lane.b32.xlu0 %v4184_v58, %s6154_s9  ;;  %v1103_v58 = vadd.f32 %v1101_v32, %v1005_v52  ;;  %v493_v55 = vadd.f32 %v491_v40, %v400_v7  ;;  %v467_v24 = vmul.f32 %v4317_v63, %v466_v61  ;;  %v566_v26 = vmul.f32 %v4356_v28, %v565_v25  ;;  %v4440_v7 = vld [vmem:[#allocation2 + $0x8] sm:$0x3]  ;;  %s4442_s15 = sld [smem:[#allocation8 + $0xb2]] }
  0xc0   : > { %1390 = vrot.lane.b32.xlu1 %v4186_v30, %s6154_s9  ;;  %v384_v30 = vmul.f32 %v4333_v19, %v383_v10  ;;  %v928_v11 = vmul.f32 %v4333_v19, %v927_v46  ;;  %v996_v27 = vmul.f32 %v4317_v63, %v995_v42  ;;  %v1175_v29 = vadd.f32 %v1173_v23, %v1077_v18  ;;  %s4454_s23 = sld [smem:[#allocation8 + $0xb6]] }
  0xc1   : > { %v592_v35 = vadd.f32 %v590_v53, %v493_v55  ;;  %v665_v39 = vmul.f32 %v4348_v36, %v664_v41  ;;  %v1094_v45 = vmul.f32 %v4356_v28, %v1093_v4  ;;  %v932_v46 = vmul.f32 %v4333_v19, %v931_v43  ;;  %s4468_s18 = sld [smem:[#allocation8 + $0xba]] }
  0xc2   : > { %v469_v50 = vadd.f32 %v467_v24, %v384_v30  ;;  %v998_v22 = vadd.f32 %v996_v27, %v928_v11  ;;  %v1002_v42 = vmul.f32 %v4317_v63, %v1001_v21  ;;  %v1192_v51 = vmul.f32 %v4348_v36, %v1191_v13  ;;  %v4452_v30 = vld [vmem:[#allocation2 + $0x18] sm:$0x3]  ;;  %s4473_s20 = sld [smem:[#allocation8 + $0xbe]] }
  0xc3   : > { %v691_v49 = vadd.f32 %v689_v12, %v592_v35  ;;  %v1100_v52 = vmul.f32 %v4356_v28, %v1099_v9  ;;  %v953_v4 = vmul.f32 %v951_v2, %v3932_v33  ;;  %v1033_v23 = vmul.f32 %v1031_v14, %v3938_v5  ;;  %v4461_v35 = vld [vmem:[#allocation2 + $0x30] sm:$0xff]  ;;  %s4477_s24 = sld [smem:[#allocation8 + $0xc2]] }
  0xc4   : > { %v568_v32 = vadd.f32 %v566_v26, %v469_v50  ;;  %v1096_v43 = vadd.f32 %v1094_v45, %v998_v22  ;;  %v1004_v21 = vadd.f32 %v1002_v42, %v932_v46  ;;  %v4403_v13 = vadd.f32 %v1277_v47, %v1181_v48  ;;  %v4450_v26 = vld [vmem:[#allocation2 + $0x20] sm:$0xff]  ;;  %s4488_s30 = sld [smem:[#allocation8 + $0xc6]] }
  0xc5   : > { %v4405_v9 = vadd.f32 %v1199_v54, %v1103_v58  ;;  %v1273_v40 = vadd.f32 %v1271_v6, %v1175_v29  ;;  %814 = vst.msk [vmem:[#allocation3 + $0x1e] sm:$0xff] %vm319_vm1, %v691_v49  ;;  %v4412_v18 = vmul.f32 %v4348_v36, %v1197_v37  ;;  %v1131_v14 = vmul.f32 %v1129_v1, %v3960_v59  ;;  %v4429_v54 = vld [vmem:[#allocation2] sm:$0xff]  ;;  %v4431_v6 = vld [vmem:[#allocation2 + $0x10] sm:$0xff]  ;;  %s4497_s17 = sld [smem:[#allocation8 + $0xca]] }
  0xc6   : > { %1358 = vrot.lane.b32.xlu2 %v1248_v60, %s6154_s9  ;;  %v667_v2 = vadd.f32 %v665_v39, %v568_v32  ;;  %v4424_v47 = vadd.f32 %v1192_v51, %v1096_v43  ;;  %v367_v60 = vstv %s4323_s19  ;;  %v442_v48 = vstv %s4338_s6  ;;  %v4463_v39 = vld [vmem:[#allocation2 + $0x28] sm:$0x3]  ;;  %s4511_s1 = sld [smem:[#allocation8 + $0xce]] }
  0xc7   : > { %1286 = vrot.lane.b32.xlu0 %v4233_v0, %s6153_s0  ;;  %v4420_v0 = vmul.f32 %v1227_v38, %v3970_v17  ;;  %v541_v37 = vstv %s4344_s5  ;;  %v1102_v1 = vadd.f32 %v1100_v52, %v1004_v21  ;;  %v1035_v38 = vadd.f32 %v1033_v23, %v953_v4  ;;  %v4483_v21 = vld [vmem:[#allocation2 + $0x38] sm:$0x3]  ;;  %s4525_s2 = sld [smem:[#allocation8 + $0x51]] }
  0xc8   : > { %1336 = vrot.lane.b32.xlu1 %v4288_v44, %s6155_s11  ;;  %782 = vst.msk [vmem:[#allocation3 + $0x14] sm:$0xff] %vm319_vm1, %v667_v2  ;;  %v443_v44 = vmul.f32 %v4317_v63, %v442_v48  ;;  %v542_v53 = vmul.f32 %v4356_v28, %v541_v37  ;;  %v640_v58 = vstv %s4361_s8  ;;  %v368_v12 = vmul.f32 %v4333_v19, %v367_v60  ;;  %s4535_s7 = sld [smem:[#allocation8 + $0x55]] }
  0xc9   : > { %v1513_v55 = vstv %s4373_s26  ;;  %v1597_v24 = vstv %s4381_s14  ;;  %v641_v11 = vmul.f32 %v4348_v36, %v640_v58  ;;  %v984_v45 = vmul.f32 %v4333_v19, %v983_v16  ;;  %s4547_s25 = sld [smem:[#allocation8 + $0x59]] }
  0xca   : > { %v1514_v27 = vmul.f32 %v1513_v55, %v4429_v54  ;;  %v1598_v29 = vmul.f32 %v1597_v24, %v4431_v6  ;;  %v445_v50 = vadd.f32 %v443_v44, %v368_v12  ;;  %v1695_v22 = vstv %s4387_s28  ;;  %v4506_v12 = vld [vmem:[#allocation2 + $0x18] sm:$0x3]  ;;  %s4554_s10 = sld [smem:[#allocation8 + $0x5d]] }
  0xcb   : > { %v1793_v46 = vstv %s4396_s3  ;;  %v1515_v42 = vmul.f32 %v1513_v55, %v4440_v7  ;;  %v1133_v49 = vadd.f32 %v1131_v14, %v1035_v38  ;;  %v1696_v52 = vmul.f32 %v1695_v22, %v4450_v26  ;;  %s4559_s4 = sld [smem:[#allocation8 + $0xa1]] }
  0xcc   : > { %v1600_v51 = vadd.f32 %v1598_v29, %v1514_v27  ;;  %v1599_v4 = vmul.f32 %v1597_v24, %v4452_v30  ;;  %v544_v16 = vadd.f32 %v542_v53, %v445_v50  ;;  %v1794_v32 = vmul.f32 %v1793_v46, %v4461_v35  ;;  %v4501_v53 = vld [vmem:[#allocation2 + $0x8] sm:$0x3]  ;;  %s4572_s21 = sld [smem:[#allocation8 + $0xa5]] }
  0xcd   : > { %v1697_v43 = vmul.f32 %v1695_v22, %v4463_v39  ;;  %v1080_v23 = vmul.f32 %v4317_v63, %v1079_v34  ;;  %v1276_v38 = vmul.f32 %v4348_v36, %v1275_v8  ;;  %v4514_v55 = vadd.f32 %v4412_v18, %v1102_v1  ;;  %s4578_s29 = sld [smem:[#allocation8 + $0xa9]] }
  0xce   : > { %1392 = vrot.lane.b32.xlu2 %v1273_v40, %s6154_s9  ;;  %v1698_v2 = vadd.f32 %v1696_v52, %v1600_v51  ;;  %v1601_v14 = vadd.f32 %v1599_v4, %v1515_v42  ;;  %v643_v34 = vadd.f32 %v641_v11, %v544_v16  ;;  %v401_v40 = vmul.f32 %v4501_v53, %v399_v56  ;;  %v4520_v56 = vld [vmem:[#allocation2 + $0x28] sm:$0x3]  ;;  %s4590_s12 = sld [smem:[#allocation8 + $0xad]] }
  0xcf   : > { %1368 = vrot.lane.b32.xlu0 %v4290_v31, %s6155_s11  ;;  %v1178_v31 = vmul.f32 %v4356_v28, %v1177_v20  ;;  %v1082_v44 = vadd.f32 %v1080_v23, %v984_v45  ;;  %v492_v20 = vmul.f32 %v4506_v12, %v490_v57  ;;  %v4518_v24 = vmul.f32 %v1793_v46, %v4483_v21  ;;  %s4600_s16 = sld [smem:[#allocation8 + $0xe2]] }
  0xd0   : > { %1370 = vrot.lane.b32.xlu1 %v4295_v15, %s6155_s11  ;;  %v787_v8 = vpop.permute.xlu2 %786  ;;  %v1231_v15 = vadd.f32 %v4420_v0, %v1133_v49  ;;  %v591_v11 = vmul.f32 %v4520_v56, %v589_v62  ;;  %v4528_v57 = vadd.f32 %v1794_v32, %v1698_v2  ;;  %v4530_v0 = vld [vmem:[#allocation2 + $0x38] sm:$0x3]  ;;  %750 = vst.msk [vmem:[#allocation3 + $0xa] sm:$0xff] %vm319_vm1, %v643_v34  ;;  %v1621_v42 = vstv %s4454_s23  ;;  %s4608_s13 = sld [smem:[#allocation8 + $0xe6]] }
  0xd1   : > { %792 = vst.msk [vmem:[#allocation3 + $0x14] sm:$0xff] %vm722_vm2, %v787_v8  ;;  %v1180_v18 = vadd.f32 %v1178_v31, %v1082_v44  ;;  %v494_v1 = vadd.f32 %v492_v20, %v401_v40  ;;  %v690_v27 = vmul.f32 %v4530_v0, %v688_v3  ;;  %v1699_v62 = vadd.f32 %v1697_v43, %v1601_v14  ;;  %s4618_s22 = sld [smem:[#allocation8 + $0xea]] }
  0xd2   : > { %v385_v29 = vmul.f32 %v4501_v53, %v383_v10  ;;  %v468_v45 = vmul.f32 %v4506_v12, %v466_v61  ;;  %v567_v50 = vmul.f32 %v4520_v56, %v565_v25  ;;  %v666_v46 = vmul.f32 %v4530_v0, %v664_v41  ;;  %s4631_s26 = sld [smem:[#allocation8 + $0xee]] }
  0xd3   : > { %v4549_v3 = vadd.f32 %v1276_v38, %v1180_v18  ;;  %v593_v22 = vadd.f32 %v591_v11, %v494_v1  ;;  %v1529_v61 = vstv %s4442_s15  ;;  %v1719_v25 = vstv %s4468_s18  ;;  %s4650_s19 = sld [smem:[#allocation8 + $0x81]] }
  0xd4   : > { %v470_v10 = vadd.f32 %v468_v45, %v385_v29  ;;  %v1531_v41 = vmul.f32 %v1529_v61, %v4440_v7  ;;  %v1623_v51 = vmul.f32 %v1621_v42, %v4452_v30  ;;  %v1721_v52 = vmul.f32 %v1719_v25, %v4463_v39  ;;  %s4657_s6 = sld [smem:[#allocation8 + $0x85]] }
  0xd5   : > { %v692_v49 = vadd.f32 %v690_v27, %v593_v22  ;;  %v1517_v16 = vstv %s4477_s24  ;;  %v1603_v32 = vstv %s4488_s30  ;;  %v1701_v38 = vstv %s4497_s17  ;;  %s4665_s5 = sld [smem:[#allocation8 + $0x89]] }
  0xd6   : > { %1338 = vrot.lane.b32.xlu2 %v1231_v15, %s6155_s11  ;;  %v569_v4 = vadd.f32 %v567_v50, %v470_v10  ;;  %v1625_v2 = vadd.f32 %v1623_v51, %v1531_v41  ;;  %v1518_v31 = vmul.f32 %v1517_v16, %v4429_v54  ;;  %v1604_v44 = vmul.f32 %v1603_v32, %v4431_v6  ;;  %s4670_s8 = sld [smem:[#allocation8 + $0x8d]] }
  0xd7   : > { %1402 = vrot.lane.b32.xlu0 %v4403_v13, %s6155_s11  ;;  %v1817_v13 = vstv %s4473_s20  ;;  %815 = vst.msk [vmem:[#allocation3 + $0x26] sm:$0x3] %vm712_vm4, %v692_v49  ;;  %v1702_v40 = vmul.f32 %v1701_v38, %v4450_v26  ;;  %v1799_v20 = vstv %s4511_s1  ;;  %v935_v11 = vstv %s4525_s2  ;;  %s4677_s27 = sld [smem:[#allocation8 + $0x32]] }
  0xd8   : > { %1296 = vrot.lane.b32.xlu1 %v4405_v9, %s6154_s9  ;;  %v1819_v14 = vmul.f32 %v1817_v13, %v4483_v21  ;;  %v797_v9 = vpop.permute.xlu2 %796  ;;  %v668_v34 = vadd.f32 %v666_v46, %v569_v4  ;;  %v1723_v8 = vadd.f32 %v1721_v52, %v1625_v2  ;;  %v1800_v15 = vmul.f32 %v1799_v20, %v4461_v35  ;;  %s4681_s14 = sld [smem:[#allocation8 + $0x36]] }
  0xd9   : > { %v829_v43 = vpop.permute.xlu1 %828  ;;  %v819_v23 = vpop.permute.xlu0 %818  ;;  %v1007_v18 = vstv %s4535_s7  ;;  %802 = vst.msk [vmem:[#allocation3 + $0x14] sm:$0xff] %vm734_vm3, %v797_v9  ;;  %v1606_v1 = vadd.f32 %v1604_v44, %v1518_v31  ;;  %v937_v27 = vmul.f32 %v935_v11, %v3932_v33  ;;  %v1105_v45 = vstv %s4547_s25  ;;  %s4687_s28 = sld [smem:[#allocation8 + $0x3a]] }
  0xda   : > { %824 = vst.msk [vmem:[#allocation3 + $0x1e] sm:$0xff] %vm722_vm2, %v819_v23  ;;  %v1009_v29 = vmul.f32 %v1007_v18, %v3938_v5  ;;  %v4621_v50 = vadd.f32 %v4518_v24, %v1699_v62  ;;  %v1107_v22 = vmul.f32 %v1105_v45, %v3960_v59  ;;  %v1203_v46 = vstv %s4554_s10  ;;  %s4692_s3 = sld [smem:[#allocation8 + $0x3e]] }
  0xdb   : > { %834 = vst.msk [vmem:[#allocation3 + $0x1e] sm:$0xff] %vm734_vm3, %v829_v43  ;;  %v369_v10 = vmul.f32 %v4501_v53, %v367_v60  ;;  %v1704_v49 = vadd.f32 %v1702_v40, %v1606_v1  ;;  %v1205_v51 = vmul.f32 %v1203_v46, %v3970_v17  ;;  %v444_v24 = vmul.f32 %v4506_v12, %v442_v48  ;;  %s4729_s2 = sld [smem:[#allocation8 + $0xde]] }
  0xdc   : > { %783 = vst.msk [vmem:[#allocation3 + $0x1c] sm:$0x3] %vm712_vm4, %v668_v34  ;;  %v1011_v41 = vadd.f32 %v1009_v29, %v937_v27  ;;  %v4641_v62 = vadd.f32 %v1819_v14, %v1723_v8  ;;  %v543_v60 = vmul.f32 %v4520_v56, %v541_v37  ;;  %v642_v52 = vmul.f32 %v4530_v0, %v640_v58  ;;  %s4734_s7 = sld [smem:[#allocation8]] }
  0xdd   : > { %v971_v4 = vstv %s4559_s4  ;;  %v4654_v48 = vadd.f32 %v1800_v15, %v1704_v49  ;;  %v446_v43 = vadd.f32 %v444_v24, %v369_v10  ;;  %v1061_v2 = vstv %s4572_s21  ;;  %s4700_s4 = sld [smem:[#allocation8 + $0xd2]] }
  0xde   : > { %1400 = vrot.lane.b32.xlu2 %v4549_v3, %s6155_s11  ;;  %v972_v23 = vmul.f32 %v4333_v19, %v971_v4  ;;  %v973_v58 = vmul.f32 %v971_v4, %v3932_v33  ;;  %v1159_v14 = vstv %s4578_s29  ;;  %v1257_v31 = vstv %s4590_s12  ;;  %s4708_s21 = sld [smem:[#allocation8 + $0xd6]] }
  0xdf   : > { %1284 = vrot.lane.b32.xlu0 %v4424_v47, %s6153_s0  ;;  %v1109_v47 = vadd.f32 %v1107_v22, %v1011_v41  ;;  %v545_v34 = vadd.f32 %v543_v60, %v446_v43  ;;  %v1062_v44 = vmul.f32 %v4317_v63, %v1061_v2  ;;  %v1063_v40 = vmul.f32 %v1061_v2, %v3938_v5  ;;  %s4721_s29 = sld [smem:[#allocation8 + $0xda]] }
  0xe0   : > { %1294 = vrot.lane.b32.xlu1 %v4514_v55, %s6154_s9  ;;  %v789_v3 = vpop.permute.xlu2 %788  ;;  %v1160_v55 = vmul.f32 %v4356_v28, %v1159_v14  ;;  %v1161_v8 = vmul.f32 %v1159_v14, %v3960_v59  ;;  %v1258_v15 = vmul.f32 %v4348_v36, %v1257_v31  ;;  %v1259_v1 = vmul.f32 %v1257_v31, %v3970_v17  ;;  %s4744_s25 = sld [smem:[#allocation8 + $0x4]] }
  0xe1   : > { %v839_v37 = vpop.permute.xlu0 %838  ;;  %v1207_v9 = vadd.f32 %v1205_v51, %v1109_v47  ;;  %793 = vst.msk [vmem:[#allocation3 + $0x1c] sm:$0x3] %vm724_vm6, %v789_v3  ;;  %v644_v5 = vadd.f32 %v642_v52, %v545_v34  ;;  %v1064_v27 = vadd.f32 %v1062_v44, %v972_v23  ;;  %v1065_v29 = vadd.f32 %v1063_v40, %v973_v58  ;;  %s4749_s10 = sld [smem:[#allocation8 + $0x8]] }
  0xe2   : > { %844 = vst.msk [vmem:[#allocation3 + $0x1e] sm:$0xff] %vm746_vm5, %v839_v37  ;;  %v755_v33 = vpop.permute.xlu1 %754  ;;  %v1533_v22 = vstv %s4600_s16  ;;  %v1627_v49 = vstv %s4608_s13  ;;  %v1725_v41 = vstv %s4618_s22  ;;  %v1823_v51 = vstv %s4631_s26  ;;  %s4761_s12 = sld [smem:[#allocation8 + $0xc]] }
  0xe3   : > { %760 = vst.msk [vmem:[#allocation3 + $0xa] sm:$0xff] %vm722_vm2, %v755_v33  ;;  %v1534_v10 = vmul.f32 %v1533_v22, %v4429_v54  ;;  %v1162_v59 = vadd.f32 %v1160_v55, %v1064_v27  ;;  %v1163_v17 = vadd.f32 %v1161_v8, %v1065_v29  ;;  %v1628_v24 = vmul.f32 %v1627_v49, %v4431_v6  ;;  %s4767_s16 = sld [smem:[#allocation8 + $0xf2]] }
  0xe4   : > { %751 = vst.msk [vmem:[#allocation3 + $0x12] sm:$0x3] %vm712_vm4, %v644_v5  ;;  %v1726_v60 = vmul.f32 %v1725_v41, %v4450_v26  ;;  %v1824_v52 = vmul.f32 %v1823_v51, %v4461_v35  ;;  %v1535_v4 = vmul.f32 %v1533_v22, %v4440_v7  ;;  %v1629_v47 = vmul.f32 %v1627_v49, %v4452_v30  ;;  %v4741_v5 = vld [vmem:[#allocation2 + $0x8] sm:$0x3]  ;;  %s4776_s13 = sld [smem:[#allocation8 + $0xf6]] }
  0xe5   : > { %v1727_v43 = vmul.f32 %v1725_v41, %v4463_v39  ;;  %v4703_v23 = vadd.f32 %v1258_v15, %v1162_v59  ;;  %v4705_v37 = vadd.f32 %v1259_v1, %v1163_v17  ;;  %v1825_v58 = vmul.f32 %v1823_v51, %v4483_v21  ;;  %v4752_v51 = vld [vmem:[#allocation2 + $0x18] sm:$0x3]  ;;  %v4755_v17 = vld [vmem:[#allocation2 + $0x28] sm:$0x3]  ;;  %s4788_s22 = sld [smem:[#allocation8 + $0xfa]] }
  0xe6   : > { %1306 = vrot.lane.b32.xlu2 %v1207_v9, %s6155_s11  ;;  %v1631_v14 = vadd.f32 %v1629_v47, %v1535_v4  ;;  %v936_v31 = vmul.f32 %v4333_v19, %v935_v11  ;;  %v1008_v3 = vmul.f32 %v4317_v63, %v1007_v18  ;;  %v1106_v9 = vmul.f32 %v4356_v28, %v1105_v45  ;;  %s4797_s26 = sld [smem:[#allocation8 + $0xfe]] }
  0xe7   : > { %1902 = vrot.lane.b32.xlu0 %v4528_v57, %s6153_s0  ;;  %v1630_v57 = vadd.f32 %v1628_v24, %v1534_v10  ;;  %v1204_v44 = vmul.f32 %v4348_v36, %v1203_v46  ;;  %v955_v40 = vstv %s4650_s19  ;;  %v1037_v33 = vstv %s4657_s6  ;;  %s4815_s19 = sld [smem:[#allocation8 + $0x21]] }
  0xe8   : > { %1904 = vrot.lane.b32.xlu1 %v4621_v50, %s6153_s0  ;;  %v757_v34 = vpop.permute.xlu2 %756  ;;  %v1729_v18 = vadd.f32 %v1727_v43, %v1631_v14  ;;  %v1010_v45 = vadd.f32 %v1008_v3, %v936_v31  ;;  %v956_v55 = vmul.f32 %v4333_v19, %v955_v40  ;;  %v1038_v8 = vmul.f32 %v4317_v63, %v1037_v33  ;;  %s4829_s15 = sld [smem:[#allocation8 + $0x25]] }
  0xe9   : > { %v821_v2 = vpop.permute.xlu0 %820  ;;  %v1728_v50 = vadd.f32 %v1726_v60, %v1630_v57  ;;  %761 = vst.msk [vmem:[#allocation3 + $0x12] sm:$0x3] %vm724_vm6, %v757_v34  ;;  %v1135_v46 = vstv %s4665_s5  ;;  %v1233_v1 = vstv %s4670_s8  ;;  %v957_v27 = vmul.f32 %v4741_v5, %v955_v40  ;;  %v4758_v60 = vld [vmem:[#allocation2 + $0x38] sm:$0x3]  ;;  %s4842_s23 = sld [smem:[#allocation8 + $0x29]] }
  0xea   : > { %825 = vst.msk [vmem:[#allocation3 + $0x26] sm:$0x3] %vm724_vm6, %v821_v2  ;;  %v831_v11 = vpop.permute.xlu1 %830  ;;  %v4746_v29 = vadd.f32 %v1825_v58, %v1729_v18  ;;  %v1108_v22 = vadd.f32 %v1106_v9, %v1010_v45  ;;  %v1040_v10 = vadd.f32 %v1038_v8, %v956_v55  ;;  %v1136_v49 = vmul.f32 %v4356_v28, %v1135_v46  ;;  %s4849_s18 = sld [smem:[#allocation8 + $0x2d]] }
  0xeb   : > { %835 = vst.msk [vmem:[#allocation3 + $0x26] sm:$0x3] %vm736_vm7, %v831_v11  ;;  %v4737_v15 = vadd.f32 %v1824_v52, %v1728_v50  ;;  %v1234_v41 = vmul.f32 %v4348_v36, %v1233_v1  ;;  %v1039_v59 = vmul.f32 %v4752_v51, %v1037_v33  ;;  %v1137_v24 = vmul.f32 %v4755_v17, %v1135_v46  ;;  %s4857_s20 = sld [smem:[#allocation8 + $0x62]] }
  0xec   : > { %v1235_v52 = vmul.f32 %v4758_v60, %v1233_v1  ;;  %v1206_v4 = vadd.f32 %v1204_v44, %v1108_v22  ;;  %v1138_v47 = vadd.f32 %v1136_v49, %v1040_v10  ;;  %v1497_v43 = vstv %s4677_s27  ;;  %s4863_s6 = sld [smem:[#allocation8 + $0x66]] }
  0xed   : > { %v1573_v57 = vstv %s4681_s14  ;;  %v1041_v58 = vadd.f32 %v1039_v59, %v957_v27  ;;  %v1499_v2 = vmul.f32 %v1497_v43, %v4440_v7  ;;  %v1671_v31 = vstv %s4687_s28  ;;  %s4868_s5 = sld [smem:[#allocation8 + $0x6a]] }
  0xee   : > { %v1575_v14 = vmul.f32 %v1573_v57, %v4452_v30  ;;  %1304 = vrot.lane.b32.xlu2 %v1206_v4, %s6155_s11  ;;  %v4781_v3 = vadd.f32 %v1234_v41, %v1138_v47  ;;  %v1673_v9 = vmul.f32 %v1671_v31, %v4463_v39  ;;  %v1769_v34 = vstv %s4692_s3  ;;  %s4876_s8 = sld [smem:[#allocation8 + $0x6e]] }
  0xef   : > { %1936 = vrot.lane.b32.xlu0 %v4641_v62, %s6153_s0  ;;  %v1521_v50 = vstv %s4700_s4  ;;  %v1139_v44 = vadd.f32 %v1137_v24, %v1041_v58  ;;  %v1771_v33 = vmul.f32 %v1769_v34, %v4483_v21  ;;  %v1609_v45 = vstv %s4708_s21  ;;  %s4906_s24 = sld [smem:[#allocation8 + $0x1e]] }
  0xf0   : > { %1912 = vrot.lane.b32.xlu1 %v4654_v48, %s6154_s9  ;;  %v765_v48 = vpop.permute.xlu2 %764  ;;  %v1577_v40 = vadd.f32 %v1575_v14, %v1499_v2  ;;  %v1522_v11 = vmul.f32 %v1521_v50, %v4429_v54  ;;  %v1707_v55 = vstv %s4721_s29  ;;  %v1805_v8 = vstv %s4729_s2  ;;  %s4912_s30 = sld [smem:[#allocation8 + $0x1]] }
  0xf1   : > { %v799_v62 = vpop.permute.xlu0 %798  ;;  %770 = vst.msk [vmem:[#allocation3 + $0xa] sm:$0xff] %vm734_vm3, %v765_v48  ;;  %v1530_v46 = vmul.f32 %v1529_v61, %v4429_v54  ;;  %v4807_v1 = vadd.f32 %v1235_v52, %v1139_v44  ;;  %v1610_v22 = vmul.f32 %v1609_v45, %v4431_v6  ;;  %v1708_v10 = vmul.f32 %v1707_v55, %v4450_v26  ;;  %s4919_s17 = sld [smem:[#allocation8 + $0x5]] }
  0xf2   : > { %803 = vst.msk [vmem:[#allocation3 + $0x1c] sm:$0x3] %vm736_vm7, %v799_v62  ;;  %v841_v18 = vpop.permute.xlu1 %840  ;;  %v1675_v27 = vadd.f32 %v1673_v9, %v1577_v40  ;;  %v1806_v49 = vmul.f32 %v1805_v8, %v4461_v35  ;;  %v1622_v61 = vmul.f32 %v1621_v42, %v4431_v6  ;;  %v1720_v41 = vmul.f32 %v1719_v25, %v4450_v26  ;;  %s4923_s1 = sld [smem:[#allocation8 + $0x9]] }
  0xf3   : > { %845 = vst.msk [vmem:[#allocation3 + $0x26] sm:$0x3] %vm748_vm8, %v841_v18  ;;  %v1818_v59 = vmul.f32 %v1817_v13, %v4461_v35  ;;  %v1612_v52 = vadd.f32 %v1610_v22, %v1522_v11  ;;  %v351_v4 = vstv %s4734_s7  ;;  %v418_v47 = vstv %s4744_s25  ;;  %s4943_s25 = sld [smem:[#allocation8 + $0x72]] }
  0xf4   : > { %v1773_v24 = vadd.f32 %v1771_v33, %v1675_v27  ;;  %v1624_v58 = vadd.f32 %v1622_v61, %v1530_v46  ;;  %v353_v42 = vmul.f32 %v4501_v53, %v351_v4  ;;  %v420_v25 = vmul.f32 %v4506_v12, %v418_v47  ;;  %s4954_s7 = sld [smem:[#allocation8 + $0x76]] }
  0xf5   : > { %v517_v2 = vstv %s4749_s10  ;;  %v1710_v13 = vadd.f32 %v1708_v10, %v1612_v52  ;;  %v616_v62 = vstv %s4761_s12  ;;  %v1537_v9 = vstv %s4767_s16  ;;  %s4882_s16 = sld [smem:[#allocation8 + $0x12]] }
  0xf6   : > { %v519_v14 = vmul.f32 %v4520_v56, %v517_v2  ;;  %v422_v12 = vadd.f32 %v420_v25, %v353_v42  ;;  %v618_v48 = vmul.f32 %v4530_v0, %v616_v62  ;;  %v1538_v44 = vmul.f32 %v1537_v9, %v4429_v54  ;;  %s4962_s10 = sld [smem:[#allocation8 + $0x7a]] }
  0xf7   : > { %1944 = vrot.lane.b32.xlu0 %v4737_v15, %s6154_s9  ;;  %v1722_v15 = vadd.f32 %v1720_v41, %v1624_v58  ;;  %v1808_v56 = vadd.f32 %v1806_v49, %v1710_v13  ;;  %v1633_v33 = vstv %s4776_s13  ;;  %v1731_v11 = vstv %s4788_s22  ;;  %s4891_s13 = sld [smem:[#allocation8 + $0x16]] }
  0xf8   : > { %1946 = vrot.lane.b32.xlu1 %v4746_v29, %s6154_s9  ;;  %v775_v40 = vpop.permute.xlu2 %774  ;;  %v1829_v18 = vstv %s4797_s26  ;;  %v521_v0 = vadd.f32 %v519_v14, %v422_v12  ;;  %v1634_v22 = vmul.f32 %v1633_v33, %v4431_v6  ;;  %v1732_v10 = vmul.f32 %v1731_v11, %v4450_v26  ;;  %s4902_s22 = sld [smem:[#allocation8 + $0x1a]] }
  0xf9   : > { %v807_v53 = vpop.permute.xlu0 %806  ;;  %v1820_v27 = vadd.f32 %v1818_v59, %v1722_v15  ;;  %780 = vst.msk [vmem:[#allocation3 + $0xa] sm:$0xff] %vm746_vm5, %v775_v40  ;;  %v1830_v49 = vmul.f32 %v1829_v18, %v4461_v35  ;;  %v1539_v61 = vmul.f32 %v1537_v9, %v4440_v7  ;;  %v1635_v41 = vmul.f32 %v1633_v33, %v4452_v30  ;;  %s4935_s26 = sld [smem:[#allocation8 + $0xd]] }
  0xfa   : > { %812 = vst.msk [vmem:[#allocation3 + $0x14] sm:$0xff] %vm746_vm5, %v807_v53  ;;  %v850_v29 = vld [vmem:[#allocation3 + $0x20] sm:$0xff]  ;;  %v809_v46 = vpop.permute.xlu1 %808  ;;  %v939_v59 = vstv %s4815_s19  ;;  %v1636_v52 = vadd.f32 %v1634_v22, %v1538_v44  ;;  %v1733_v58 = vmul.f32 %v1731_v11, %v4463_v39  ;;  %v1013_v42 = vstv %s4829_s15  ;;  %s4972_s12 = sld [smem:[#allocation8 + $0x7e]] }
  0xfb   : > { %1377 = vst.msk [vmem:[#allocation3 + $0x26] sm:$0x3] %vm712_vm4, %v4705_v37  ;;  %869 = vmatpush.msra.mxu0 %v850_v29  ;;  %1934 = vrot.lane.b32.xlu2 %v1820_v27, %s6153_s0  ;;  %v620_v37 = vadd.f32 %v618_v48, %v521_v0  ;;  %v1637_v25 = vadd.f32 %v1635_v41, %v1539_v61  ;;  %v1111_v48 = vstv %s4842_s23  ;;  %s4981_s19 = sld [smem:[#allocation8 + $0x42]] }
  0xfc   : > { %813 = vst.msk [vmem:[#allocation3 + $0x1c] sm:$0x3] %vm748_vm8, %v809_v46  ;;  %v1831_v13 = vmul.f32 %v1829_v18, %v4483_v21  ;;  %v1519_v14 = vmul.f32 %v1517_v16, %v4440_v7  ;;  %v1605_v9 = vmul.f32 %v1603_v32, %v4452_v30  ;;  %v1734_v53 = vadd.f32 %v1732_v10, %v1636_v52  ;;  %s4994_s15 = sld [smem:[#allocation8 + $0x46]] }
  0xfd   : > { %713 = vst.msk [vmem:[#allocation3 + $0x8] sm:$0x3] %vm712_vm4, %v620_v37  ;;  %v1703_v15 = vmul.f32 %v1701_v38, %v4463_v39  ;;  %v1801_v12 = vmul.f32 %v1799_v20, %v4483_v21  ;;  %v1735_v16 = vadd.f32 %v1733_v58, %v1637_v25  ;;  %v940_v32 = vmul.f32 %v4333_v19, %v939_v59  ;;  %s4999_s27 = sld [smem:[#allocation8 + $0x4a]] }
  0xfe   : > { %v1607_v44 = vadd.f32 %v1605_v9, %v1519_v14  ;;  %v941_v40 = vmul.f32 %v4741_v5, %v939_v59  ;;  %v1832_v33 = vadd.f32 %v1830_v49, %v1734_v53  ;;  %v1014_v38 = vmul.f32 %v4317_v63, %v1013_v42  ;;  %s5014_s14 = sld [smem:[#allocation8 + $0x4e]] }
  0xff   : > { %1872 = vrot.lane.b32.xlu0 %v1773_v24, %s6153_s0  ;;  %v1015_v20 = vmul.f32 %v4752_v51, %v1013_v42  ;;  %v1112_v11 = vmul.f32 %v4356_v28, %v1111_v48  ;;  %v1833_v18 = vadd.f32 %v1831_v13, %v1735_v16  ;;  %v1113_v46 = vmul.f32 %v4755_v17, %v1111_v48  ;;  %s5044_s28 = sld [smem:[#allocation8 + $0xb3]] }
 0x100   : > { %1922 = vrot.lane.b32.xlu1 %v1808_v56, %s6155_s11  ;;  %v1705_v29 = vadd.f32 %v1703_v15, %v1607_v44  ;;  %v1209_v56 = vstv %s4849_s18  ;;  %v4917_v27 = vpop.permute.xlu2 %716  ;;  %v1016_v22 = vadd.f32 %v1014_v38, %v940_v32  ;;  %v419_v37 = vmul.f32 %v4317_v63, %v418_v47  ;;  %s5054_s3 = sld [smem:[#allocation8 + $0xb7]] }
 0x101   : > { %v767_v24 = vpop.permute.xlu0 %766  ;;  %v1017_v10 = vadd.f32 %v1015_v20, %v941_v40  ;;  %v1210_v49 = vmul.f32 %v4348_v36, %v1209_v56  ;;  %v1211_v61 = vmul.f32 %v4758_v60, %v1209_v56  ;;  %v518_v52 = vmul.f32 %v4356_v28, %v517_v2  ;;  %s5064_s4 = sld [smem:[#allocation8 + $0xbb]] }
 0x102   : > { %771 = vst.msk [vmem:[#allocation3 + $0x12] sm:$0x3] %vm736_vm7, %v767_v24  ;;  %v719_v0 = vpop.permute.xlu1 %718  ;;  %v1803_v59 = vadd.f32 %v1801_v12, %v1705_v29  ;;  %v617_v58 = vmul.f32 %v4348_v36, %v616_v62  ;;  %v1114_v42 = vadd.f32 %v1112_v11, %v1016_v22  ;;  %v352_v13 = vmul.f32 %v4333_v19, %v351_v4  ;;  %s5069_s23 = sld [smem:[#allocation8 + $0xbf]] }
 0x103   : > { %v849_v41 = vld [vmem:[#allocation3 + $0x18] sm:$0xff]  ;;  %725 = vst.msk [vmem:[#allocation3 + $0x8] sm:$0x3] %vm724_vm6, %v719_v0  ;;  %v1115_v25 = vadd.f32 %v1113_v46, %v1017_v10  ;;  %v1501_v63 = vstv %s4857_s20  ;;  %v1579_v28 = vstv %s4863_s6  ;;  %v1775_v47 = vstv %s4876_s8  ;;  %s5080_s18 = sld [smem:[#allocation8 + $0xe3]] }
 0x104   : > { %1345 = vst.msk [vmem:[#allocation3 + $0x1c] sm:$0x3] %vm712_vm4, %v4807_v1  ;;  %870 = vmatpush.msra.mxu0 %v849_v41  ;;  %1914 = vrot.lane.b32.xlu2 %v1803_v59, %s6154_s9  ;;  %v1503_v36 = vmul.f32 %v1501_v63, %v4440_v7  ;;  %v1677_v1 = vstv %s4868_s5  ;;  %v4957_v19 = vadd.f32 %v1210_v49, %v1114_v42  ;;  %v1481_v9 = vstv %s4882_s16  ;;  %s5100_s21 = sld [smem:[#allocation8 + $0xeb]] }
 0x105   : > { %1376 = vst.msk [vmem:[#allocation3 + $0x1e] sm:$0xff] %vm319_vm1, %v4703_v23  ;;  %v1213_v4 = vadd.f32 %v1211_v61, %v1115_v25  ;;  %v421_v2 = vadd.f32 %v419_v37, %v352_v13  ;;  %v1581_v23 = vmul.f32 %v1579_v28, %v4452_v30  ;;  %v1679_v62 = vmul.f32 %v1677_v1, %v4463_v39  ;;  %s5106_s29 = sld [smem:[#allocation8 + $0xef]] }
 0x106   : > { %v1777_v14 = vmul.f32 %v1775_v47, %v4483_v21  ;;  %v1549_v53 = vstv %s4891_s13  ;;  %v1483_v16 = vmul.f32 %v1481_v9, %v4440_v7  ;;  %v1647_v32 = vstv %s4902_s22  ;;  %s5110_s2 = sld [smem:[#allocation8 + $0x93]] }
 0x107   : > { %1954 = vrot.lane.b32.xlu0 %v1832_v33, %s6155_s11  ;;  %v520_v12 = vadd.f32 %v518_v52, %v421_v2  ;;  %v1583_v48 = vadd.f32 %v1581_v23, %v1503_v36  ;;  %v1551_v44 = vmul.f32 %v1549_v53, %v4452_v30  ;;  %v1745_v40 = vstv %s4906_s24  ;;  %s5122_s16 = sld [smem:[#allocation8 + $0x97]] }
 0x108   : > { %1956 = vrot.lane.b32.xlu1 %v1833_v18, %s6155_s11  ;;  %v1498_v24 = vmul.f32 %v1497_v43, %v4429_v54  ;;  %v1574_v33 = vmul.f32 %v1573_v57, %v4431_v6  ;;  %v4992_v38 = vpop.permute.xlu2 %740  ;;  %v1649_v46 = vmul.f32 %v1647_v32, %v4463_v39  ;;  %v1747_v43 = vmul.f32 %v1745_v40, %v4483_v21  ;;  %s6160_s24 = sld [smem:[#allocation38_spill]] }
 0x109   : > { %v777_v15 = vpop.permute.xlu0 %776  ;;  %v619_v11 = vadd.f32 %v617_v58, %v520_v12  ;;  %v1681_v18 = vadd.f32 %v1679_v62, %v1583_v48  ;;  %v1553_v29 = vadd.f32 %v1551_v44, %v1483_v16  ;;  %v1672_v56 = vmul.f32 %v1671_v31, %v4450_v26  ;;  %s5133_s20 = sld [smem:[#allocation8 + $0x9b]] }
 0x10a   : > { %781 = vst.msk [vmem:[#allocation3 + $0x12] sm:$0x3] %vm748_vm8, %v777_v15  ;;  %v731_v20 = vpop.permute.xlu1 %730  ;;  %v1576_v57 = vadd.f32 %v1574_v33, %v1498_v24  ;;  %v1770_v0 = vmul.f32 %v1769_v34, %v4461_v35  ;;  %v923_v49 = vstv %s4912_s30  ;;  %v989_v61 = vstv %s4919_s17  ;;  %s5144_s6 = sld [smem:[#allocation8 + $0x9f]] }
 0x10b   : > { %737 = vst.msk [vmem:[#allocation3 + $0x8] sm:$0x3] %vm736_vm7, %v731_v20  ;;  %v1779_v22 = vadd.f32 %v1777_v14, %v1681_v18  ;;  %v1651_v10 = vadd.f32 %v1649_v46, %v1553_v29  ;;  %v925_v31 = vmul.f32 %v4741_v5, %v923_v49  ;;  %v991_v34 = vmul.f32 %v4752_v51, %v989_v61  ;;  %s5155_s5 = sld [smem:[#allocation8 + $0x52]] }
 0x10c   : > { %711 = vst.msk [vmem:[#allocation3] sm:$0xff] %vm319_vm1, %v619_v11  ;;  %v1674_v41 = vadd.f32 %v1672_v56, %v1576_v57  ;;  %v1087_v59 = vstv %s4923_s1  ;;  %v1185_v58 = vstv %s4935_s26  ;;  %v1585_v2 = vstv %s4954_s7  ;;  %s5167_s8 = sld [smem:[#allocation8 + $0x56]] }
 0x10d   : > { %723 = vst.msk [vmem:[#allocation3] sm:$0xff] %vm722_vm2, %v4917_v27  ;;  %v1749_v37 = vadd.f32 %v1747_v43, %v1651_v10  ;;  %v1089_v52 = vmul.f32 %v4755_v17, %v1087_v59  ;;  %v1505_v27 = vstv %s4943_s25  ;;  %v993_v25 = vadd.f32 %v991_v34, %v925_v31  ;;  %s5201_s25 = sld [smem:[#allocation8 + $0xf7]] }
 0x10e   : > { %v1772_v42 = vadd.f32 %v1770_v0, %v1674_v41  ;;  %v1187_v5 = vmul.f32 %v4758_v60, %v1185_v58  ;;  %v1507_v51 = vmul.f32 %v1505_v27, %v4440_v7  ;;  %v1683_v17 = vstv %s4962_s10  ;;  %s5211_s7 = sld [smem:[#allocation8 + $0xfb]] }
 0x10f   : > { %1882 = vrot.lane.b32.xlu0 %v1779_v22, %s6154_s9  ;;  %v1781_v23 = vstv %s4972_s12  ;;  %v1523_v62 = vmul.f32 %v1521_v50, %v4440_v7  ;;  %v1091_v60 = vadd.f32 %v1089_v52, %v993_v25  ;;  %v1587_v14 = vmul.f32 %v1585_v2, %v4452_v30  ;;  %v5120_v52 = vld [vmem:[#allocation2 + $0x8] sm:$0x3]  ;;  %s5252_s13 = sld [smem:[#allocation8 + $0xcb]] }
 0x110   : > { %1840 = vrot.lane.b32.xlu1 %v1749_v37, %s6153_s0  ;;  %1870 = vrot.lane.b32.xlu2 %v1772_v42, %s6153_s0  ;;  %v1685_v15 = vmul.f32 %v1683_v17, %v4463_v39  ;;  %v1349_v12 = vpop.permute.xlu2 %1348  ;;  %v1485_v48 = vstv %s4981_s19  ;;  %v1555_v16 = vstv %s4994_s15  ;;  %v1611_v29 = vmul.f32 %v1609_v45, %v4452_v30  ;;  %s5088_s19 = sld [smem:[#allocation8 + $0xe7]]  ;;  %s6161_s15 = smov %s6160_s24 }
 0x111   : > { %v848_v13 = vld [vmem:[#allocation3 + $0x10] sm:$0xff]  ;;  %v743_v36 = vpop.permute.xlu0 %742  ;;  %v1653_v44 = vstv %s4999_s27  ;;  %v1189_v24 = vadd.f32 %v1187_v5, %v1091_v60  ;;  %v1589_v33 = vadd.f32 %v1587_v14, %v1507_v51  ;;  %v1487_v20 = vmul.f32 %v1485_v48, %v4440_v7  ;;  %v5127_v51 = vld [vmem:[%s6160_s24] sm:$0xff]  ;;  %v5142_v60 = vld [vmem:[#allocation2 + $0x18] sm:$0x3]  ;;  %s5177_s27 = sld [smem:[#allocation8 + $0x5a]] }
 0x112   : > { %1313 = vst.msk [vmem:[#allocation3 + $0x12] sm:$0x3] %vm712_vm4, %v1213_v4  ;;  %871 = vmatpush.msra.mxu0 %v848_v13  ;;  %v729_v50 = vpop.permute.xlu1 %728  ;;  %v1783_v4 = vmul.f32 %v1781_v23, %v4483_v21  ;;  %v1655_v11 = vmul.f32 %v1653_v44, %v4463_v39  ;;  %v1751_v18 = vstv %s5014_s14  ;;  %v1709_v46 = vmul.f32 %v1707_v55, %v4463_v39  ;;  %s5181_s14 = sld [smem:[#allocation8 + $0x5e]] }
 0x113   : > { %1344 = vst.msk [vmem:[#allocation3 + $0x14] sm:$0xff] %vm319_vm1, %v4781_v3  ;;  %v1557_v3 = vmul.f32 %v1555_v16, %v4452_v30  ;;  %v1687_v7 = vadd.f32 %v1685_v15, %v1589_v33  ;;  %v1753_v57 = vmul.f32 %v1751_v18, %v4483_v21  ;;  %v1807_v56 = vmul.f32 %v1805_v8, %v4483_v21  ;;  %v5149_v15 = vld [vmem:[#allocation2] sm:$0xff]  ;;  %s5260_s22 = sld [smem:[#allocation8 + $0xcf]] }
 0x114   : > { %749 = vst.msk [vmem:[#allocation3 + $0x8] sm:$0x3] %vm748_vm8, %v743_v36  ;;  %v1613_v0 = vadd.f32 %v1611_v29, %v1523_v62  ;;  %v1482_v30 = vmul.f32 %v1481_v9, %v4429_v54  ;;  %v1550_v39 = vmul.f32 %v1549_v53, %v4431_v6  ;;  %v1648_v45 = vmul.f32 %v1647_v32, %v4450_v26  ;;  %s5272_s24 = sld [smem:[#allocation8 + $0x33]] }
 0x115   : > { %735 = vst.msk [vmem:[#allocation3] sm:$0xff] %vm734_vm3, %v729_v50  ;;  %v1559_v43 = vadd.f32 %v1557_v3, %v1487_v20  ;;  %v1785_v55 = vadd.f32 %v1783_v4, %v1687_v7  ;;  %v1746_v8 = vmul.f32 %v1745_v40, %v4461_v35  ;;  %v1556_v53 = vmul.f32 %v1555_v16, %v4431_v6  ;;  %v5158_v50 = vld [vmem:[#allocation2 + $0x10] sm:$0xff]  ;;  %s5329_s10 = sld [smem:[#allocation8 + $0xa2]] }
 0x116   : > { %747 = vst.msk [vmem:[#allocation3] sm:$0xff] %vm746_vm5, %v4992_v38  ;;  %v1486_v38 = vmul.f32 %v1485_v48, %v4429_v54  ;;  %v1711_v9 = vadd.f32 %v1709_v46, %v1613_v0  ;;  %v1552_v10 = vadd.f32 %v1550_v39, %v1482_v30  ;;  %v1654_v32 = vmul.f32 %v1653_v44, %v4450_v26  ;;  %v5161_v48 = vld [vmem:[#allocation2 + $0x20] sm:$0xff]  ;;  %v5172_v20 = vld [vmem:[#allocation2 + $0x30] sm:$0xff]  ;;  %s5336_s12 = sld [smem:[#allocation8 + $0xa6]] }
 0x117   : > { %1354 = vst.msk [vmem:[#allocation3 + $0x14] sm:$0xff] %vm722_vm2, %v1349_v12  ;;  %v1657_v21 = vadd.f32 %v1655_v11, %v1559_v43  ;;  %1892 = vrot.lane.b32.xlu0 %v1785_v55, %s6155_s11  ;;  %v1752_v31 = vmul.f32 %v1751_v18, %v4461_v35  ;;  %v1502_v40 = vmul.f32 %v1501_v63, %v4429_v54  ;;  %v2083_v36 = vstv %s5044_s28  ;;  %s5193_s28 = sld [smem:[#allocation8 + $0xf3]] }
 0x118   : > { %v1580_v34 = vmul.f32 %v1579_v28, %v4431_v6  ;;  %v1383_v37 = vpop.permute.xlu2 %1382  ;;  %v1809_v25 = vadd.f32 %v1807_v56, %v1711_v9  ;;  %v1650_v54 = vadd.f32 %v1648_v45, %v1552_v10  ;;  %v1558_v63 = vadd.f32 %v1556_v53, %v1486_v38  ;;  %s5461_s30 = sld [smem:[#allocation8 + $0x7b]] }
 0x119   : > { %v1317_v22 = vpop.permute.xlu0 %1316  ;;  %v1755_v41 = vadd.f32 %v1753_v57, %v1657_v21  ;;  %v1678_v6 = vmul.f32 %v1677_v1, %v4450_v26  ;;  %1387 = vst.msk [vmem:[#allocation3 + $0x26] sm:$0x3] %vm724_vm6, %v1383_v37  ;;  %v1776_v13 = vmul.f32 %v1775_v47, %v4461_v35  ;;  %v2175_v62 = vstv %s5054_s3  ;;  %v5153_v47 = vld [vmem:[#allocation2 + $0x28] sm:$0x3]  ;;  %s5224_s3 = sld [smem:[#allocation8 + $0xff]] }
 0x11a   : > { %v1319_v5 = vpop.permute.xlu1 %1318  ;;  %v1582_v28 = vadd.f32 %v1580_v34, %v1502_v40  ;;  %1924 = vrot.lane.b32.xlu2 %v1809_v25, %s6155_s11  ;;  %v1748_v1 = vadd.f32 %v1746_v8, %v1650_v54  ;;  %v1656_v14 = vadd.f32 %v1654_v32, %v1558_v63  ;;  %v2084_v12 = vmul.f32 %v5149_v15, %v2083_v36  ;;  %s5537_s17 = sld [smem:[#allocation8 + $0x8a]] }
 0x11b   : > { %v847_v42 = vld [vmem:[#allocation3 + $0x8] sm:$0xff]  ;;  %1850 = vrot.lane.b32.xlu1 %v1755_v41, %s6154_s9  ;;  %v2273_v35 = vstv %s5064_s4  ;;  %v2176_v4 = vmul.f32 %v5158_v50, %v2175_v62  ;;  %v2371_v44 = vstv %s5069_s23  ;;  %1323 = vst.msk [vmem:[#allocation3 + $0x12] sm:$0x3] %vm724_vm6, %v1319_v5  ;;  %v2085_v11 = vmul.f32 %v2083_v36, %v5120_v52  ;;  %s5236_s4 = sld [smem:[#allocation8 + $0xc3]] }
 0x11c   : > { %1281 = vst.msk [vmem:[#allocation3 + $0x8] sm:$0x3] %vm712_vm4, %v1189_v24  ;;  %872 = vmatpush.msra.mxu0 %v847_v42  ;;  %v2274_v16 = vmul.f32 %v5161_v48, %v2273_v35  ;;  %v5165_v24 = vld [vmem:[#allocation2 + $0x38] sm:$0x3]  ;;  %v1754_v33 = vadd.f32 %v1752_v31, %v1656_v14  ;;  %v2372_v3 = vmul.f32 %v5172_v20, %v2371_v44  ;;  %v2087_v18 = vstv %s5080_s18  ;;  %s5246_s23 = sld [smem:[#allocation8 + $0xc7]] }
 0x11d   : > { %1312 = vst.msk [vmem:[#allocation3 + $0xa] sm:$0xff] %vm319_vm1, %v4957_v19  ;;  %v846_v26 = vld [vmem:[#allocation3] sm:$0xff]  ;;  %v1680_v19 = vadd.f32 %v1678_v6, %v1582_v28  ;;  %v2178_v46 = vadd.f32 %v2176_v4, %v2084_v12  ;;  %v2177_v7 = vmul.f32 %v2175_v62, %v5142_v60  ;;  %v2275_v43 = vmul.f32 %v2273_v35, %v5153_v47  ;;  %v5257_v4 = vld [vmem:[#allocation2 + $0x8] sm:$0x3]  ;;  %s5372_s18 = sld [smem:[#allocation8 + $0x6]] }
 0x11e   : > { %1322 = vst.msk [vmem:[#allocation3 + $0xa] sm:$0xff] %vm722_vm2, %v1317_v22  ;;  %873 = vmatpush.msra.mxu0 %v846_v26  ;;  %v2373_v56 = vmul.f32 %v2371_v44, %v5165_v24  ;;  %v1506_v0 = vmul.f32 %v5149_v15, %v1505_v27  ;;  %v1586_v30 = vmul.f32 %v5158_v50, %v1585_v2  ;;  %v2181_v8 = vstv %s5088_s19  ;;  %v5264_v44 = vld [vmem:[#allocation2 + $0x18] sm:$0x3]  ;;  %s5376_s19 = sld [smem:[#allocation8 + $0xa]] }
 0x11f   : > { %2790 = vmatmul.msk.f32.vlgmr.msra.gmra.mxu0 %vm851_vm9, %v5127_v51  ;;  %v1778_v29 = vadd.f32 %v1776_v13, %v1680_v19  ;;  %v1684_v39 = vmul.f32 %v5161_v48, %v1683_v17  ;;  %1838 = vrot.lane.b32.xlu0 %v1748_v1, %s6153_s0  ;;  %v2276_v45 = vadd.f32 %v2274_v16, %v2178_v46  ;;  %v2279_v22 = vstv %s5100_s21  ;;  %s5383_s21 = sld [smem:[#allocation8 + $0xe]] }
 0x120   : > { %v2179_v55 = vadd.f32 %v2177_v7, %v2085_v11  ;;  %v1782_v21 = vmul.f32 %v5172_v20, %v1781_v23  ;;  %v1359_v27 = vpop.permute.xlu2 %1358  ;;  %v1588_v38 = vadd.f32 %v1586_v30, %v1506_v0  ;;  %v2089_v17 = vmul.f32 %v2087_v18, %v5120_v52  ;;  %v5218_v23 = vld [vmem:[%s6161_s15 + $0x8] sm:$0xff]  ;;  %s5357_s15 = sld [smem:[#allocation8 + $0xae]] }
 0x121   : > { %v1351_v57 = vpop.permute.xlu0 %1350  ;;  %1364 = vst.msk [vmem:[#allocation3 + $0x14] sm:$0xff] %vm734_vm3, %v1359_v27  ;;  %v2183_v9 = vmul.f32 %v2181_v8, %v5142_v60  ;;  %v2374_v10 = vadd.f32 %v2372_v3, %v2276_v45  ;;  %v2281_v32 = vmul.f32 %v2279_v22, %v5153_v47  ;;  %v2377_v41 = vstv %s5106_s29  ;;  %v5267_v3 = vld [vmem:[#allocation2 + $0x28] sm:$0x3]  ;;  %s5388_s29 = sld [smem:[#allocation8 + $0x63]] }
 0x122   : > { %1355 = vst.msk [vmem:[#allocation3 + $0x1c] sm:$0x3] %vm724_vm6, %v1351_v57  ;;  %v1381_v2 = vpop.permute.xlu1 %1380  ;;  %v2277_v53 = vadd.f32 %v2275_v43, %v2179_v55  ;;  %1880 = vrot.lane.b32.xlu2 %v1778_v29, %s6154_s9  ;;  %v1686_v31 = vadd.f32 %v1684_v39, %v1588_v38  ;;  %v2379_v34 = vmul.f32 %v2377_v41, %v5165_v24  ;;  %v2067_v37 = vstv %s5110_s2  ;;  %s5437_s2 = sld [smem:[#allocation8 + $0x1f]] }
 0x123   : > { %1848 = vrot.lane.b32.xlu1 %v1754_v33, %s6154_s9  ;;  %1386 = vst.msk [vmem:[#allocation3 + $0x1e] sm:$0xff] %vm722_vm2, %v1381_v2  ;;  %v2185_v40 = vadd.f32 %v2183_v9, %v2089_v17  ;;  %v2068_v25 = vmul.f32 %v5149_v15, %v2067_v37  ;;  %v2151_v5 = vstv %s5122_s16  ;;  %v2249_v54 = vstv %s5133_s20  ;;  %6164 = sst [smem:[#allocation34_spill]] %s5372_s18 }
 0x124   : > { %v2375_v42 = vadd.f32 %v2373_v56, %v2277_v53  ;;  %v1784_v63 = vadd.f32 %v1782_v21, %v1686_v31  ;;  %v2152_v28 = vmul.f32 %v5158_v50, %v2151_v5  ;;  %v2250_v13 = vmul.f32 %v5161_v48, %v2249_v54  ;;  %v5274_v56 = vld [vmem:[#allocation2 + $0x38] sm:$0x3]  ;;  %6165 = sst [smem:[#allocation35_spill]] %s5376_s19 }
 0x125   : > { %v2283_v6 = vadd.f32 %v2281_v32, %v2185_v40  ;;  %v2347_v36 = vstv %s5144_s6  ;;  %v1489_v62 = vstv %s5155_s5  ;;  %v1561_v26 = vstv %s5167_s8  ;;  %s5280_s5 = sld [smem:[#allocation8 + $0x37]] }
 0x126   : > { %v1659_v1 = vstv %s5177_s27  ;;  %v2154_v35 = vadd.f32 %v2152_v28, %v2068_v25  ;;  %v2348_v19 = vmul.f32 %v5172_v20, %v2347_v36  ;;  %v1491_v16 = vmul.f32 %v5257_v4, %v1489_v62  ;;  %s5287_s8 = sld [smem:[#allocation8 + $0x3b]] }
 0x127   : > { %2791 = vmatmul.msk.f32.gmra.mxu0 %vm851_vm9, %v5218_v23  ;;  %v2381_v12 = vadd.f32 %v2379_v34, %v2283_v6  ;;  %2488 = vrot.lane.b32.xlu0 %v2374_v10, %s6153_s0  ;;  %v1563_v33 = vmul.f32 %v5264_v44, %v1561_v26  ;;  %v1661_v11 = vmul.f32 %v5267_v3, %v1659_v1  ;;  %v1757_v29 = vstv %s5181_s14  ;;  %s5295_s27 = sld [smem:[#allocation8 + $0x3f]] }
 0x128   : > { %v1393_v46 = vpop.permute.xlu2 %1392  ;;  %v2091_v7 = vstv %s5193_s28  ;;  %v2252_v57 = vadd.f32 %v2250_v13, %v2154_v35  ;;  %v1759_v0 = vmul.f32 %v5274_v56, %v1757_v29  ;;  %v2187_v39 = vstv %s5201_s25  ;;  %s5301_s14 = sld [smem:[#allocation8 + $0xd3]] }
 0x129   : > { %v1327_v14 = vpop.permute.xlu0 %1326  ;;  %1397 = vst.msk [vmem:[#allocation3 + $0x26] sm:$0x3] %vm736_vm7, %v1393_v46  ;;  %v2092_v30 = vmul.f32 %v5149_v15, %v2091_v7  ;;  %v1565_v45 = vadd.f32 %v1563_v33, %v1491_v16  ;;  %v2188_v55 = vmul.f32 %v5158_v50, %v2187_v39  ;;  %v2285_v21 = vstv %s5211_s7  ;;  %s5304_s28 = sld [smem:[#allocation8 + $0xd7]] }
 0x12a   : > { %1332 = vst.msk [vmem:[#allocation3 + $0xa] sm:$0xff] %vm734_vm3, %v1327_v14  ;;  %v1329_v43 = vpop.permute.xlu1 %1328  ;;  %v2383_v27 = vstv %s5224_s3  ;;  %1890 = vrot.lane.b32.xlu2 %v1784_v63, %s6155_s11  ;;  %v2350_v2 = vadd.f32 %v2348_v19, %v2252_v57  ;;  %v2286_v38 = vmul.f32 %v5161_v48, %v2285_v21  ;;  %v2093_v9 = vmul.f32 %v2091_v7, %v5120_v52  ;;  %s5309_s25 = sld [smem:[#allocation8 + $0xdb]] }
 0x12b   : > { %2490 = vrot.lane.b32.xlu1 %v2375_v42, %s6153_s0  ;;  %1333 = vst.msk [vmem:[#allocation3 + $0x12] sm:$0x3] %vm736_vm7, %v1329_v43  ;;  %v2384_v17 = vmul.f32 %v5172_v20, %v2383_v27  ;;  %v1663_v10 = vadd.f32 %v1661_v11, %v1565_v45  ;;  %v2190_v53 = vadd.f32 %v2188_v55, %v2092_v30  ;;  %v2071_v19 = vstv %s5236_s4  ;;  %s5317_s7 = sld [smem:[#allocation8 + $0xdf]] }
 0x12c   : > { %6162 = sst [smem:[#allocation32_spill]] %s5287_s8  ;;  %v2189_v32 = vmul.f32 %v2187_v39, %v5142_v60  ;;  %v2287_v31 = vmul.f32 %v2285_v21, %v5153_v47  ;;  %v2385_v40 = vmul.f32 %v2383_v27, %v5165_v24  ;;  %v1490_v34 = vmul.f32 %v5149_v15, %v1489_v62 }
 0x12d   : > { %v1562_v42 = vmul.f32 %v5158_v50, %v1561_v26  ;;  %v1660_v25 = vmul.f32 %v5161_v48, %v1659_v1  ;;  %v1761_v63 = vadd.f32 %v1759_v0, %v1663_v10  ;;  %v2288_v6 = vadd.f32 %v2286_v38, %v2190_v53  ;;  %s5345_s3 = sld [smem:[#allocation8 + $0xaa]] }
 0x12e   : > { %v2191_v28 = vadd.f32 %v2189_v32, %v2093_v9  ;;  %v1758_v13 = vmul.f32 %v5172_v20, %v1757_v29  ;;  %v2157_v62 = vstv %s5246_s23  ;;  %v2255_v26 = vstv %s5252_s13  ;;  %6166 = sst [smem:[#allocation36_spill]] %s5383_s21 }
 0x12f   : > { %v1564_v35 = vadd.f32 %v1562_v42, %v1490_v34  ;;  %2500 = vrot.lane.b32.xlu0 %v2381_v12, %s6154_s9  ;;  %v2386_v1 = vadd.f32 %v2384_v17, %v2288_v6  ;;  %v2073_v11 = vmul.f32 %v2071_v19, %v5120_v52  ;;  %v2353_v29 = vstv %s5260_s22  ;;  %s5442_s16 = sld [smem:[#allocation8 + $0x73]] }
 0x130   : > { %v2289_v16 = vadd.f32 %v2287_v31, %v2191_v28  ;;  %v1339_v33 = vpop.permute.xlu2 %1338  ;;  %v2159_v12 = vmul.f32 %v2157_v62, %v5142_v60  ;;  %v2257_v43 = vmul.f32 %v2255_v26, %v5153_v47  ;;  %v2355_v57 = vmul.f32 %v2353_v29, %v5165_v24  ;;  %s5451_s20 = sld [smem:[#allocation8 + $0x77]] }
 0x131   : > { %v1361_v14 = vpop.permute.xlu0 %1360  ;;  %v1662_v7 = vadd.f32 %v1660_v25, %v1564_v35  ;;  %1343 = vst.msk [vmem:[#allocation3 + $0x12] sm:$0x3] %vm748_vm8, %v1339_v33  ;;  %v2051_v30 = vstv %s5272_s24  ;;  %v2127_v39 = vstv %s5280_s5  ;;  %v2225_v45 = vstv %s5287_s8  ;;  %s5365_s8 = sld [smem:[#allocation8 + $0x2]] }
 0x132   : > { %1365 = vst.msk [vmem:[#allocation3 + $0x1c] sm:$0x3] %vm736_vm7, %v1361_v14  ;;  %v1391_v46 = vpop.permute.xlu1 %1390  ;;  %v2387_v0 = vadd.f32 %v2385_v40, %v2289_v16  ;;  %1860 = vrot.lane.b32.xlu2 %v1761_v63, %s6155_s11  ;;  %v2161_v21 = vadd.f32 %v2159_v12, %v2073_v11  ;;  %v2052_v27 = vmul.f32 %v5149_v15, %v2051_v30  ;;  %v2323_v17 = vstv %s5295_s27  ;;  %s5471_s6 = sld [smem:[#allocation8 + $0x7f]] }
 0x133   : > { %2456 = vrot.lane.b32.xlu1 %v2350_v2, %s6153_s0  ;;  %1396 = vst.msk [vmem:[#allocation3 + $0x1e] sm:$0xff] %vm734_vm3, %v1391_v46  ;;  %v1760_v55 = vadd.f32 %v1758_v13, %v1662_v7  ;;  %v2128_v2 = vmul.f32 %v5158_v50, %v2127_v39  ;;  %v2226_v38 = vmul.f32 %v5161_v48, %v2225_v45  ;;  %v2075_v42 = vstv %s5301_s14  ;;  %s5395_s14 = sld [smem:[#allocation8 + $0x67]] }
 0x134   : > { %v2088_v9 = vmul.f32 %v5149_v15, %v2087_v18  ;;  %v2182_v10 = vmul.f32 %v5158_v50, %v2181_v8  ;;  %v2259_v53 = vadd.f32 %v2257_v43, %v2161_v21  ;;  %v2324_v31 = vmul.f32 %v5172_v20, %v2323_v17  ;;  %s5545_s1 = sld [smem:[#allocation8 + $0x8e]] }
 0x135   : > { %v2130_v32 = vadd.f32 %v2128_v2, %v2052_v27  ;;  %v2280_v40 = vmul.f32 %v5161_v48, %v2279_v22  ;;  %v2378_v18 = vmul.f32 %v5172_v20, %v2377_v41  ;;  %v2163_v8 = vstv %s5304_s28  ;;  %s5401_s28 = sld [smem:[#allocation8 + $0x6b]] }
 0x136   : > { %v2184_v34 = vadd.f32 %v2182_v10, %v2088_v9  ;;  %v2357_v63 = vadd.f32 %v2355_v57, %v2259_v53  ;;  %v2076_v28 = vmul.f32 %v5149_v15, %v2075_v42  ;;  %v2164_v13 = vmul.f32 %v5158_v50, %v2163_v8  ;;  %s5560_s26 = sld [smem:[#allocation8 + $0x53]] }
 0x137   : > { %6163 = sst [smem:[#allocation33_spill]] %s5365_s8  ;;  %v2228_v6 = vadd.f32 %v2226_v38, %v2130_v32  ;;  %2508 = vrot.lane.b32.xlu0 %v2386_v1, %s6155_s11  ;;  %v2261_v41 = vstv %s5309_s25  ;;  %v2359_v35 = vstv %s5317_s7  ;;  %v2077_v16 = vmul.f32 %v2075_v42, %v5120_v52 }
 0x138   : > { %v2282_v22 = vadd.f32 %v2280_v40, %v2184_v34  ;;  %v1401_v14 = vpop.permute.xlu2 %1400  ;;  %v2166_v46 = vadd.f32 %v2164_v13, %v2076_v28  ;;  %v2262_v7 = vmul.f32 %v5161_v48, %v2261_v41  ;;  %v2360_v1 = vmul.f32 %v5172_v20, %v2359_v35  ;;  %s5406_s25 = sld [smem:[#allocation8 + $0x6f]] }
 0x139   : > { %v1287_v25 = vpop.permute.xlu0 %1286  ;;  %v2326_v11 = vadd.f32 %v2324_v31, %v2228_v6  ;;  %1406 = vst.msk [vmem:[#allocation3 + $0x1e] sm:$0xff] %vm746_vm5, %v1401_v14  ;;  %v2165_v43 = vmul.f32 %v2163_v8, %v5142_v60  ;;  %v2263_v57 = vmul.f32 %v2261_v41, %v5153_v47  ;;  %v1525_v21 = vstv %s5329_s10  ;;  %s5413_s7 = sld [smem:[#allocation8 + $0x13]] }
 0x13a   : > { %1291 = vst.msk [vmem:[#allocation3 + $0x8] sm:$0x3] %vm724_vm6, %v1287_v25  ;;  %v1337_v33 = vpop.permute.xlu1 %1336  ;;  %v2380_v12 = vadd.f32 %v2378_v18, %v2282_v22  ;;  %1858 = vrot.lane.b32.xlu2 %v1760_v55, %s6155_s11  ;;  %v2264_v27 = vadd.f32 %v2262_v7, %v2166_v46  ;;  %v2361_v2 = vmul.f32 %v2359_v35, %v5165_v24  ;;  %v1615_v10 = vstv %s5336_s12  ;;  %s5426_s10 = sld [smem:[#allocation8 + $0x1b]] }
 0x13b   : > { %2510 = vrot.lane.b32.xlu1 %v2387_v0, %s6155_s11  ;;  %1342 = vst.msk [vmem:[#allocation3 + $0xa] sm:$0xff] %vm746_vm5, %v1337_v33  ;;  %v1526_v38 = vmul.f32 %v5149_v15, %v1525_v21  ;;  %v1527_v0 = vmul.f32 %v5257_v4, %v1525_v21  ;;  %v2167_v9 = vadd.f32 %v2165_v43, %v2077_v16  ;;  %v1713_v53 = vstv %s5345_s3  ;;  %s5479_s12 = sld [smem:[#allocation8 + $0x43]] }
 0x13c   : > { %v1811_v32 = vstv %s5357_s15  ;;  %v5408_v31 = vadd.f32 %v2360_v1, %v2264_v27  ;;  %v1616_v55 = vmul.f32 %v5158_v50, %v1615_v10  ;;  %v1617_v40 = vmul.f32 %v5264_v44, %v1615_v10  ;;  %s5418_s15 = sld [smem:[#allocation8 + $0x17]] }
 0x13d   : > { %v1714_v34 = vmul.f32 %v5161_v48, %v1713_v53  ;;  %v2265_v18 = vadd.f32 %v2263_v57, %v2167_v9  ;;  %v1715_v42 = vmul.f32 %v5267_v3, %v1713_v53  ;;  %v1812_v8 = vmul.f32 %v5172_v20, %v1811_v32  ;;  %v3161_v57 = vld [vmem:[#allocation2] sm:$0xff]  ;;  %s5485_s3 = sld [smem:[#allocation8 + $0x47]] }
 0x13e   : > { %v1813_v25 = vmul.f32 %v5274_v56, %v1811_v32  ;;  %v1618_v28 = vadd.f32 %v1616_v55, %v1526_v38  ;;  %v1619_v13 = vadd.f32 %v1617_v40, %v1527_v0  ;;  %v2069_v22 = vmul.f32 %v2067_v37, %v5120_v52  ;;  %s5571_s4 = sld [smem:[#allocation8 + $0x57]] }
 0x13f   : > { %v2153_v14 = vmul.f32 %v2151_v5, %v5142_v60  ;;  %2468 = vrot.lane.b32.xlu0 %v2357_v63, %s6154_s9  ;;  %v2363_v41 = vadd.f32 %v2361_v2, %v2265_v18  ;;  %v2251_v35 = vmul.f32 %v2249_v54, %v5153_v47  ;;  %v2349_v16 = vmul.f32 %v2347_v36, %v5165_v24  ;;  %s5582_s23 = sld [smem:[#allocation8 + $0x5b]] }
 0x140   : > { %v1477_v37 = vstv %s5365_s8  ;;  %v1716_v33 = vadd.f32 %v1714_v34, %v1618_v28  ;;  %v1717_v46 = vadd.f32 %v1715_v42, %v1619_v13  ;;  %v1307_v1 = vpop.permute.xlu2 %1306  ;;  %v1543_v54 = vstv %s5372_s18  ;;  %s5516_s18 = sld [smem:[#allocation8 + $0x82]] }
 0x141   : > { %v1369_v6 = vpop.permute.xlu0 %1368  ;;  %v2155_v63 = vadd.f32 %v2153_v14, %v2069_v22  ;;  %v1479_v7 = vmul.f32 %v5257_v4, %v1477_v37  ;;  %v1641_v36 = vstv %s5376_s19  ;;  %v1739_v43 = vstv %s5383_s21  ;;  %s5493_s21 = sld [smem:[#allocation8 + $0x4b]] }
 0x142   : > { %1374 = vst.msk [vmem:[#allocation3 + $0x14] sm:$0xff] %vm746_vm5, %v1369_v6  ;;  %v1371_v5 = vpop.permute.xlu1 %1370  ;;  %v924_v21 = vmul.f32 %v3161_v57, %v923_v49  ;;  %2498 = vrot.lane.b32.xlu2 %v2380_v12, %s6154_s9  ;;  %v5454_v27 = vadd.f32 %v1812_v8, %v1716_v33  ;;  %v1545_v38 = vmul.f32 %v5264_v44, %v1543_v54  ;;  %v2055_v0 = vstv %s5388_s29  ;;  %s5506_s19 = sld [smem:[#allocation8 + $0x4f]]  ;;  %v3162_v57 = vld [vmem:[#allocation2 + $0x10] sm:$0xff] }
 0x143   : > { %2424 = vrot.lane.b32.xlu1 %v2326_v11, %s6153_s0  ;;  %1375 = vst.msk [vmem:[#allocation3 + $0x1c] sm:$0x3] %vm748_vm8, %v1371_v5  ;;  %v5456_v11 = vadd.f32 %v1813_v25, %v1717_v46  ;;  %v2253_v2 = vadd.f32 %v2251_v35, %v2155_v63  ;;  %v1643_v49 = vmul.f32 %v5267_v3, %v1641_v36  ;;  %v2133_v9 = vstv %s5395_s14  ;;  %s5525_s8 = sld [smem:[#allocation8 + $0x86]] }
 0x144   : > { %v1741_v12 = vmul.f32 %v5274_v56, %v1739_v43  ;;  %v1547_v53 = vadd.f32 %v1545_v38, %v1479_v7  ;;  %v2057_v32 = vmul.f32 %v2055_v0, %v5120_v52  ;;  %v2135_v55 = vmul.f32 %v2133_v9, %v5142_v60  ;;  %v3163_v38 = vld [vmem:[#allocation2 + $0x20] sm:$0xff]  ;;  %s5591_s13 = sld [smem:[#allocation8 + $0x5f]] }
 0x145   : > { %v2351_v10 = vadd.f32 %v2349_v16, %v2253_v2  ;;  %v2231_v40 = vstv %s5401_s28  ;;  %v2329_v34 = vstv %s5406_s25  ;;  %v2035_v18 = vstv %s5413_s7  ;;  %s5636_s24 = sld [smem:[#allocation8 + $0x26]] }
 0x146   : > { %v2103_v42 = vstv %s5418_s15  ;;  %v1645_v25 = vadd.f32 %v1643_v49, %v1547_v53  ;;  %v2137_v6 = vadd.f32 %v2135_v55, %v2057_v32  ;;  %v2233_v28 = vmul.f32 %v2231_v40, %v5153_v47  ;;  %v3164_v53 = vld [vmem:[#allocation2 + $0x30] sm:$0xff]  ;;  %s5646_s5 = sld [smem:[#allocation8 + $0x2a]] }
 0x147   : > { %v2331_v13 = vmul.f32 %v2329_v34, %v5165_v24  ;;  %2476 = vrot.lane.b32.xlu0 %v5408_v31, %s6155_s11  ;;  %v2037_v22 = vmul.f32 %v2035_v18, %v5120_v52  ;;  %v2105_v14 = vmul.f32 %v2103_v42, %v5142_v60  ;;  %v2201_v35 = vstv %s5426_s10  ;;  %s5654_s27 = sld [smem:[#allocation8 + $0x2e]] }
 0x148   : > { %v2299_v16 = vstv %s5437_s2  ;;  %v5508_v33 = vadd.f32 %v1741_v12, %v1645_v25  ;;  %v2235_v46 = vadd.f32 %v2233_v28, %v2137_v6  ;;  %v2203_v31 = vmul.f32 %v2201_v35, %v5153_v47  ;;  %s5742_s29 = sld [smem:[#allocation8 + $0xaf]] }
 0x149   : > { %v1403_v8 = vpop.permute.xlu0 %1402  ;;  %v2301_v63 = vmul.f32 %v2299_v16, %v5165_v24  ;;  %v2107_v7 = vadd.f32 %v2105_v14, %v2037_v22  ;;  %v990_v2 = vmul.f32 %v3162_v57, %v989_v61  ;;  %v1088_v49 = vmul.f32 %v3163_v38, %v1087_v59  ;;  %v5534_v59 = vpop.permute.xlu2 %1304  ;;  %s6168_s25 = sld [smem:[#allocation39_spill]] }
 0x14a   : > { %1407 = vst.msk [vmem:[#allocation3 + $0x26] sm:$0x3] %vm748_vm8, %v1403_v8  ;;  %v1297_v5 = vpop.permute.xlu1 %1296  ;;  %v2059_v12 = vstv %s5442_s16  ;;  %2458 = vrot.lane.b32.xlu2 %v2351_v10, %s6153_s0  ;;  %v1186_v61 = vmul.f32 %v3164_v53, %v1185_v58  ;;  %v2072_v32 = vmul.f32 %v5149_v15, %v2071_v19  ;;  %v2139_v55 = vstv %s5451_s20  ;;  %s5879_s15 = sld [smem:[#allocation8 + $0x2f]] }
 0x14b   : > { %2478 = vrot.lane.b32.xlu1 %v2363_v41, %s6155_s11  ;;  %1301 = vst.msk [vmem:[#allocation3 + $0x8] sm:$0x3] %vm736_vm7, %v1297_v5  ;;  %v2333_v41 = vadd.f32 %v2331_v13, %v2235_v46  ;;  %v2205_v8 = vadd.f32 %v2203_v31, %v2107_v7  ;;  %v992_v25 = vadd.f32 %v990_v2, %v924_v21  ;;  %v2237_v6 = vstv %s5461_s30  ;;  %v1411_v7 = vld [vmem:[#allocation3 + $0x18] sm:$0xff]  ;;  %s5775_s30 = sld [smem:[#allocation8 + $0x23]] }
 0x14c   : > { %1311 = vst.msk [vmem:[#allocation3 + $0x8] sm:$0x3] %vm748_vm8, %v1307_v1  ;;  %v2158_v1 = vmul.f32 %v5158_v50, %v2157_v62  ;;  %v2256_v10 = vmul.f32 %v5161_v48, %v2255_v26  ;;  %v2354_v58 = vmul.f32 %v5172_v20, %v2353_v29  ;;  %v2061_v19 = vmul.f32 %v2059_v12, %v5120_v52  ;;  %s6174_s16 = sld [smem:[#allocation38_spill]] }
 0x14d   : > { %v2141_v21 = vmul.f32 %v2139_v55, %v5142_v60  ;;  %v2303_v28 = vadd.f32 %v2301_v63, %v2205_v8  ;;  %v1090_v13 = vadd.f32 %v1088_v49, %v992_v25  ;;  %v2239_v26 = vmul.f32 %v2237_v6, %v5153_v47 }
 0x14e   : > { %v2160_v62 = vadd.f32 %v2158_v1, %v2072_v32  ;;  %v2335_v5 = vstv %s5471_s6  ;;  %v2039_v46 = vstv %s5479_s12  ;;  %v2109_v31 = vstv %s5485_s3  ;;  %v1410_v1 = vld [vmem:[#allocation3 + $0x10] sm:$0xff]  ;;  %s5783_s6 = sld [smem:[#allocation8 + $0x27]] }
 0x14f   : > { %v2143_v29 = vadd.f32 %v2141_v21, %v2061_v19  ;;  %2436 = vrot.lane.b32.xlu0 %v2333_v41, %s6154_s9  ;;  %v1188_v63 = vadd.f32 %v1186_v61, %v1090_v13  ;;  %v2337_v2 = vmul.f32 %v2335_v5, %v5165_v24  ;;  %v2111_v41 = vmul.f32 %v2109_v31, %v5142_v60  ;;  %s6169_s7 = smov %s6168_s25  ;;  %s6175_s12 = sld [smem:[#allocation17_spill]] }
 0x150   : > { %v2258_v57 = vadd.f32 %v2256_v10, %v2160_v62  ;;  %v2207_v53 = vstv %s5493_s21  ;;  %v2305_v8 = vstv %s5506_s19  ;;  %v1509_v25 = vstv %s5516_s18  ;;  %s5713_s18 = sld [smem:[#allocation8 + $0xa3]] }
 0x151   : > { %v1412_v22 = vld [vmem:[#allocation3 + $0x20] sm:$0xff]  ;;  %v1285_v14 = vpop.permute.xlu0 %1284  ;;  %v2241_v49 = vadd.f32 %v2239_v26, %v2143_v29  ;;  %1280 = vst.msk [vmem:[#allocation3] sm:$0xff] %vm319_vm1, %v1188_v63  ;;  %v2307_v21 = vmul.f32 %v2305_v8, %v5165_v24  ;;  %v1689_v13 = vstv %s5537_s17  ;;  %v1787_v62 = vstv %s5545_s1  ;;  %s5724_s19 = sld [smem:[#allocation8 + $0xa7]] }
 0x152   : > { %1931 = vst.msk [vmem:[#allocation3 + $0x26] sm:$0x3] %vm712_vm4, %v5456_v11  ;;  %1424 = vmatpush.msra.mxu2 %v1412_v22  ;;  %v1295_v38 = vpop.permute.xlu1 %1294  ;;  %v2041_v11 = vmul.f32 %v2039_v46, %v5120_v52  ;;  %v2356_v32 = vadd.f32 %v2354_v58, %v2258_v57  ;;  %v1510_v58 = vmul.f32 %v5149_v15, %v1509_v25  ;;  %s5728_s21 = sld [smem:[#allocation8 + $0xab]] }
 0x153   : > { %1930 = vst.msk [vmem:[#allocation3 + $0x1e] sm:$0xff] %vm319_vm1, %v5454_v27  ;;  %v1409_v61 = vld [vmem:[#allocation3 + $0x8] sm:$0xff]  ;;  %2394 = vrot.lane.b32.xlu1 %v2303_v28, %s6153_s0  ;;  %v2209_v27 = vmul.f32 %v2207_v53, %v5153_v47  ;;  %v2339_v10 = vadd.f32 %v2337_v2, %v2241_v49  ;;  %v1591_v28 = vstv %s5525_s8  ;;  %v1511_v26 = vmul.f32 %v5257_v4, %v1509_v25  ;;  %s5615_s8 = sld [smem:[#allocation8 + $0x22]] }
 0x154   : > { %1425 = vmatpush.msra.mxu2 %v1411_v7  ;;  %1835 = vst.msk [vmem:[#allocation3 + $0x8] sm:$0x3] %vm712_vm4, %v5508_v33  ;;  %v2113_v19 = vadd.f32 %v2111_v41, %v2041_v11  ;;  %2466 = vrot.lane.b32.xlu2 %v2356_v32, %s6154_s9  ;;  %v1592_v22 = vmul.f32 %v5158_v50, %v1591_v28  ;;  %s5799_s17 = sld [smem:[#allocation8 + $0x83]] }
 0x155   : > { %1290 = vst.msk [vmem:[#allocation3] sm:$0xff] %vm722_vm2, %v1285_v14  ;;  %v1690_v29 = vmul.f32 %v5161_v48, %v1689_v13  ;;  %v1788_v14 = vmul.f32 %v5172_v20, %v1787_v62  ;;  %v1935_v7 = vpop.permute.xlu2 %1934  ;;  %v1593_v63 = vmul.f32 %v5264_v44, %v1591_v28  ;;  %v1691_v57 = vmul.f32 %v5267_v3, %v1689_v13  ;;  %s2860_s3 = sld [smem:[#allocation9 + $0x1]] }
 0x156   : > { %1426 = vmatpush.msra.mxu2 %v1410_v1  ;;  %1300 = vst.msk [vmem:[#allocation3] sm:$0xff] %vm734_vm3, %v1295_v38  ;;  %v2211_v33 = vadd.f32 %v2209_v27, %v2113_v19  ;;  %v1789_v2 = vmul.f32 %v5274_v56, %v1787_v62  ;;  %v2043_v38 = vstv %s5560_s26  ;;  %v1594_v11 = vadd.f32 %v1592_v22, %v1510_v58 }
 0x157   : > { %1310 = vst.msk [vmem:[#allocation3] sm:$0xff] %vm746_vm5, %v5534_v59  ;;  %v2053_v59 = vmul.f32 %v2051_v30, %v5120_v52  ;;  %2446 = vrot.lane.b32.xlu0 %v2339_v10, %s6155_s11  ;;  %v1595_v32 = vadd.f32 %v1593_v63, %v1511_v26  ;;  %v2227_v27 = vmul.f32 %v2225_v45, %v5153_v47  ;;  %v2213_v58 = vstv %s5582_s23  ;;  %s5813_s23 = sld [smem:[#allocation8 + $0x87]] }
 0x158   : > { %1427 = vmatpush.msra.mxu2 %v1409_v61  ;;  %v2309_v49 = vadd.f32 %v2307_v21, %v2211_v33  ;;  %v2129_v61 = vmul.f32 %v2127_v39, %v5142_v60  ;;  %1940 = vst.msk [vmem:[#allocation3 + $0x1e] sm:$0xff] %vm722_vm2, %v1935_v7  ;;  %v2325_v25 = vmul.f32 %v2323_v17, %v5165_v24  ;;  %v2115_v21 = vstv %s5571_s4  ;;  %s2930_s4 = sld [smem:[#allocation9 + $0x2]] }
 0x159   : > { %v1903_v41 = vpop.permute.xlu0 %1902  ;;  %v2045_v30 = vmul.f32 %v2043_v38, %v5120_v52  ;;  %v1692_v1 = vadd.f32 %v1690_v29, %v1594_v11  ;;  %v1693_v45 = vadd.f32 %v1691_v57, %v1595_v32  ;;  %v2117_v17 = vmul.f32 %v2115_v21, %v5142_v60 }
 0x15a   : > { %v1905_v39 = vpop.permute.xlu1 %1904  ;;  %v2131_v19 = vadd.f32 %v2129_v61, %v2053_v59  ;;  %v2215_v52 = vmul.f32 %v2213_v58, %v5153_v47  ;;  %v2311_v10 = vstv %s5591_s13  ;;  %v2040_v26 = vmul.f32 %v5149_v15, %v2039_v46  ;;  %s3000_s13 = sld [smem:[#allocation9 + $0x3]] }
 0x15b   : > { %2404 = vrot.lane.b32.xlu1 %v2309_v49, %s6154_s9  ;;  %v1790_v28 = vadd.f32 %v1788_v14, %v1692_v1  ;;  %v2313_v62 = vmul.f32 %v2311_v10, %v5165_v24  ;;  %v1791_v33 = vadd.f32 %v1789_v2, %v1693_v45  ;;  %v2119_v22 = vadd.f32 %v2117_v17, %v2045_v30 }
 0x15c   : > { %v2229_v13 = vadd.f32 %v2227_v27, %v2131_v19  ;;  %v2110_v29 = vmul.f32 %v5158_v50, %v2109_v31  ;;  %v2208_v7 = vmul.f32 %v5161_v48, %v2207_v53  ;;  %v2306_v46 = vmul.f32 %v5172_v20, %v2305_v8 }
 0x15d   : > { %1898 = vst.msk [vmem:[#allocation3 + $0x14] sm:$0xff] %vm319_vm1, %v1790_v28  ;;  %v2056_v63 = vmul.f32 %v5149_v15, %v2055_v0  ;;  %v2134_v57 = vmul.f32 %v5158_v50, %v2133_v9  ;;  %v2217_v31 = vadd.f32 %v2215_v52, %v2119_v22  ;;  %v2232_v2 = vmul.f32 %v5161_v48, %v2231_v40 }
 0x15e   : > { %v2327_v14 = vadd.f32 %v2325_v25, %v2229_v13  ;;  %v1408_v24 = vld [vmem:[#allocation3] sm:$0xff]  ;;  %1908 = vst.msk [vmem:[#allocation3 + $0x14] sm:$0xff] %vm722_vm2, %v1903_v41  ;;  %v2112_v53 = vadd.f32 %v2110_v29, %v2040_v26  ;;  %v1493_v49 = vstv %s5615_s8  ;;  %v2330_v8 = vmul.f32 %v5172_v20, %v2329_v34  ;;  %v1915_v59 = vpop.permute.xlu2 %1914 }
 0x15f   : > { %1428 = vmatpush.msra.mxu2 %v1408_v24  ;;  %1899 = vst.msk [vmem:[#allocation3 + $0x1c] sm:$0x3] %vm712_vm4, %v1791_v33  ;;  %v2136_v9 = vadd.f32 %v2134_v57, %v2056_v63  ;;  %v2060_v11 = vmul.f32 %v5149_v15, %v2059_v12  ;;  %v2315_v40 = vadd.f32 %v2313_v62, %v2217_v31  ;;  %v1567_v12 = vstv %s5636_s24 }
 0x160   : > { %2426 = vrot.lane.b32.xlu2 %v2327_v14, %s6153_s0  ;;  %2858 = vmatmul.msk.f32.vlgmr.msra.gmra.mxu2 %vm851_vm9, %v5127_v51  ;;  %1909 = vst.msk [vmem:[#allocation3 + $0x1c] sm:$0x3] %vm724_vm6, %v1905_v39  ;;  %v2210_v41 = vadd.f32 %v2208_v7, %v2112_v53  ;;  %v2140_v61 = vmul.f32 %v5158_v50, %v2139_v55  ;;  %v1665_v1 = vstv %s5646_s5  ;;  %v1763_v45 = vstv %s5654_s27  ;;  %s5836_s5 = sld [smem:[#allocation8 + $0x8b]] }
 0x161   : > { %v1937_v0 = vpop.permute.xlu0 %1936  ;;  %v2234_v32 = vadd.f32 %v2232_v2, %v2136_v9  ;;  %v2238_v34 = vmul.f32 %v5161_v48, %v2237_v6  ;;  %v1494_v27 = vmul.f32 %v5149_v15, %v1493_v49  ;;  %2414 = vrot.lane.b32.xlu0 %v2315_v40, %s6155_s11  ;;  %v1568_v55 = vmul.f32 %v5158_v50, %v1567_v12  ;;  %s5843_s27 = sld [smem:[#allocation8 + $0x7]] }
 0x162   : > { %1941 = vst.msk [vmem:[#allocation3 + $0x26] sm:$0x3] %vm724_vm6, %v1937_v0  ;;  %v1913_v51 = vpop.permute.xlu1 %1912  ;;  %v2308_v25 = vadd.f32 %v2306_v46, %v2210_v41  ;;  %v2142_v30 = vadd.f32 %v2140_v61, %v2060_v11  ;;  %v1666_v19 = vmul.f32 %v5161_v48, %v1665_v1  ;;  %v1495_v6 = vmul.f32 %v5257_v4, %v1493_v49  ;;  %v5757_v0 = vld [vmem:[#allocation2 + $0x8] sm:$0x3]  ;;  %v5770_v41 = vld [vmem:[%s6169_s7 + $0x30] sm:$0xff] }
 0x163   : > { %1918 = vst.msk [vmem:[#allocation3 + $0x14] sm:$0xff] %vm734_vm3, %v1913_v51  ;;  %v2332_v39 = vadd.f32 %v2330_v8, %v2234_v32  ;;  %v1570_v17 = vadd.f32 %v1568_v55, %v1494_v27  ;;  %v1764_v52 = vmul.f32 %v5172_v20, %v1763_v45  ;;  %v1569_v28 = vmul.f32 %v5264_v44, %v1567_v12  ;;  %v5788_v32 = vld [vmem:[%s6169_s7 + $0x28] sm:$0xff] }
 0x164   : > { %1919 = vst.msk [vmem:[#allocation3 + $0x1c] sm:$0x3] %vm736_vm7, %v1915_v59  ;;  %2402 = vrot.lane.b32.xlu1 %v2308_v25, %s6154_s9  ;;  %v1667_v13 = vmul.f32 %v5267_v3, %v1665_v1  ;;  %v2336_v62 = vmul.f32 %v5172_v20, %v2335_v5  ;;  %v1765_v22 = vmul.f32 %v5274_v56, %v1763_v45  ;;  %v2079_v63 = vstv %s5713_s18  ;;  %v5834_v1 = vld [vmem:[%s6169_s7 + $0x10] sm:$0xff] }
 0x165   : > { %v1668_v26 = vadd.f32 %v1666_v19, %v1570_v17  ;;  %v1571_v33 = vadd.f32 %v1569_v28, %v1495_v6  ;;  %v2240_v29 = vadd.f32 %v2238_v34, %v2142_v30  ;;  %v2036_v44 = vmul.f32 %v5149_v15, %v2035_v18  ;;  %v5850_v17 = vld [vmem:[%s6169_s7 + $0x8] sm:$0xff] }
 0x166   : > { %v2104_v3 = vmul.f32 %v5158_v50, %v2103_v42  ;;  %v2202_v24 = vmul.f32 %v5161_v48, %v2201_v35  ;;  %v2300_v46 = vmul.f32 %v5172_v20, %v2299_v16  ;;  %v2169_v53 = vstv %s5724_s19  ;;  %v5754_v16 = vld [vmem:[%s6168_s25 + $0x38] sm:$0xff]  ;;  %s5872_s25 = sld [smem:[#allocation8 + $0xb]] }
 0x167   : > { %v1766_v56 = vadd.f32 %v1764_v52, %v1668_v26  ;;  %v1669_v5 = vadd.f32 %v1667_v13, %v1571_v33  ;;  %v2338_v18 = vadd.f32 %v2336_v62, %v2240_v29  ;;  %v2044_v35 = vmul.f32 %v5149_v15, %v2043_v38  ;;  %898 = vmatpush.msra.mxu1 %v5754_v16  ;;  %v5863_v26 = vld [vmem:[%s6169_s7] sm:$0xff]  ;;  %s6179_s19 = sld [smem:[#allocation42_spill]] }
 0x168   : > { %2434 = vrot.lane.b32.xlu2 %v2332_v39, %s6154_s9  ;;  %2859 = vmatmul.msk.f32.gmra.mxu2 %vm851_vm9, %v5218_v23  ;;  %v2106_v42 = vadd.f32 %v2104_v3, %v2036_v44  ;;  %v2116_v2 = vmul.f32 %v5158_v50, %v2115_v21  ;;  %v2081_v9 = vmul.f32 %v5757_v0, %v2079_v63  ;;  %v2267_v8 = vstv %s5728_s21  ;;  %v5839_v39 = vld [vmem:[#allocation2 + $0x38] sm:$0x3]  ;;  %s5852_s21 = sld [smem:[#allocation8 + $0x8f]] }
 0x169   : > { %v1945_v4 = vpop.permute.xlu0 %1944  ;;  %v1767_v14 = vadd.f32 %v1765_v22, %v1669_v5  ;;  %1866 = vst.msk [vmem:[#allocation3 + $0xa] sm:$0xff] %vm319_vm1, %v1766_v56  ;;  %v2171_v38 = vmul.f32 %v2169_v53, %v5142_v60  ;;  %1452 = vmatpush.msra.mxu3 %v5754_v16  ;;  %v2214_v40 = vmul.f32 %v5161_v48, %v2213_v58  ;;  %v2365_v12 = vstv %s5742_s29  ;;  %s5856_s29 = sld [smem:[#allocation8 + $0x2b]] }
 0x16a   : > { %1950 = vst.msk [vmem:[#allocation3 + $0x1e] sm:$0xff] %vm734_vm3, %v1945_v4  ;;  %v1947_v7 = vpop.permute.xlu1 %1946  ;;  %v1871_v23 = vpop.permute.xlu2 %1870  ;;  %v2204_v31 = vadd.f32 %v2202_v24, %v2106_v42  ;;  %v2118_v11 = vadd.f32 %v2116_v2, %v2044_v35  ;;  %2006 = vmatpush.msrb.mxu2 %v5754_v16  ;;  %v2080_v60 = vmul.f32 %v5149_v15, %v2079_v63  ;;  %v2047_v22 = vstv %s5775_s30  ;;  %v3169_v2 = vld [vmem:[#allocation2 + $0x28] sm:$0x3] }
 0x16b   : > { %1951 = vst.msk [vmem:[#allocation3 + $0x26] sm:$0x3] %vm736_vm7, %v1947_v7  ;;  %v2170_v59 = vmul.f32 %v5158_v50, %v2169_v53  ;;  %899 = vmatpush.msra.mxu1 %v5770_v41  ;;  %v1478_v58 = vmul.f32 %v5149_v15, %v1477_v37  ;;  %1453 = vmatpush.msra.mxu3 %v5770_v41  ;;  %v2121_v29 = vstv %s5783_s6  ;;  %v2063_v44 = vstv %s5799_s17  ;;  %s881_s6 = sld [smem:[#allocation9]]  ;;  %s283_s17 = sand.u32 1, %s6175_s12  }
 0x16c   : > { %1876 = vst.msk [vmem:[#allocation3 + $0xa] sm:$0xff] %vm722_vm2, %v1871_v23  ;;  %v2302_v21 = vadd.f32 %v2300_v46, %v2204_v31  ;;  %v2269_v51 = vmul.f32 %v2267_v8, %v5153_v47  ;;  %2007 = vmatpush.msrb.mxu2 %v5770_v41  ;;  %v2173_v34 = vadd.f32 %v2171_v38, %v2081_v9  ;;  %v2145_v3 = vstv %s5813_s23  ;;  %s2724_s1 = sshll.u32 %s283_s17, 5  ;;  %s6176_s23 = sld [smem:[#allocation22_spill]] }
 0x16d   : > { %1867 = vst.msk [vmem:[#allocation3 + $0x12] sm:$0x3] %vm712_vm4, %v1767_v14  ;;  %900 = vmatpush.msra.mxu1 %v5788_v32  ;;  %v1544_v15 = vmul.f32 %v5158_v50, %v1543_v54  ;;  %v1642_v47 = vmul.f32 %v5161_v48, %v1641_v36  ;;  %1454 = vmatpush.msra.mxu3 %v5788_v32  ;;  %v5811_v50 = vld [vmem:[%s6169_s7 + $0x20] sm:$0xff]  ;;  %v5819_v36 = vld [vmem:[#allocation2 + $0x30] sm:$0xff]  ;;  %v2243_v23 = vstv %s5836_s5  ;;  %v2097_v31 = vstv %s5843_s27  ;;  %s6010_s26 = scalar_lea.vmem [#allocation11], %s2724_s1 }
 0x16e   : > { %v2268_v27 = vmul.f32 %v5161_v48, %v2267_v8  ;;  %v2216_v25 = vadd.f32 %v2214_v40, %v2118_v11  ;;  %v2312_v30 = vmul.f32 %v5172_v20, %v2311_v10  ;;  %2008 = vmatpush.msrb.mxu2 %v5788_v32  ;;  %v2172_v54 = vadd.f32 %v2170_v59, %v2080_v60  ;;  %v5828_v10 = vld [vmem:[%s6169_s7 + $0x18] sm:$0xff]  ;;  %v5904_v40 = vld [vmem:[#allocation2 + $0x10] sm:$0xff]  ;;  %s2596_s14 = sshll.u32 %s6010_s26, 4  ;;  %s2597_s14 = int_to_ptr.vmem [resolvable:$true] %s2596_s14 }
 0x16f   : > { %v1546_v48 = vadd.f32 %v1544_v15, %v1478_v58  ;;  %v1740_v20 = vmul.f32 %v5819_v36, %v1739_v43  ;;  %901 = vmatpush.msra.mxu1 %v5811_v50  ;;  %1455 = vmatpush.msra.mxu3 %v5811_v50  ;;  %v2271_v43 = vadd.f32 %v2269_v51, %v2173_v34  ;;  %v2341_v53 = vstv %s5852_s21 }
 0x170   : > { %2444 = vrot.lane.b32.xlu2 %v2338_v18, %s6155_s11  ;;  %2009 = vmatpush.msrb.mxu2 %v5811_v50  ;;  %v2367_v19 = vmul.f32 %v5839_v39, %v2365_v12  ;;  %v2314_v6 = vadd.f32 %v2312_v30, %v2216_v25  ;;  %v2270_v52 = vadd.f32 %v2268_v27, %v2172_v54  ;;  %v3168_v18 = vld [vmem:[#allocation2 + $0x18] sm:$0x3]  ;;  %v2195_v51 = vstv %s5872_s25  ;;  %v5921_v25 = vld [vmem:[#allocation2 + $0x20] sm:$0xff] }
 0x171   : > { %v1873_v57 = vpop.permute.xlu0 %1872  ;;  %v1644_v45 = vadd.f32 %v1642_v47, %v1546_v48  ;;  %902 = vmatpush.msra.mxu1 %v5828_v10  ;;  %1456 = vmatpush.msra.mxu3 %v5828_v10  ;;  %v2366_v28 = vmul.f32 %v5819_v36, %v2365_v12  ;;  %v2065_v14 = vmul.f32 %v5757_v0, %v2063_v44  ;;  %v2317_v34 = vstv %s5879_s15 }
 0x172   : > { %1877 = vst.msk [vmem:[#allocation3 + $0x12] sm:$0x3] %vm724_vm6, %v1873_v57  ;;  %v1923_v49 = vpop.permute.xlu1 %1922  ;;  %2010 = vmatpush.msrb.mxu2 %v5828_v10  ;;  %v2369_v33 = vadd.f32 %v2367_v19, %v2271_v43  ;;  %v2147_v42 = vmul.f32 %v3168_v18, %v2145_v3  ;;  %v2049_v24 = vmul.f32 %v5757_v0, %v2047_v22  ;;  %s3005_s22 = sshll.u32 %s6176_s23, 3 }
 0x173   : > { %1928 = vst.msk [vmem:[#allocation3 + $0x14] sm:$0xff] %vm746_vm5, %v1923_v49  ;;  %v1742_v13 = vadd.f32 %v1740_v20, %v1644_v45  ;;  %903 = vmatpush.msra.mxu1 %v5834_v1  ;;  %1457 = vmatpush.msra.mxu3 %v5834_v1  ;;  %v2368_v56 = vadd.f32 %v2366_v28, %v2270_v52 }
 0x174   : > { %v1925_v61 = vpop.permute.xlu2 %1924  ;;  %2011 = vmatpush.msrb.mxu2 %v5834_v1  ;;  %v2123_v46 = vmul.f32 %v3168_v18, %v2121_v29  ;;  %v2149_v35 = vadd.f32 %v2147_v42, %v2065_v14  ;;  %v2245_v49 = vmul.f32 %v3169_v2, %v2243_v23  ;;  %v2343_v8 = vmul.f32 %v5839_v39, %v2341_v53 }
 0x175   : > { %1929 = vst.msk [vmem:[#allocation3 + $0x1c] sm:$0x3] %vm748_vm8, %v1925_v61  ;;  %904 = vmatpush.msra.mxu1 %v5850_v17  ;;  %1458 = vmatpush.msra.mxu3 %v5850_v17  ;;  %v2099_v59 = vmul.f32 %v3168_v18, %v2097_v31  ;;  %v2146_v47 = vmul.f32 %v5904_v40, %v2145_v3 }
 0x176   : > { %1834 = vst.msk [vmem:[#allocation3] sm:$0xff] %vm319_vm1, %v1742_v13  ;;  %2012 = vmatpush.msrb.mxu2 %v5850_v17  ;;  %v2247_v38 = vadd.f32 %v2245_v49, %v2149_v35  ;;  %v2125_v58 = vadd.f32 %v2123_v46, %v2049_v24  ;;  %v2197_v12 = vmul.f32 %v3169_v2, %v2195_v51  ;;  %v3174_v46 = vld [vmem:[%s6174_s16 + $0x8] sm:$0xff] }
 0x177   : > { %905 = vmatpush.msra.mxu1 %v5863_v26  ;;  %1459 = vmatpush.msra.mxu3 %v5863_v26  ;;  %v2319_v54 = vmul.f32 %v5839_v39, %v2317_v34  ;;  %v2244_v43 = vmul.f32 %v5921_v25, %v2243_v23  ;;  %v2318_v52 = vmul.f32 %v5819_v36, %v2317_v34  ;;  %v5952_v23 = vld [vmem:[%s6174_s16] sm:$0xff] }
 0x178   : > { %2392 = vrot.lane.b32.xlu2 %v2302_v21, %s6153_s0  ;;  %s5817_s0 = sld [smem:[#allocation8 + $0x3]]  ;;  %2013 = vmatpush.msrb.mxu2 %v5863_v26  ;;  %v5901_v21 = vld [vmem:[#allocation2] sm:$0xff]  ;;  %v2342_v13 = vmul.f32 %v5819_v36, %v2341_v53  ;;  %v2098_v53 = vmul.f32 %v5904_v40, %v2097_v31  ;;  %v2196_v49 = vmul.f32 %v5921_v25, %v2195_v51 }
 0x179   : > { %v1955_v37 = vpop.permute.xlu0 %1954  ;;  %2560 = vmatpush.msrb.mxu3 %v5754_v16  ;;  %v2219_v16 = vstv %s5856_s29  ;;  %v2048_v11 = vmul.f32 %v5901_v21, %v2047_v22  ;;  %v2064_v15 = vmul.f32 %v5901_v21, %v2063_v44  ;;  %s6180_s29 = smov %s6179_s19 }
 0x17a   : > { %1960 = vst.msk [vmem:[#allocation3 + $0x1e] sm:$0xff] %vm746_vm5, %v1955_v37  ;;  %v1957_v55 = vpop.permute.xlu1 %1956  ;;  %v2221_v61 = vmul.f32 %v3169_v2, %v2219_v16  ;;  %v2220_v30 = vmul.f32 %v5921_v25, %v2219_v16  ;;  %s3255_s2 = scalar_lea.hbm %s6180_s29, 128 }
 0x17b   : > { %1961 = vst.msk [vmem:[#allocation3 + $0x26] sm:$0x3] %vm748_vm8, %v1957_v55  ;;  %2561 = vmatpush.msrb.mxu3 %v5770_v41  ;;  %v2122_v41 = vmul.f32 %v5904_v40, %v2121_v29  ;;  %v2148_v55 = vadd.f32 %v2146_v47, %v2064_v15 }
 0x17c   : > { %v1881_v62 = vpop.permute.xlu2 %1880 }
 0x17d   : > { %1886 = vst.msk [vmem:[#allocation3 + $0xa] sm:$0xff] %vm734_vm3, %v1881_v62  ;;  %2562 = vmatpush.msrb.mxu3 %v5788_v32  ;;  %v2345_v32 = vadd.f32 %v2343_v8, %v2247_v38  ;;  %v2124_v37 = vadd.f32 %v2122_v41, %v2048_v11 }
 0x17e   : > { %v2031_v63 = vstv %s5817_s0  ;;  %s6177_s0 = sld [smem:[#allocation21_spill]] }
 0x17f   : > { %v2033_v60 = vmul.f32 %v5757_v0, %v2031_v63  ;;  %2563 = vmatpush.msrb.mxu3 %v5811_v50  ;;  %v2223_v50 = vadd.f32 %v2221_v61, %v2125_v58 }
 0x180   : > { %2412 = vrot.lane.b32.xlu2 %v2314_v6, %s6155_s11  ;;  %s5892_s11 = sld [smem:[#allocation8 + $0xf]]  ;;  %v2222_v6 = vadd.f32 %v2220_v30, %v2124_v37 }
 0x181   : > { %v1883_v4 = vpop.permute.xlu0 %1882  ;;  %v1965_v57 = vld [vmem:[#allocation3 + $0x18] sm:$0xff]  ;;  %2564 = vmatpush.msrb.mxu3 %v5828_v10  ;;  %v2101_v27 = vadd.f32 %v2099_v59, %v2033_v60  ;;  %v2321_v28 = vadd.f32 %v2319_v54, %v2223_v50  ;;  %v882_v54 = vstv %s881_s6 }
 0x182   : > { %1887 = vst.msk [vmem:[#allocation3 + $0x12] sm:$0x3] %vm736_vm7, %v1883_v4  ;;  %v1966_v5 = vld [vmem:[#allocation3 + $0x20] sm:$0xff]  ;;  %v1841_v7 = vpop.permute.xlu1 %1840  ;;  %v2320_v4 = vadd.f32 %v2318_v52, %v2222_v6  ;;  %v1437_v6 = vstv %s2860_s3 }
 0x183   : > { %2485 = vst.msk [vmem:[#allocation3 + $0x26] sm:$0x3] %vm712_vm4, %v2369_v33  ;;  %1978 = vmatpush.msrb.mxu0 %v1966_v5  ;;  %2565 = vmatpush.msrb.mxu3 %v5834_v1  ;;  %v2199_v19 = vadd.f32 %v2197_v12, %v2101_v27  ;;  %v2246_v1 = vadd.f32 %v2244_v43, %v2148_v55 }
 0x184   : > { %1845 = vst.msk [vmem:[#allocation3 + $0x8] sm:$0x3] %vm724_vm6, %v1841_v7  ;;  %v1891_v9 = vpop.permute.xlu2 %1890  ;;  %s2593_s24 = sadd.s32 %s6177_s0, %s3005_s22 }
 0x185   : > { %1979 = vmatpush.msrb.mxu0 %v1965_v57  ;;  %2484 = vst.msk [vmem:[#allocation3 + $0x1e] sm:$0xff] %vm319_vm1, %v2368_v56  ;;  %2566 = vmatpush.msrb.mxu3 %v5850_v17  ;;  %v2344_v44 = vadd.f32 %v2342_v13, %v2246_v1  ;;  %v2032_v57 = vmul.f32 %v5901_v21, %v2031_v63  ;;  %s3006_s5 = sshll.u32 %s2593_s24, 3 }
 0x186   : > { %1896 = vst.msk [vmem:[#allocation3 + $0xa] sm:$0xff] %vm746_vm5, %v1891_v9  ;;  %v2293_v48 = vstv %s5892_s11  ;;  %s2595_s21 = scalar_lea.hbm %s6179_s19, %s3006_s5 }
 0x187   : > { %2453 = vst.msk [vmem:[#allocation3 + $0x1c] sm:$0x3] %vm712_vm4, %v2345_v32  ;;  %v2295_v45 = vmul.f32 %v5839_v39, %v2293_v48  ;;  %2567 = vmatpush.msrb.mxu3 %v5863_v26  ;;  %v2100_v2 = vadd.f32 %v2098_v53, %v2032_v57  ;;  %v2294_v38 = vmul.f32 %v5819_v36, %v2293_v48  ;;  %s2598_s28 = sshll.u32 %s2595_s21, 4  ;;  %s2599_s28 = int_to_ptr.hbm [resolvable:$true] %s2598_s28 }
 0x188   : > { %s3249_s25 = sshra.s32 %s2599_s28, 4  ;;  %s3250_s25 = int_to_ptr.hbm [resolvable:$true] %s3249_s25 }
 0x189   : > { %v1893_v0 = vpop.permute.xlu0 %1892  ;;  %v2297_v33 = vadd.f32 %v2295_v45, %v2199_v19  ;;  %v2198_v9 = vadd.f32 %v2196_v49, %v2100_v2  ;;  %s3251_s15 = scalar_lea.hbm %s3250_s25, 32  ;;  %p3256_p7 = scmp.lt.s32.totalorder %s3250_s25, %s6180_s29 }
 0x18a   : > { %1897 = vst.msk [vmem:[#allocation3 + $0x12] sm:$0x3] %vm748_vm8, %v1893_v0  ;;  %p3252_p3 = scmp.ne.s32.totalorder %s3250_s25, %s3251_s15  ;;  %p3257_p8 = scmp.lt.s32.totalorder %s3255_s2, %s3251_s15 }
 0x18b   : > { %v2296_v63 = vadd.f32 %v2294_v38, %v2198_v9 }
 0x18c   : > { %v1861_v10 = vpop.permute.xlu2 %1860  ;;  %p3253_p2 = pnand %p3252_p3, %p3486_p10  ;;  %p3258_p4 = por %p3257_p8, %p3256_p7 }
 0x18d   : > { %v1851_v20 = vpop.permute.xlu1 %1850 }
 0x18e   : > { %1855 = vst.msk [vmem:[#allocation3 + $0x8] sm:$0x3] %vm736_vm7, %v1851_v20  ;;  %p3254_p5 = pneg %p3253_p2 }
 0x18f   : > { %1865 = vst.msk [vmem:[#allocation3 + $0x8] sm:$0x3] %vm748_vm8, %v1861_v10 }
 0x190   : > { %p3259_p9 = pnand %p3258_p4, %p3254_p5 }
 0x191   : > { %v1964_v62 = vld [vmem:[#allocation3 + $0x10] sm:$0xff]  ;;  %v1839_v22 = vpop.permute.xlu0 %1838 }
 0x192   : > { %2421 = vst.msk [vmem:[#allocation3 + $0x12] sm:$0x3] %vm712_vm4, %v2321_v28  ;;  %1980 = vmatpush.msrb.mxu0 %v1964_v62 }
 0x193   : > { %1844 = vst.msk [vmem:[#allocation3] sm:$0xff] %vm722_vm2, %v1839_v22 }
 0x194   : > { %v1859_v29 = vpop.permute.xlu2 %1858  ;;  %2452 = vst.msk [vmem:[#allocation3 + $0x14] sm:$0xff] %vm319_vm1, %v2344_v44 }
 0x195   : > { %v1849_v39 = vpop.permute.xlu1 %1848 }
 0x196   : > { %v1963_v17 = vld [vmem:[#allocation3 + $0x8] sm:$0xff]  ;;  %1854 = vst.msk [vmem:[#allocation3] sm:$0xff] %vm734_vm3, %v1849_v39 }
 0x197   : > { %2389 = vst.msk [vmem:[#allocation3 + $0x8] sm:$0x3] %vm712_vm4, %v2297_v33  ;;  %1981 = vmatpush.msrb.mxu0 %v1963_v17 }
 0x198   : > { %2420 = vst.msk [vmem:[#allocation3 + $0xa] sm:$0xff] %vm319_vm1, %v2320_v4  ;;  %v1991_v4 = vstv %s2930_s4 }
 0x199   : > { %1864 = vst.msk [vmem:[#allocation3] sm:$0xff] %vm746_vm5, %v1859_v29  ;;  %v2489_v26 = vpop.permute.xlu0 %2488 }
 0x19a   : > { %2494 = vst.msk [vmem:[#allocation3 + $0x1e] sm:$0xff] %vm722_vm2, %v2489_v26  ;;  %v2545_v26 = vstv %s3000_s13 }
 0x19c   : > { %v875_v3 = vpop.f32.mrf.mxu0  ;;  %v2499_v5 = vpop.permute.xlu2 %2498 }
 0x19d   : > { %2792 = vmatmul.msk.f32.vlgmr.msra.gmra.mxu1 %vm883_vm10, %v875_v3  ;;  %v2491_v56 = vpop.permute.xlu1 %2490  ;;  %2504 = vst.msk [vmem:[#allocation3 + $0x1e] sm:$0xff] %vm734_vm3, %v2499_v5 }
 0x19e   : > { %2495 = vst.msk [vmem:[#allocation3 + $0x26] sm:$0x3] %vm724_vm6, %v2491_v56 }
 0x1a0   : > { %v1962_v7 = vld [vmem:[#allocation3] sm:$0xff] }
 0x1a1   : > { %1982 = vmatpush.msrb.mxu0 %v1962_v7  ;;  %v2501_v14 = vpop.permute.xlu0 %2500  ;;  %2388 = vst.msk [vmem:[#allocation3] sm:$0xff] %vm319_vm1, %v2296_v63 }
 0x1a2   : > { %2928 = vmatmul.msk.f32.vlgmr.msrb.gmra.mxu0 %vm851_vm9, %v5952_v23  ;;  %2505 = vst.msk [vmem:[#allocation3 + $0x26] sm:$0x3] %vm736_vm7, %v2501_v14 }
 0x1a4   : > { %v878_v18 = vpop.f32.mrf.mxu0  ;;  %v2459_v24 = vpop.permute.xlu2 %2458 }
 0x1a5   : > { %2793 = vmatmul.msk.f32.gmra.mxu1 %vm883_vm10, %v878_v18  ;;  %v2457_v42 = vpop.permute.xlu1 %2456  ;;  %2463 = vst.msk [vmem:[#allocation3 + $0x1c] sm:$0x3] %vm724_vm6, %v2459_v24 }
 0x1a6   : > { %2462 = vst.msk [vmem:[#allocation3 + $0x14] sm:$0xff] %vm722_vm2, %v2457_v42 }
 0x1a9   : > { %v2509_v35 = vpop.permute.xlu0 %2508 }
 0x1aa   : > { %2929 = vmatmul.msk.f32.gmra.mxu0 %vm851_vm9, %v3174_v46  ;;  %2514 = vst.msk [vmem:[#allocation3 + $0x1e] sm:$0xff] %vm746_vm5, %v2509_v35 }
 0x1ad   : > { %v2511_v16 = vpop.permute.xlu1 %2510 }
 0x1ae   : > { %2515 = vst.msk [vmem:[#allocation3 + $0x26] sm:$0x3] %vm748_vm8, %v2511_v16  ;;  %v2467_v8 = vpop.permute.xlu2 %2466 }
 0x1af   : > { %2472 = vst.msk [vmem:[#allocation3 + $0x14] sm:$0xff] %vm734_vm3, %v2467_v8 }
 0x1b1   : > { %v2469_v31 = vpop.permute.xlu0 %2468 }
 0x1b2   : > { %2473 = vst.msk [vmem:[#allocation3 + $0x1c] sm:$0x3] %vm736_vm7, %v2469_v31 }
 0x1b5   : > { %v2425_v21 = vpop.permute.xlu1 %2424  ;;  %v2520_v11 = vld [vmem:[#allocation3 + $0x20] sm:$0xff] }
 0x1b6   : > { %2430 = vst.msk [vmem:[#allocation3 + $0xa] sm:$0xff] %vm722_vm2, %v2425_v21  ;;  %2532 = vmatpush.msrb.mxu1 %v2520_v11 }
 0x1b9   : > { %v2477_v41 = vpop.permute.xlu0 %2476 }
 0x1ba   : > { %v2427_v40 = vpop.permute.xlu2 %2426  ;;  %2482 = vst.msk [vmem:[#allocation3 + $0x14] sm:$0xff] %vm746_vm5, %v2477_v41 }
 0x1bb   : > { %2431 = vst.msk [vmem:[#allocation3 + $0x12] sm:$0x3] %vm724_vm6, %v2427_v40 }
 0x1bd   : > { %v2479_v36 = vpop.permute.xlu1 %2478 }
 0x1be   : > { %2483 = vst.msk [vmem:[#allocation3 + $0x1c] sm:$0x3] %vm748_vm8, %v2479_v36 }
 0x1c1   : > { %v2437_v59 = vpop.permute.xlu0 %2436 }
 0x1c2   : > { %v2435_v60 = vpop.permute.xlu2 %2434  ;;  %2441 = vst.msk [vmem:[#allocation3 + $0x12] sm:$0x3] %vm736_vm7, %v2437_v59 }
 0x1c3   : > { %2440 = vst.msk [vmem:[#allocation3 + $0xa] sm:$0xff] %vm734_vm3, %v2435_v60 }
 0x1c5   : > { %v2395_v58 = vpop.permute.xlu1 %2394  ;;  %v2519_v61 = vld [vmem:[#allocation3 + $0x18] sm:$0xff] }
 0x1c6   : > { %2399 = vst.msk [vmem:[#allocation3 + $0x8] sm:$0x3] %vm724_vm6, %v2395_v58  ;;  %2533 = vmatpush.msrb.mxu1 %v2519_v61 }
 0x1c9   : > { %v2447_v32 = vpop.permute.xlu0 %2446 }
 0x1ca   : > { %v2445_v51 = vpop.permute.xlu2 %2444  ;;  %2451 = vst.msk [vmem:[#allocation3 + $0x12] sm:$0x3] %vm748_vm8, %v2447_v32 }
 0x1cb   : > { %2450 = vst.msk [vmem:[#allocation3 + $0xa] sm:$0xff] %vm746_vm5, %v2445_v51 }
 0x1cd   : > { %v2405_v34 = vpop.permute.xlu1 %2404 }
 0x1ce   : > { %2409 = vst.msk [vmem:[#allocation3 + $0x8] sm:$0x3] %vm736_vm7, %v2405_v34 }
 0x1d2   : > { %v2393_v15 = vpop.permute.xlu2 %2392  ;;  %v2518_v47 = vld [vmem:[#allocation3 + $0x10] sm:$0xff] }
 0x1d3   : > { %2398 = vst.msk [vmem:[#allocation3] sm:$0xff] %vm722_vm2, %v2393_v15  ;;  %2534 = vmatpush.msrb.mxu1 %v2518_v47  ;;  %v2415_v37 = vpop.permute.xlu0 %2414 }
 0x1d4   : > { %2419 = vst.msk [vmem:[#allocation3 + $0x8] sm:$0x3] %vm748_vm8, %v2415_v37 }
 0x1d6   : > { %v2403_v0 = vpop.permute.xlu1 %2402 }
 0x1d7   : > { %2408 = vst.msk [vmem:[#allocation3] sm:$0xff] %vm734_vm3, %v2403_v0 }
 0x1da   : > { %v2413_v27 = vpop.permute.xlu2 %2412 }
 0x1db   : > { %2418 = vst.msk [vmem:[#allocation3] sm:$0xff] %vm746_vm5, %v2413_v27  ;;  %v2517_v12 = vld [vmem:[#allocation3 + $0x8] sm:$0xff] }
 0x1dc   : > { %2535 = vmatpush.msrb.mxu1 %v2517_v12 }
 0x1e2   : > { %v2516_v25 = vld [vmem:[#allocation3] sm:$0xff] }
 0x1e3   : > { %2536 = vmatpush.msrb.mxu1 %v2516_v25  ;;  %v1430_v30 = vpop.f32.mrf.mxu2 }
 0x1e4   : > { %2998 = vmatmul.msk.f32.vlgmr.msrb.gmra.mxu1 %vm851_vm9, %v5952_v23  ;;  %2861 = vmatmul.msk.f32.vlgmr.msra.gmra.mxu3 %vm883_vm10, %v1430_v30 }
 0x1eb   : > { %v1433_v50 = vpop.f32.mrf.mxu2 }
 0x1ec   : > { %2999 = vmatmul.msk.f32.gmra.mxu1 %vm851_vm9, %v3174_v46  ;;  %2862 = vmatmul.msk.f32.gmra.mxu3 %vm883_vm10, %v1433_v50 }
 0x21a   : > { %v907_v48 = vpop.f32.mrf.mxu1 }
 0x21b   : > { %v908_v20 = vadd.f32 %v907_v48, %v882_v54 }
 0x21f   : > { %v1984_v10 = vpop.f32.mrf.mxu0 }
 0x220   : > { %2931 = vmatmul.msk.f32.vlgmr.msrb.gmra.mxu2 %vm883_vm10, %v1984_v10 }
 0x222   : > { %v910_v55 = vpop.f32.mrf.mxu1 }
 0x223   : > { %v911_v43 = vadd.f32 %v910_v55, %v882_v54 }
 0x225   : > { %914 = vrot.lane.b32.xlu0 %v911_v43, %s6154_s9 }
 0x227   : > { %v1987_v19 = vpop.f32.mrf.mxu0 }
 0x228   : > { %2932 = vmatmul.msk.f32.gmra.mxu2 %vm883_vm10, %v1987_v19 }
 0x261   : > { %v2538_v45 = vpop.f32.mrf.mxu1 }
 0x262   : > { %3001 = vmatmul.msk.f32.vlgmr.msrb.gmra.mxu3 %vm883_vm10, %v2538_v45 }
 0x267   : > { %v1461_v52 = vpop.f32.mrf.mxu3 }
 0x268   : > { %v1462_v28 = vadd.f32 %v1461_v52, %v1437_v6 }
 0x269   : > { %v2541_v1 = vpop.f32.mrf.mxu1 }
 0x26a   : > { %3002 = vmatmul.msk.f32.gmra.mxu3 %vm883_vm10, %v2541_v1 }
 0x26f   : > { %v1464_v13 = vpop.f32.mrf.mxu3 }
 0x270   : > { %v1465_v62 = vadd.f32 %v1464_v13, %v1437_v6 }
 0x272   : > { %1468 = vrot.lane.b32.xlu1 %v1465_v62, %s6154_s9 }
 0x297   : > { %v915_v33 = vpop.permute.xlu0 %914 }
 0x298   : > { %v918_v22 = vsel %vm917_vm11, %v908_v20, %v915_v33 }
 0x299   : > { %919 = vst.msk [vmem:[%s6010_s26] sm:$0xff] %vm883_vm10, %v918_v22 }
 0x2a3   : > { %v2015_v39 = vpop.f32.mrf.mxu2 }
 0x2a4   : > { %v2016_v17 = vadd.f32 %v2015_v39, %v1991_v4 }
 0x2ab   : > { %v2018_v29 = vpop.f32.mrf.mxu2 }
 0x2ac   : > { %v2019_v44 = vadd.f32 %v2018_v29, %v1991_v4 }
 0x2ae   : > { %2022 = vrot.lane.b32.xlu2 %v2019_v44, %s6154_s9 }
 0x2e4   : > { %v1469_v3 = vpop.permute.xlu1 %1468 }
 0x2e5   : > { %v2569_v56 = vpop.f32.mrf.mxu3  ;;  %v1471_v5 = vsel %vm917_vm11, %v1462_v28, %v1469_v3 }
 0x2e6   : > { %v2570_v7 = vadd.f32 %v2569_v56, %v2545_v26  ;;  %2863 = vst.msk [vmem:[%s6010_s26 + $0x8] sm:$0xff] %vm883_vm10, %v1471_v5 }
 0x2ed   : > { %v2572_v23 = vpop.f32.mrf.mxu3 }
 0x2ee   : > { %v2573_v14 = vadd.f32 %v2572_v23, %v2545_v26 }
 0x2f0   : > { %2576 = vrot.lane.b32.xlu0 %v2573_v14, %s6154_s9  ;;  %s2583_s9 = scalar_lea.sflag [#allocation6], %s283_s17 }
 0x308   : > { %v2023_v18 = vpop.permute.xlu2 %2022 }
 0x309   : > { %v2025_v42 = vsel %vm917_vm11, %v2016_v17, %v2023_v18 }
 0x30a   : > { %2933 = vst.msk [vmem:[%s6010_s26 + $0x10] sm:$0xff] %vm883_vm10, %v2025_v42 }
 0x362   : > { %v2577_v24 = vpop.permute.xlu0 %2576 }
 0x363   : > { %v2579_v46 = vsel %vm917_vm11, %v2570_v7, %v2577_v24 }
 0x364   : > { %3003 = vst.msk [vmem:[%s6010_s26 + $0x18] sm:$0xff] %vm883_vm10, %v2579_v46 }
 0x365   : > { %3262 = shalt.err (!%p3259_p9)
}
 0x366   : > { %s3374_s6 = smov 128   ;;  %s3375_s12 = smov 256  }
 0x367   : > { %s3376_s3 = smov 8  }
 0x368   : > { %3020 = dma.vmem_to_hbm [thread:$0]  (%p3486_p10), %s2597_s14, 512, %s2599_s28, %s2583_s9, %s3374_s6, %s3375_s12, %s3376_s3  }
 0x369 PF: > { %s6181_s17 = sld [smem:[#allocation25_spill]] }
 0x36a   : > { %s6182_s1 = sld [smem:[#allocation16_spill]] }
 0x36f   : > { %p3042_p11 = scmp.ge.s32.totalorder %s6181_s17, 2 }
 0x370   : > { %s2613_s4 = sand.u32 1, %s6182_s1  }
 0x371   : > { %p3034_p13 = pnand %p3042_p11, %p3491_p12  ;;  %s2614_s23 = scalar_lea.sflag [#allocation6], %s2613_s4 }
 0x373   : > { %p3035_p6 = pneg %p3034_p13 }
 0x375   : > { %3320 = dma.done.wait (%p3035_p6), %s2614_s23, 512  }
 0x376   : > { %3322 = vsyncadd (%p3035_p6), %s2614_s23, 4294966784  ;;  %s23_s28 = sadd.s32 1, %s6181_s17   ;;  %s6184_s18 = sld [smem:[#allocation17_spill]] }
 0x377   : > { %p20_p0 = scmp.ge.s32.totalorder %s23_s28, 6   ;;  %s6185_s19 = sld [smem:[#allocation18_spill]] }
 0x378   : > { %s6186_s20 = sld [smem:[#allocation31_spill]] }
 0x379   : > { %s6187_s21 = sld [smem:[#allocation19_spill]] }
 0x37a   : > { %s6188_s22 = sld [smem:[#allocation20_spill]] }
 0x37b   : > { %s6189_s23 = sld [smem:[#allocation30_spill]]  ;;  %22 = sbr.rel (!%p20_p0) target bundleno = 18 (0x12), region = 103 }
 0x37c   : > { %s6190_s24 = sld [smem:[#allocation23_spill]] }
 0x37d   : > { %s6191_s25 = sld [smem:[#allocation24_spill]] }
 0x37e   : > { %s6192_s26 = sld [smem:[#allocation28_spill]] }
 0x37f   : > { %s6193_s27 = sld [smem:[#allocation29_spill]] }
 0x380   :  { %2620 = vsyncpa [#allocation5], 1 }
 0x381   :  { %2622 = vsyncpa [#allocation5 + $0x1], 1 }
 0x382   :  { %2623 = vsyncpa [#allocation6], 1 }
 0x383   :  { %2625 = vsyncpa [#allocation6 + $0x1], 1 }
 0x384   :  { %2626 = vsyncpa [#allocation7], 1 }
 0x385   :  { %2628 = vsyncpa [#allocation7 + $0x1], 1 }
 0x386   :  { %2629 = vsyncpa [#allocation10], 1 }

</bundles_post_ra>
